<compile_context>
chip_gen: v5e
topology: v5e:2x2
jax: 0.10.0
libtpu: 0.0.40
codegen_flags: <defaults>
</compile_context>

<pallas_src>
import jax
import jax.numpy as jnp
from jax import lax
from jax.experimental import pallas as pl
from jax.experimental.pallas import tpu as pltpu


DIM_INPUT = 96
N_CLASSES = 2
REEIG_EPS = 1e-4


def _pick_bb(batch, block_b):
    """Batch tile size. Full batch when it fits; otherwise block_b, which must be a
    multiple of 16 so that bb*48 and bb*24 lane blocks are multiples of 128."""
    if batch <= block_b:
        return batch
    assert block_b % 16 == 0, "block_b must be a multiple of 16 for lane-dense packing"
    return block_b


# -----------------------------------------------------------------------------
# Kernel A: BiMap stage 1  — Y_b = W^T X_b W, output packed batch-along-lanes.
# -----------------------------------------------------------------------------
def bimap1(x, w, wt, *, block_b=32):
    """x:(B,N,N) symmetric, w:(N,M), wt:(M,N)=W^T  ->  (M, B*M) with block b = Y_b."""
    B, N, _ = x.shape
    M = w.shape[1]
    bb = _pick_bb(B, block_b)
    x_tall = x.reshape(B * N, N)          # free XLA reshape: batch stacked along rows

    def kernel(x_ref, w_ref, wt_ref, o_ref, t_ref):
        n, m = w_ref.shape
        nb = o_ref.shape[1] // m
        w_ = w_ref[...]
        # Stage 1 + repack: T_b = X_b W written straight to lane offset b*m of the
        # scratch (bounded live ranges; the store is the batch->lane repack).
        for b in range(nb):
            t_ref[:, b * m:(b + 1) * m] = jnp.dot(
                x_ref[b * n:(b + 1) * n, :], w_, preferred_element_type=jnp.float32)
        # Stage 2: one wide lane-dense GEMM  (M,N) @ (N, nb*M) -> (M, nb*M).
        o_ref[...] = jnp.dot(wt_ref[...], t_ref[...],
                             preferred_element_type=jnp.float32)

    return pl.pallas_call(
        kernel,
        out_shape=jax.ShapeDtypeStruct((M, B * M), jnp.float32),
        grid=(pl.cdiv(B, bb),),
        in_specs=[
            pl.BlockSpec((bb * N, N), lambda i: (i, 0)),
            pl.BlockSpec((N, M), lambda i: (0, 0)),
            pl.BlockSpec((M, N), lambda i: (0, 0)),
        ],
        out_specs=pl.BlockSpec((M, bb * M), lambda i: (0, i)),
        scratch_shapes=[pltpu.VMEM((N, bb * M), jnp.float32)],
        compiler_params=pltpu.CompilerParams(dimension_semantics=("parallel",)),
    )(x_tall, w, wt)


# -----------------------------------------------------------------------------
# Kernel B: fused ReEig rebuild + BiMap stage 2 on batch-along-lanes layout.
#   P = W^T U ; Q = P * max(s,eps) ; Y_b = Q_b @ P_b^T
# -----------------------------------------------------------------------------
def reeig_bimap(u_wide, s_wide, wt, *, block_b=32):
    """u_wide:(N, B*N) eigvecs packed along lanes, s_wide:(1, B*N), wt:(M,N)=W^T
       ->  (M, B*M) with block b = W^T ReEig(Y_b) W."""
    N = u_wide.shape[0]
    B = u_wide.shape[1] // N
    M = wt.shape[0]
    bb = _pick_bb(B, block_b)

    def kernel(u_ref, s_ref, wt_ref, o_ref, p_ref, q_ref):
        m, n = wt_ref.shape
        nb = o_ref.shape[1] // m
        # Single wide shared-weight GEMM over the whole batch block (lane-dense).
        p_ref[...] = jnp.dot(wt_ref[...], u_ref[...],
                             preferred_element_type=jnp.float32)          # (M, nb*N)
        # ReEig clamp folded as a column scale: W^T U diag(f) == (W^T U) * f  (VPU).
        q_ref[...] = p_ref[...] * jnp.maximum(s_ref[...], REEIG_EPS)
        # Per-matrix closing product Q_b @ P_b^T (trans-rhs dot_general, no transpose).
        for b in range(nb):
            o_ref[:, b * m:(b + 1) * m] = lax.dot_general(
                q_ref[:, b * n:(b + 1) * n], p_ref[:, b * n:(b + 1) * n],
                (((1,), (1,)), ((), ())), preferred_element_type=jnp.float32)

    return pl.pallas_call(
        kernel,
        out_shape=jax.ShapeDtypeStruct((M, B * M), jnp.float32),
        grid=(pl.cdiv(B, bb),),
        in_specs=[
            pl.BlockSpec((N, bb * N), lambda i: (0, i)),
            pl.BlockSpec((1, bb * N), lambda i: (0, i)),
            pl.BlockSpec((M, N), lambda i: (0, 0)),
        ],
        out_specs=pl.BlockSpec((M, bb * M), lambda i: (0, i)),
        scratch_shapes=[pltpu.VMEM((M, bb * N), jnp.float32),
                        pltpu.VMEM((M, bb * N), jnp.float32)],
        compiler_params=pltpu.CompilerParams(dimension_semantics=("parallel",)),
    )(u_wide, s_wide, wt)


# -----------------------------------------------------------------------------
# Kernel C: LogEig rebuild (replaces ReEig2-rebuild + third eigh + LogEig)
#   Z_b = U diag(log(max(s, eps))) U^T
# -----------------------------------------------------------------------------
def logeig_rebuild(u, s, *, block_b=32):
    B, N, _ = u.shape
    bb = min(B, block_b)
    s_r = s.reshape(B, 1, N).astype(jnp.float32)

    def kernel(u_ref, s_ref, o_ref):
        nb = o_ref.shape[0]
        for b in range(nb):
            ub = u_ref[b]                                     # (N, N)
            g = jnp.log(jnp.maximum(s_ref[b], REEIG_EPS))     # clamp first: no -inf/NaN
            o_ref[b] = lax.dot_general(ub * g, ub, (((1,), (1,)), ((), ())),
                                       preferred_element_type=jnp.float32)

    return pl.pallas_call(
        kernel,
        out_shape=jax.ShapeDtypeStruct((B, N, N), jnp.float32),
        grid=(pl.cdiv(B, bb),),
        in_specs=[
            pl.BlockSpec((bb, N, N), lambda i: (i, 0, 0)),
            pl.BlockSpec((bb, 1, N), lambda i: (i, 0, 0)),
        ],
        out_specs=pl.BlockSpec((bb, N, N), lambda i: (i, 0, 0)),
        compiler_params=pltpu.CompilerParams(dimension_semantics=("parallel",)),
    )(u, s_r)


# -----------------------------------------------------------------------------
# Kernel D: MLP head with the triu gather folded into the first Linear.
#   logits = ((vec(Z) @ W1c + b1) @ W2 + b2) @ W3 + b3
# -----------------------------------------------------------------------------
def mlp_head(zflat, w1c, b1, w2, b2, w3, b3, *, block_rows=256):
    B, F = zflat.shape
    C = w3.shape[1]
    tb = min(B, block_rows)

    def kernel(z_ref, w1_ref, b1_ref, w2_ref, b2_ref, w3_ref, b3_ref, o_ref):
        h = jnp.dot(z_ref[...], w1_ref[...], preferred_element_type=jnp.float32) + b1_ref[...]
        h = jnp.dot(h, w2_ref[...], preferred_element_type=jnp.float32) + b2_ref[...]
        o_ref[...] = jnp.dot(h, w3_ref[...], preferred_element_type=jnp.float32) + b3_ref[...]

    return pl.pallas_call(
        kernel,
        out_shape=jax.ShapeDtypeStruct((B, C), jnp.float32),
        grid=(pl.cdiv(B, tb),),
        in_specs=[
            pl.BlockSpec((tb, F), lambda i: (i, 0)),
            pl.BlockSpec(w1c.shape, lambda i: (0, 0)),
            pl.BlockSpec(b1.shape, lambda i: (0, 0)),
            pl.BlockSpec(w2.shape, lambda i: (0, 0)),
            pl.BlockSpec(b2.shape, lambda i: (0, 0)),
            pl.BlockSpec(w3.shape, lambda i: (0, 0)),
            pl.BlockSpec(b3.shape, lambda i: (0, 0)),
        ],
        out_specs=pl.BlockSpec((tb, C), lambda i: (i, 0)),
        compiler_params=pltpu.CompilerParams(dimension_semantics=("parallel",)),
    )(zflat, w1c, b1, w2, b2, w3, b3)


# -----------------------------------------------------------------------------
# Parameters & forward
# -----------------------------------------------------------------------------
def make_params(key):
    """Deterministic init matching SPDnet.__init__ shapes (f32 instead of f64)."""
    d = DIM_INPUT
    n4 = d // 4
    keys = jax.random.split(key, 8)

    # BiMap Stiefel weights (semi-orthogonal columns), like nn_spd.BiMap.
    w_bimap1 = jnp.linalg.qr(
        jax.random.normal(keys[0], (d, d // 2), dtype=jnp.float32))[0]
    w_bimap2 = jnp.linalg.qr(
        jax.random.normal(keys[1], (d // 2, d // 4), dtype=jnp.float32))[0]

    def linear(kw, kb, fan_in, fan_out):
        lim = 1.0 / jnp.sqrt(jnp.float32(fan_in))
        w = jax.random.uniform(kw, (fan_in, fan_out), jnp.float32, -lim, lim)
        b = jax.random.uniform(kb, (1, fan_out), jnp.float32, -lim, lim)
        return w, b

    w1, b1 = linear(keys[2], keys[3], n4 * (n4 + 1) // 2, 64)   # 300 -> 64
    w2, b2 = linear(keys[4], keys[5], 64, 32)
    w3, b3 = linear(keys[6], keys[7], 32, N_CLASSES)

    # Fold the torch.triu_indices gather into the first Linear:
    #   Z[:, iu0, iu1] @ w1  ==  vec(Z) @ w1c   (row-major vec, same ordering).
    iu0, iu1 = jnp.triu_indices(n4)
    flat_idx = iu0 * n4 + iu1
    w1c = jnp.zeros((n4 * n4, 64), jnp.float32).at[flat_idx].set(w1)

    return dict(w_bimap1=w_bimap1, w_bimap2=w_bimap2,
                w1c=w1c, b1=b1, w2=w2, b2=b2, w3=w3, b3=b3)


def spdnet_forward(params, x):
    """x: (B, 1, 96, 96) SPD matrices (dummy channel dim, as in PyTorch)."""
    xb = x[:, 0].astype(jnp.float32)                     # (B, 96, 96)
    B = xb.shape[0]
    n2 = DIM_INPUT // 2                                  # 48
    n4 = DIM_INPUT // 4                                  # 24

    w1b = params["w_bimap1"]                             # (96, 48)
    w2b = params["w_bimap2"]                             # (48, 24)

    # BiMap1 — output packed batch-along-lanes; Y1 is symmetric so the unpack is exact.
    y1w = bimap1(xb, w1b, w1b.T)                         # (48, B*48)
    y1 = y1w.reshape(n2, B, n2).transpose(1, 0, 2)       # (B, 48, 48)

    # ReEig1 + BiMap2 (fused; eigh stays in XLA, symmetrizes its input).
    s1, u1 = jnp.linalg.eigh(y1)
    u1w = u1.transpose(1, 0, 2).reshape(n2, B * n2)      # batch-along-lanes pack (cheap)
    s1w = s1.reshape(1, B * n2)
    y2w = reeig_bimap(u1w, s1w, w2b.T)                   # (24, B*24)
    y2 = y2w.reshape(n4, B, n4).transpose(1, 0, 2)       # (B, 24, 24)

    # ReEig2 + LogEig: eigh(ReEig(Y2)) shares U2, so rebuild once with log(max(s,eps)).
    s2, u2 = jnp.linalg.eigh(y2)
    z = logeig_rebuild(u2, s2)                           # (B, 24, 24)

    # Row-major flatten (free XLA reshape) + folded-triu MLP head.
    zflat = z.reshape(B, n4 * n4)                        # (B, 576)
    return mlp_head(zflat, params["w1c"], params["b1"],
                    params["w2"], params["b2"],
                    params["w3"], params["b3"])          # (B, 2)


# -----------------------------------------------------------------------------
if __name__ == "__main__":
    key = jax.random.PRNGKey(0)
    k_x, k_p = jax.random.split(key)

    B = 2
    # Deterministic SPD input: X = A A^T / d + 0.1 I  (exactly symmetric)
    a = jax.random.normal(k_x, (B, 1, DIM_INPUT, DIM_INPUT), dtype=jnp.float32)
    x = jnp.einsum("bcij,bckj->bcik", a, a) / DIM_INPUT \
        + 0.1 * jnp.eye(DIM_INPUT, dtype=jnp.float32)[None, None]

    params = make_params(k_p)

    fwd = jax.jit(spdnet_forward)
    out = jax.block_until_ready(fwd(params, x))
    assert out.shape == (B, N_CLASSES) and out.dtype == jnp.float32
    assert bool(jnp.all(jnp.isfinite(out)))
    print("KERNEL_OK")
</pallas_src>

<mosaic_0001>
module attributes {stable_mosaic.version = 11 : i64} {
  func.func @kernel(%arg0: i32, %arg1: memref<192x96xf32, #tpu.memory_space<vmem>>, %arg2: memref<96x48xf32, #tpu.memory_space<vmem>>, %arg3: memref<48x96xf32, #tpu.memory_space<vmem>>, %arg4: memref<48x96xf32, #tpu.memory_space<vmem>>, %arg5: memref<96x96xf32, #tpu.memory_space<vmem>>) attributes {dimension_semantics = [#tpu.dimension_semantics<parallel>], iteration_bounds = array<i64: 1>, scalar_prefetch = 0 : i64, scratch_operands = 1 : i64, tpu.core_type = #tpu.core_type<tc>, window_params = [{transform_indices = @transform_0, window_bounds = array<i64: 192, 96>}, {pipeline_mode = #tpu.pipeline_mode<synchronous>, transform_indices = @transform_1, window_bounds = array<i64: 96, 48>}, {pipeline_mode = #tpu.pipeline_mode<synchronous>, transform_indices = @transform_2, window_bounds = array<i64: 48, 96>}, {transform_indices = @transform_3, window_bounds = array<i64: 48, 96>}]} {
    %c0 = arith.constant 0 : index
    %c0_0 = arith.constant 0 : index
    %0 = vector.load %arg2[%c0, %c0_0] : memref<96x48xf32, #tpu.memory_space<vmem>>, vector<96x48xf32>
    %c0_1 = arith.constant 0 : index
    %c0_2 = arith.constant 0 : index
    %1 = vector.load %arg1[%c0_1, %c0_2] : memref<192x96xf32, #tpu.memory_space<vmem>>, vector<96x96xf32>
    %cst = arith.constant dense<0.000000e+00> : vector<96x48xf32>
    %2 = tpu.matmul %1, %0, %cst {dimension_numbers = #tpu.dot_dimension_numbers<[1], [0], [0], [1], [0, 0, 1, 1], [], []>} : vector<96x96xf32>, vector<96x48xf32>, vector<96x48xf32> -> vector<96x48xf32>
    %c0_3 = arith.constant 0 : index
    %c0_4 = arith.constant 0 : index
    %3 = vector.load %arg5[%c0_3, %c0_4] : memref<96x96xf32, #tpu.memory_space<vmem>>, vector<96x48xf32>
    tpu.vector_store %arg5[%c0_3, %c0_4], %2 {strides = array<i32>} : memref<96x96xf32, #tpu.memory_space<vmem>>, vector<96x48xf32>,
    %c96 = arith.constant 96 : index
    %c0_5 = arith.constant 0 : index
    %4 = vector.load %arg1[%c96, %c0_5] : memref<192x96xf32, #tpu.memory_space<vmem>>, vector<96x96xf32>
    %cst_6 = arith.constant dense<0.000000e+00> : vector<96x48xf32>
    %5 = tpu.matmul %4, %0, %cst_6 {dimension_numbers = #tpu.dot_dimension_numbers<[1], [0], [0], [1], [0, 0, 1, 1], [], []>} : vector<96x96xf32>, vector<96x48xf32>, vector<96x48xf32> -> vector<96x48xf32>
    %c0_7 = arith.constant 0 : index
    %c48 = arith.constant 48 : index
    %6 = vector.load %arg5[%c0_7, %c48] : memref<96x96xf32, #tpu.memory_space<vmem>>, vector<96x48xf32>
    tpu.vector_store %arg5[%c0_7, %c48], %5 {strides = array<i32>} : memref<96x96xf32, #tpu.memory_space<vmem>>, vector<96x48xf32>,
    %c0_8 = arith.constant 0 : index
    %c0_9 = arith.constant 0 : index
    %7 = vector.load %arg3[%c0_8, %c0_9] : memref<48x96xf32, #tpu.memory_space<vmem>>, vector<48x96xf32>
    %c0_10 = arith.constant 0 : index
    %c0_11 = arith.constant 0 : index
    %8 = vector.load %arg5[%c0_10, %c0_11] : memref<96x96xf32, #tpu.memory_space<vmem>>, vector<96x96xf32>
    %cst_12 = arith.constant dense<0.000000e+00> : vector<48x96xf32>
    %9 = tpu.matmul %7, %8, %cst_12 {dimension_numbers = #tpu.dot_dimension_numbers<[1], [0], [0], [1], [0, 0, 1, 1], [], []>} : vector<48x96xf32>, vector<96x96xf32>, vector<48x96xf32> -> vector<48x96xf32>
    %c0_13 = arith.constant 0 : index
    %c0_14 = arith.constant 0 : index
    %10 = vector.load %arg4[%c0_13, %c0_14] : memref<48x96xf32, #tpu.memory_space<vmem>>, vector<48x96xf32>
    tpu.vector_store %arg4[%c0_13, %c0_14], %9 {strides = array<i32>} : memref<48x96xf32, #tpu.memory_space<vmem>>, vector<48x96xf32>,
    return
  }
  func.func @transform_0(%arg0: i32) -> (i32, i32) {
    %c0_i32 = arith.constant 0 : i32
    %c0_i32_0 = arith.constant 0 : i32
    return %arg0, %c0_i32 : i32, i32
  }
  func.func @transform_1(%arg0: i32) -> (i32, i32) {
    %c0_i32 = arith.constant 0 : i32
    %c0_i32_0 = arith.constant 0 : i32
    %c0_i32_1 = arith.constant 0 : i32
    return %c0_i32, %c0_i32_0 : i32, i32
  }
  func.func @transform_2(%arg0: i32) -> (i32, i32) {
    %c0_i32 = arith.constant 0 : i32
    %c0_i32_0 = arith.constant 0 : i32
    %c0_i32_1 = arith.constant 0 : i32
    return %c0_i32, %c0_i32_0 : i32, i32
  }
  func.func @transform_3(%arg0: i32) -> (i32, i32) {
    %c0_i32 = arith.constant 0 : i32
    %c0_i32_0 = arith.constant 0 : i32
    return %c0_i32, %arg0 : i32, i32
  }
}

module attributes {stable_mosaic.version = 11 : i64} {
  func.func @kernel(%arg0: i32, %arg1: memref<48x96xf32, #tpu.memory_space<vmem>>, %arg2: memref<1x96xf32, #tpu.memory_space<vmem>>, %arg3: memref<24x48xf32, #tpu.memory_space<vmem>>, %arg4: memref<24x48xf32, #tpu.memory_space<vmem>>, %arg5: memref<24x96xf32, #tpu.memory_space<vmem>>, %arg6: memref<24x96xf32, #tpu.memory_space<vmem>>) attributes {dimension_semantics = [#tpu.dimension_semantics<parallel>], iteration_bounds = array<i64: 1>, scalar_prefetch = 0 : i64, scratch_operands = 2 : i64, tpu.core_type = #tpu.core_type<tc>, window_params = [{transform_indices = @transform_0, window_bounds = array<i64: 48, 96>}, {transform_indices = @transform_1, window_bounds = array<i64: 1, 96>}, {pipeline_mode = #tpu.pipeline_mode<synchronous>, transform_indices = @transform_2, window_bounds = array<i64: 24, 48>}, {transform_indices = @transform_3, window_bounds = array<i64: 24, 48>}]} {
    %c0 = arith.constant 0 : index
    %c0_0 = arith.constant 0 : index
    %0 = vector.load %arg3[%c0, %c0_0] : memref<24x48xf32, #tpu.memory_space<vmem>>, vector<24x48xf32>
    %c0_1 = arith.constant 0 : index
    %c0_2 = arith.constant 0 : index
    %1 = vector.load %arg1[%c0_1, %c0_2] : memref<48x96xf32, #tpu.memory_space<vmem>>, vector<48x96xf32>
    %cst = arith.constant dense<0.000000e+00> : vector<24x96xf32>
    %2 = tpu.matmul %0, %1, %cst {dimension_numbers = #tpu.dot_dimension_numbers<[1], [0], [0], [1], [0, 0, 1, 1], [], []>} : vector<24x48xf32>, vector<48x96xf32>, vector<24x96xf32> -> vector<24x96xf32>
    %c0_3 = arith.constant 0 : index
    %c0_4 = arith.constant 0 : index
    %3 = vector.load %arg5[%c0_3, %c0_4] : memref<24x96xf32, #tpu.memory_space<vmem>>, vector<24x96xf32>
    tpu.vector_store %arg5[%c0_3, %c0_4], %2 {strides = array<i32>} : memref<24x96xf32, #tpu.memory_space<vmem>>, vector<24x96xf32>,
    %c0_5 = arith.constant 0 : index
    %c0_6 = arith.constant 0 : index
    %4 = vector.load %arg5[%c0_5, %c0_6] : memref<24x96xf32, #tpu.memory_space<vmem>>, vector<24x96xf32>
    %c0_7 = arith.constant 0 : index
    %c0_8 = arith.constant 0 : index
    %5 = vector.load %arg2[%c0_7, %c0_8] : memref<1x96xf32, #tpu.memory_space<vmem>>, vector<1x96xf32>
    %cst_9 = arith.constant 9.99999974E-5 : f32
    %6 = vector.broadcast %cst_9 : f32 to vector<1x96xf32>
    %7 = arith.maximumf %5, %6 : vector<1x96xf32>
    %8 = vector.broadcast %7 : vector<1x96xf32> to vector<24x96xf32>
    %9 = arith.mulf %4, %8 : vector<24x96xf32>
    %c0_10 = arith.constant 0 : index
    %c0_11 = arith.constant 0 : index
    %10 = vector.load %arg6[%c0_10, %c0_11] : memref<24x96xf32, #tpu.memory_space<vmem>>, vector<24x96xf32>
    tpu.vector_store %arg6[%c0_10, %c0_11], %9 {strides = array<i32>} : memref<24x96xf32, #tpu.memory_space<vmem>>, vector<24x96xf32>,
    %c0_12 = arith.constant 0 : index
    %c0_13 = arith.constant 0 : index
    %11 = vector.load %arg6[%c0_12, %c0_13] : memref<24x96xf32, #tpu.memory_space<vmem>>, vector<24x48xf32>
    %c0_14 = arith.constant 0 : index
    %c0_15 = arith.constant 0 : index
    %12 = vector.load %arg5[%c0_14, %c0_15] : memref<24x96xf32, #tpu.memory_space<vmem>>, vector<24x48xf32>
    %cst_16 = arith.constant dense<0.000000e+00> : vector<24x24xf32>
    %13 = tpu.matmul %11, %12, %cst_16 {dimension_numbers = #tpu.dot_dimension_numbers<[1], [1], [0], [0], [0, 0, 1, 0], [], []>} : vector<24x48xf32>, vector<24x48xf32>, vector<24x24xf32> -> vector<24x24xf32>
    %c0_17 = arith.constant 0 : index
    %c0_18 = arith.constant 0 : index
    %14 = vector.load %arg4[%c0_17, %c0_18] : memref<24x48xf32, #tpu.memory_space<vmem>>, vector<24x24xf32>
    tpu.vector_store %arg4[%c0_17, %c0_18], %13 {strides = array<i32>} : memref<24x48xf32, #tpu.memory_space<vmem>>, vector<24x24xf32>,
    %c0_19 = arith.constant 0 : index
    %c48 = arith.constant 48 : index
    %15 = vector.load %arg6[%c0_19, %c48] : memref<24x96xf32, #tpu.memory_space<vmem>>, vector<24x48xf32>
    %c0_20 = arith.constant 0 : index
    %c48_21 = arith.constant 48 : index
    %16 = vector.load %arg5[%c0_20, %c48_21] : memref<24x96xf32, #tpu.memory_space<vmem>>, vector<24x48xf32>
    %cst_22 = arith.constant dense<0.000000e+00> : vector<24x24xf32>
    %17 = tpu.matmul %15, %16, %cst_22 {dimension_numbers = #tpu.dot_dimension_numbers<[1], [1], [0], [0], [0, 0, 1, 0], [], []>} : vector<24x48xf32>, vector<24x48xf32>, vector<24x24xf32> -> vector<24x24xf32>
    %c0_23 = arith.constant 0 : index
    %c24 = arith.constant 24 : index
    %18 = vector.load %arg4[%c0_23, %c24] : memref<24x48xf32, #tpu.memory_space<vmem>>, vector<24x24xf32>
    tpu.vector_store %arg4[%c0_23, %c24], %17 {strides = array<i32>} : memref<24x48xf32, #tpu.memory_space<vmem>>, vector<24x24xf32>,
    return
  }
  func.func @transform_0(%arg0: i32) -> (i32, i32) {
    %c0_i32 = arith.constant 0 : i32
    %c0_i32_0 = arith.constant 0 : i32
    return %c0_i32, %arg0 : i32, i32
  }
  func.func @transform_1(%arg0: i32) -> (i32, i32) {
    %c0_i32 = arith.constant 0 : i32
    %c0_i32_0 = arith.constant 0 : i32
    return %c0_i32, %arg0 : i32, i32
  }
  func.func @transform_2(%arg0: i32) -> (i32, i32) {
    %c0_i32 = arith.constant 0 : i32
    %c0_i32_0 = arith.constant 0 : i32
    %c0_i32_1 = arith.constant 0 : i32
    return %c0_i32, %c0_i32_0 : i32, i32
  }
  func.func @transform_3(%arg0: i32) -> (i32, i32) {
    %c0_i32 = arith.constant 0 : i32
    %c0_i32_0 = arith.constant 0 : i32
    return %c0_i32, %arg0 : i32, i32
  }
}

module attributes {stable_mosaic.version = 11 : i64} {
  func.func @kernel(%arg0: i32, %arg1: memref<2x24x24xf32, #tpu.memory_space<vmem>>, %arg2: memref<2x1x24xf32, #tpu.memory_space<vmem>>, %arg3: memref<2x24x24xf32, #tpu.memory_space<vmem>>) attributes {dimension_semantics = [#tpu.dimension_semantics<parallel>], iteration_bounds = array<i64: 1>, scalar_prefetch = 0 : i64, scratch_operands = 0 : i64, tpu.core_type = #tpu.core_type<tc>, window_params = [{transform_indices = @transform_0, window_bounds = array<i64: 2, 24, 24>}, {transform_indices = @transform_1, window_bounds = array<i64: 2, 1, 24>}, {transform_indices = @transform_2, window_bounds = array<i64: 2, 24, 24>}]} {
    %c0 = arith.constant 0 : index
    %c0_0 = arith.constant 0 : index
    %c0_1 = arith.constant 0 : index
    %0 = vector.load %arg1[%c0, %c0_0, %c0_1] : memref<2x24x24xf32, #tpu.memory_space<vmem>>, vector<1x24x24xf32>
    %1 = vector.shape_cast %0 : vector<1x24x24xf32> to vector<24x24xf32>
    %c0_2 = arith.constant 0 : index
    %c0_3 = arith.constant 0 : index
    %c0_4 = arith.constant 0 : index
    %2 = vector.load %arg2[%c0_2, %c0_3, %c0_4] : memref<2x1x24xf32, #tpu.memory_space<vmem>>, vector<1x1x24xf32>
    %3 = vector.shape_cast %2 : vector<1x1x24xf32> to vector<1x24xf32>
    %cst = arith.constant 9.99999974E-5 : f32
    %4 = vector.broadcast %cst : f32 to vector<1x24xf32>
    %5 = arith.maximumf %3, %4 : vector<1x24xf32>
    %6 = math.log %5 : vector<1x24xf32>
    %7 = vector.broadcast %6 : vector<1x24xf32> to vector<24x24xf32>
    %8 = arith.mulf %1, %7 : vector<24x24xf32>
    %cst_5 = arith.constant dense<0.000000e+00> : vector<24x24xf32>
    %9 = tpu.matmul %8, %1, %cst_5 {dimension_numbers = #tpu.dot_dimension_numbers<[1], [1], [0], [0], [0, 0, 1, 0], [], []>} : vector<24x24xf32>, vector<24x24xf32>, vector<24x24xf32> -> vector<24x24xf32>
    %c0_6 = arith.constant 0 : index
    %c0_7 = arith.constant 0 : index
    %c0_8 = arith.constant 0 : index
    %10 = vector.load %arg3[%c0_6, %c0_7, %c0_8] : memref<2x24x24xf32, #tpu.memory_space<vmem>>, vector<1x24x24xf32>
    %11 = vector.shape_cast %10 : vector<1x24x24xf32> to vector<24x24xf32>
    %12 = vector.shape_cast %9 : vector<24x24xf32> to vector<1x24x24xf32>
    tpu.vector_store %arg3[%c0_6, %c0_7, %c0_8], %12 {strides = array<i32>} : memref<2x24x24xf32, #tpu.memory_space<vmem>>, vector<1x24x24xf32>,
    %c1 = arith.constant 1 : index
    %c0_9 = arith.constant 0 : index
    %c0_10 = arith.constant 0 : index
    %13 = vector.load %arg1[%c1, %c0_9, %c0_10] : memref<2x24x24xf32, #tpu.memory_space<vmem>>, vector<1x24x24xf32>
    %14 = vector.shape_cast %13 : vector<1x24x24xf32> to vector<24x24xf32>
    %c1_11 = arith.constant 1 : index
    %c0_12 = arith.constant 0 : index
    %c0_13 = arith.constant 0 : index
    %15 = vector.load %arg2[%c1_11, %c0_12, %c0_13] : memref<2x1x24xf32, #tpu.memory_space<vmem>>, vector<1x1x24xf32>
    %16 = vector.shape_cast %15 : vector<1x1x24xf32> to vector<1x24xf32>
    %cst_14 = arith.constant 9.99999974E-5 : f32
    %17 = vector.broadcast %cst_14 : f32 to vector<1x24xf32>
    %18 = arith.maximumf %16, %17 : vector<1x24xf32>
    %19 = math.log %18 : vector<1x24xf32>
    %20 = vector.broadcast %19 : vector<1x24xf32> to vector<24x24xf32>
    %21 = arith.mulf %14, %20 : vector<24x24xf32>
    %cst_15 = arith.constant dense<0.000000e+00> : vector<24x24xf32>
    %22 = tpu.matmul %21, %14, %cst_15 {dimension_numbers = #tpu.dot_dimension_numbers<[1], [1], [0], [0], [0, 0, 1, 0], [], []>} : vector<24x24xf32>, vector<24x24xf32>, vector<24x24xf32> -> vector<24x24xf32>
    %c1_16 = arith.constant 1 : index
    %c0_17 = arith.constant 0 : index
    %c0_18 = arith.constant 0 : index
    %23 = vector.load %arg3[%c1_16, %c0_17, %c0_18] : memref<2x24x24xf32, #tpu.memory_space<vmem>>, vector<1x24x24xf32>
    %24 = vector.shape_cast %23 : vector<1x24x24xf32> to vector<24x24xf32>
    %25 = vector.shape_cast %22 : vector<24x24xf32> to vector<1x24x24xf32>
    tpu.vector_store %arg3[%c1_16, %c0_17, %c0_18], %25 {strides = array<i32>} : memref<2x24x24xf32, #tpu.memory_space<vmem>>, vector<1x24x24xf32>,
    return
  }
  func.func @transform_0(%arg0: i32) -> (i32, i32, i32) {
    %c0_i32 = arith.constant 0 : i32
    %c0_i32_0 = arith.constant 0 : i32
    %c0_i32_1 = arith.constant 0 : i32
    return %arg0, %c0_i32, %c0_i32_0 : i32, i32, i32
  }
  func.func @transform_1(%arg0: i32) -> (i32, i32, i32) {
    %c0_i32 = arith.constant 0 : i32
    %c0_i32_0 = arith.constant 0 : i32
    %c0_i32_1 = arith.constant 0 : i32
    return %arg0, %c0_i32, %c0_i32_0 : i32, i32, i32
  }
  func.func @transform_2(%arg0: i32) -> (i32, i32, i32) {
    %c0_i32 = arith.constant 0 : i32
    %c0_i32_0 = arith.constant 0 : i32
    %c0_i32_1 = arith.constant 0 : i32
    return %arg0, %c0_i32, %c0_i32_0 : i32, i32, i32
  }
}

module attributes {stable_mosaic.version = 11 : i64} {
  func.func @kernel(%arg0: i32, %arg1: memref<2x576xf32, #tpu.memory_space<vmem>>, %arg2: memref<576x64xf32, #tpu.memory_space<vmem>>, %arg3: memref<1x64xf32, #tpu.memory_space<vmem>>, %arg4: memref<64x32xf32, #tpu.memory_space<vmem>>, %arg5: memref<1x32xf32, #tpu.memory_space<vmem>>, %arg6: memref<32x2xf32, #tpu.memory_space<vmem>>, %arg7: memref<1x2xf32, #tpu.memory_space<vmem>>, %arg8: memref<2x2xf32, #tpu.memory_space<vmem>>) attributes {dimension_semantics = [#tpu.dimension_semantics<parallel>], iteration_bounds = array<i64: 1>, scalar_prefetch = 0 : i64, scratch_operands = 0 : i64, tpu.core_type = #tpu.core_type<tc>, window_params = [{transform_indices = @transform_0, window_bounds = array<i64: 2, 576>}, {pipeline_mode = #tpu.pipeline_mode<synchronous>, transform_indices = @transform_1, window_bounds = array<i64: 576, 64>}, {pipeline_mode = #tpu.pipeline_mode<synchronous>, transform_indices = @transform_2, window_bounds = array<i64: 1, 64>}, {pipeline_mode = #tpu.pipeline_mode<synchronous>, transform_indices = @transform_3, window_bounds = array<i64: 64, 32>}, {pipeline_mode = #tpu.pipeline_mode<synchronous>, transform_indices = @transform_4, window_bounds = array<i64: 1, 32>}, {pipeline_mode = #tpu.pipeline_mode<synchronous>, transform_indices = @transform_5, window_bounds = array<i64: 32, 2>}, {pipeline_mode = #tpu.pipeline_mode<synchronous>, transform_indices = @transform_6, window_bounds = array<i64: 1, 2>}, {transform_indices = @transform_7, window_bounds = array<i64: 2, 2>}]} {
    %c0 = arith.constant 0 : index
    %c0_0 = arith.constant 0 : index
    %0 = vector.load %arg1[%c0, %c0_0] : memref<2x576xf32, #tpu.memory_space<vmem>>, vector<2x576xf32>
    %c0_1 = arith.constant 0 : index
    %c0_2 = arith.constant 0 : index
    %1 = vector.load %arg2[%c0_1, %c0_2] : memref<576x64xf32, #tpu.memory_space<vmem>>, vector<576x64xf32>
    %cst = arith.constant dense<0.000000e+00> : vector<2x64xf32>
    %2 = tpu.matmul %0, %1, %cst {dimension_numbers = #tpu.dot_dimension_numbers<[1], [0], [0], [1], [0, 0, 1, 1], [], []>} : vector<2x576xf32>, vector<576x64xf32>, vector<2x64xf32> -> vector<2x64xf32>
    %c0_3 = arith.constant 0 : index
    %c0_4 = arith.constant 0 : index
    %3 = vector.load %arg3[%c0_3, %c0_4] : memref<1x64xf32, #tpu.memory_space<vmem>>, vector<1x64xf32>
    %4 = vector.broadcast %3 : vector<1x64xf32> to vector<2x64xf32>
    %5 = arith.addf %2, %4 : vector<2x64xf32>
    %c0_5 = arith.constant 0 : index
    %c0_6 = arith.constant 0 : index
    %6 = vector.load %arg4[%c0_5, %c0_6] : memref<64x32xf32, #tpu.memory_space<vmem>>, vector<64x32xf32>
    %cst_7 = arith.constant dense<0.000000e+00> : vector<2x32xf32>
    %7 = tpu.matmul %5, %6, %cst_7 {dimension_numbers = #tpu.dot_dimension_numbers<[1], [0], [0], [1], [0, 0, 1, 1], [], []>} : vector<2x64xf32>, vector<64x32xf32>, vector<2x32xf32> -> vector<2x32xf32>
    %c0_8 = arith.constant 0 : index
    %c0_9 = arith.constant 0 : index
    %8 = vector.load %arg5[%c0_8, %c0_9] : memref<1x32xf32, #tpu.memory_space<vmem>>, vector<1x32xf32>
    %9 = vector.broadcast %8 : vector<1x32xf32> to vector<2x32xf32>
    %10 = arith.addf %7, %9 : vector<2x32xf32>
    %c0_10 = arith.constant 0 : index
    %c0_11 = arith.constant 0 : index
    %11 = vector.load %arg6[%c0_10, %c0_11] : memref<32x2xf32, #tpu.memory_space<vmem>>, vector<32x2xf32>
    %cst_12 = arith.constant dense<0.000000e+00> : vector<2x2xf32>
    %12 = tpu.matmul %10, %11, %cst_12 {dimension_numbers = #tpu.dot_dimension_numbers<[1], [0], [0], [1], [0, 0, 1, 1], [], []>} : vector<2x32xf32>, vector<32x2xf32>, vector<2x2xf32> -> vector<2x2xf32>
    %c0_13 = arith.constant 0 : index
    %c0_14 = arith.constant 0 : index
    %13 = vector.load %arg7[%c0_13, %c0_14] : memref<1x2xf32, #tpu.memory_space<vmem>>, vector<1x2xf32>
    %14 = vector.broadcast %13 : vector<1x2xf32> to vector<2x2xf32>
    %15 = arith.addf %12, %14 : vector<2x2xf32>
    %c0_15 = arith.constant 0 : index
    %c0_16 = arith.constant 0 : index
    %16 = vector.load %arg8[%c0_15, %c0_16] : memref<2x2xf32, #tpu.memory_space<vmem>>, vector<2x2xf32>
    tpu.vector_store %arg8[%c0_15, %c0_16], %15 {strides = array<i32>} : memref<2x2xf32, #tpu.memory_space<vmem>>, vector<2x2xf32>,
    return
  }
  func.func @transform_0(%arg0: i32) -> (i32, i32) {
    %c0_i32 = arith.constant 0 : i32
    %c0_i32_0 = arith.constant 0 : i32
    return %arg0, %c0_i32 : i32, i32
  }
  func.func @transform_1(%arg0: i32) -> (i32, i32) {
    %c0_i32 = arith.constant 0 : i32
    %c0_i32_0 = arith.constant 0 : i32
    %c0_i32_1 = arith.constant 0 : i32
    return %c0_i32, %c0_i32_0 : i32, i32
  }
  func.func @transform_2(%arg0: i32) -> (i32, i32) {
    %c0_i32 = arith.constant 0 : i32
    %c0_i32_0 = arith.constant 0 : i32
    %c0_i32_1 = arith.constant 0 : i32
    return %c0_i32, %c0_i32_0 : i32, i32
  }
  func.func @transform_3(%arg0: i32) -> (i32, i32) {
    %c0_i32 = arith.constant 0 : i32
    %c0_i32_0 = arith.constant 0 : i32
    %c0_i32_1 = arith.constant 0 : i32
    return %c0_i32, %c0_i32_0 : i32, i32
  }
  func.func @transform_4(%arg0: i32) -> (i32, i32) {
    %c0_i32 = arith.constant 0 : i32
    %c0_i32_0 = arith.constant 0 : i32
    %c0_i32_1 = arith.constant 0 : i32
    return %c0_i32, %c0_i32_0 : i32, i32
  }
  func.func @transform_5(%arg0: i32) -> (i32, i32) {
    %c0_i32 = arith.constant 0 : i32
    %c0_i32_0 = arith.constant 0 : i32
    %c0_i32_1 = arith.constant 0 : i32
    return %c0_i32, %c0_i32_0 : i32, i32
  }
  func.func @transform_6(%arg0: i32) -> (i32, i32) {
    %c0_i32 = arith.constant 0 : i32
    %c0_i32_0 = arith.constant 0 : i32
    %c0_i32_1 = arith.constant 0 : i32
    return %c0_i32, %c0_i32_0 : i32, i32
  }
  func.func @transform_7(%arg0: i32) -> (i32, i32) {
    %c0_i32 = arith.constant 0 : i32
    %c0_i32_0 = arith.constant 0 : i32
    return %arg0, %c0_i32 : i32, i32
  }
}

</mosaic_0001>

<bundles_post_ra>
// kernel: custom-call.4
= control target key start
LH: loop header
LB: loop body
LE: loop exit
PB: predicated region body
PF: predicated region fallthrough
CT: control target
= control target key end

     0   :  { %s3449_s0 = inlined_call_operand.vmem [shape: f32[2,24,24], index: 0, kind: input, shape index: {}]   ;;  %s3450_s1 = inlined_call_operand.vmem [shape: f32[2,24,24], index: 1, kind: input, shape index: {}]   ;;  %s3451_s2 = inlined_call_operand.vmem [shape: f32[2,24,24], index: 2, kind: input, shape index: {}]   ;;  %s3452_s3 = inlined_call_operand.vmem [shape: f32[2,24,24], index: 3, kind: input, shape index: {}]   ;;  %s3453_s4 = inlined_call_operand.vmem [shape: f32[2,24], index: 4, kind: output, shape index: {0}]   ;;  %s3454_s5 = inlined_call_operand.vmem [shape: f32[2,24], index: 5, kind: output, shape index: {1}]   ;;  %s3455_s6 = inlined_call_operand.vmem [shape: f32[2,24,24], index: 6, kind: output, shape index: {2}]   ;;  %s3456_s7 = inlined_call_operand.vmem [shape: f32[2,24,24], index: 7, kind: output, shape index: {3}]   ;;  %s3457_s8 = inlined_call_operand.vmem [shape: f32[2,24,24], index: 8, kind: output, shape index: {4}]   ;;  %s3458_s9 = inlined_call_operand.vmem [shape: f32[2,24,24], index: 9, kind: output, shape index: {5}]  }
   0x1   :  { %3459 = sst [smem:[#allocation26_spill]] %s3449_s0 }
   0x2   :  { %3460 = sst [smem:[#allocation27_spill]] %s3450_s1 }
   0x3   :  { %3461 = sst [smem:[#allocation28_spill]] %s3451_s2 }
   0x4   :  { %3462 = sst [smem:[#allocation29_spill]] %s3452_s3 }
   0x5   :  { %s2710_s30 = smov 0   ;;  %s2712_s10 = smov 0  }
   0x6   :  { %s2714_s11 = smov 0  }
   0x7 LB: > { %s2726_s12 = sadd.s32 4294967295, %s2647_s11   ;;  %s2729_s13 = sadd.s32 1, %s2647_s11   ;;  %s2647_s11 = sphi %s2714_s11, %s3477_s11   ;;  %s2643_s10 = sphi %s2712_s10, %s3476_s10   ;;  %s2639_s30 = sphi %s2710_s30, %s3475_s30  }
   0x8   : > { %s20_s14 = sshrl.u32 %s2647_s11, 3  ;;  %s21_s15 = sshrl.u32 %s2729_s13, 3 }
   0x9   : > { %s22_s16 = ssub.s32 %s20_s14, %s21_s15  ;;  %s25_s17 = sadd.s32 1, %s2643_s10 }
   0xa   : > { %p23_p0 = scmp.eq.s32.totalorder %s22_s16, 0  ;;  %p35_p1 = scmp.ne.s32.totalorder %s2643_s10, %s2639_s30 }
   0xb   : > { %p36_p2 = scmp.eq.s32.totalorder %s2726_s12, 1  ;;  %p2322_p4 = scmp.ge.s32.totalorder %s2647_s11, 2 }
   0xc   : > { %s2738_s18 = scalar_select %p23_p0, %s2643_s10, %s25_s17  }
   0xd   : > { %p2740_p3 = por %p36_p2, %p35_p1  ;;  %86 = sbr.rel (%p2322_p4) target bundleno = 35 (0x23), region = 16 }
   0xe   : > { %3463 = sst [smem:[#allocation25_spill]] %s2738_s18  ;;  %s88_s20 = sand.u32 (!%p2322_p4), 1, %s2647_s11  }
   0xf   : > { %s2555_s21 = smul.u32 (!%p2322_p4), 24, %s2647_s11  ;;  %s3465_s0 = sld [smem:[#allocation26_spill]] (!%p2322_p4) }
  0x10   : > { %s2554_s22 = smul.u32 (!%p2322_p4), 24, %s88_s20  ;;  %s3466_s1 = sld [smem:[#allocation27_spill]] (!%p2322_p4) }
  0x11   : > { %s3467_s2 = sld [smem:[#allocation28_spill]] (!%p2322_p4) }
  0x12   : > { %s90_s29 = scalar_lea.vmem [#allocation0], %s2554_s22  ;;  %s117_s17 = scalar_lea.vmem [#allocation1], %s2554_s22 }
  0x13   : > { %s3468_s3 = sld [smem:[#allocation29_spill]]  ;;  %s171_s26 = scalar_lea.vmem [#allocation3], %s2554_s22 }
  0x15   : > { %s92_s25 = scalar_lea.vmem %s3465_s0, %s2555_s21 }
  0x16   : > { %s119_s28 = scalar_lea.vmem %s3466_s1, %s2555_s21  ;;  %v105_v0 = vld [vmem:[%s92_s25] sm:$0xff]  ;;  %v107_v1 = vld [vmem:[%s92_s25 + $0x8] sm:$0xff]  ;;  %v109_v2 = vld [vmem:[%s92_s25 + $0x10] sm:$0xff]  ;;  %s144_s25 = scalar_lea.vmem [#allocation2], %s2554_s22 }
  0x17   : > { %106 = vst [vmem:[%s90_s29] sm:$0xff] %v105_v0  ;;  %v132_v3 = vld [vmem:[%s119_s28] sm:$0xff]  ;;  %s146_s16 = scalar_lea.vmem %s3467_s2, %s2555_s21  ;;  %v134_v4 = vld [vmem:[%s119_s28 + $0x8] sm:$0xff]  ;;  %v136_v5 = vld [vmem:[%s119_s28 + $0x10] sm:$0xff] }
  0x18   : > { %108 = vst [vmem:[%s90_s29 + $0x8] sm:$0xff] %v107_v1  ;;  %v159_v6 = vld [vmem:[%s146_s16] sm:$0xff]  ;;  %v161_v7 = vld [vmem:[%s146_s16 + $0x8] sm:$0xff]  ;;  %v163_v8 = vld [vmem:[%s146_s16 + $0x10] sm:$0xff] }
  0x19   : > { %110 = vst [vmem:[%s90_s29 + $0x10] sm:$0xff] %v109_v2  ;;  %s173_s24 = scalar_lea.vmem %s3468_s3, %s2555_s21 }
  0x1a   : > { %133 = vst [vmem:[%s117_s17] sm:$0xff] %v132_v3  ;;  %v186_v9 = vld [vmem:[%s173_s24] sm:$0xff]  ;;  %v188_v10 = vld [vmem:[%s173_s24 + $0x8] sm:$0xff]  ;;  %v190_v11 = vld [vmem:[%s173_s24 + $0x10] sm:$0xff] }
  0x1b   : > { %135 = vst [vmem:[%s117_s17 + $0x8] sm:$0xff] %v134_v4 }
  0x1c   : > { %137 = vst [vmem:[%s117_s17 + $0x10] sm:$0xff] %v136_v5 }
  0x1d   : > { %160 = vst [vmem:[%s144_s25] sm:$0xff] %v159_v6 }
  0x1e   : > { %162 = vst [vmem:[%s144_s25 + $0x8] sm:$0xff] %v161_v7 }
  0x1f   : > { %164 = vst [vmem:[%s144_s25 + $0x10] sm:$0xff] %v163_v8 }
  0x20   : > { %187 = vst [vmem:[%s171_s26] sm:$0xff] %v186_v9 }
  0x21   : > { %189 = vst [vmem:[%s171_s26 + $0x8] sm:$0xff] %v188_v10 }
  0x22   : > { %191 = vst [vmem:[%s171_s26 + $0x10] sm:$0xff] %v190_v11 }
  0x23 PF: > { %p2323_p5 = scmp.ge.s32.totalorder %s2647_s11, 1  ;;  %p196_p6 = scmp.lt.s32.totalorder %s2647_s11, 3 }
  0x25   : > { %p197_p7 = pnand %p2323_p5, %p196_p6 }
  0x27   : > { %200 = sbr.rel (%p197_p7) target bundleno = 1105 (0x451), region = 96 }
  0x2c   : > { %s203_s21 = sand.u32 1, %s2726_s12   ;;  %s237_s27 = sand.u32 1, %s2639_s30   ;;  %v2657_v14 = vmov 0.0   ;;  %v329_v19 = vlaneseq }
  0x2d   : > { %s2763_s28 = smul.u32 24, %s203_s21  ;;  %s2765_s22 = sshll.u32 %s237_s27, 1 }
  0x2e   : > { %s264_s11 = smov [#allocation12]  ;;  %s275_s30 = smov [#allocation13]  ;;  %v2776_v24 = vshrl.u32 %v329_v19, 7  ;;  %v2778_v27 = vand.u32 127, %v329_v19 }
  0x2f   : > { %s205_s29 = scalar_lea.vmem [#allocation0], %s2763_s28  ;;  %s2769_s14 = scalar_lea.vmem [#allocation8], %s2763_s28 }
  0x30   : > { %v265_v12 = vld [vmem:[%s205_s29] sm:$0xff]  ;;  %v2326_v13 = vld [vmem:[%s205_s29 + $0x8] sm:$0xff]  ;;  %308 = vst [vmem:[%s2769_s14] sm:$0xff] %v2657_v14  ;;  %v2328_v15 = vld [vmem:[%s205_s29 + $0x10] sm:$0xff]  ;;  %s209_s15 = scalar_lea.vmem [#allocation1], %s2763_s28  ;;  %s286_s16 = smov [#allocation14]  ;;  %v334_v24 = vmov %v2776_v24  ;;  %v331_v27 = vmov %v2778_v27  ;;  %vm2151_vm6 = vcmp.lt.s32.totalorder %v2778_v27, 24 }
  0x31   : > { %2342 = vst [vmem:[%s2769_s14 + $0x8] sm:$0xff] %v2657_v14  ;;  %v276_v16 = vld [vmem:[%s209_s15] sm:$0xff]  ;;  %v2330_v17 = vld [vmem:[%s209_s15 + $0x8] sm:$0xff]  ;;  %v2332_v18 = vld [vmem:[%s209_s15 + $0x10] sm:$0xff]  ;;  %s213_s17 = scalar_lea.vmem [#allocation2], %s2763_s28  ;;  %s297_s20 = smov [#allocation15]  ;;  %vm338_vm0 = vcmp.eq.s32.totalorder %v334_v24, %v331_v27 }
  0x32   : > { %266 = vst [vmem:[%s264_s11] sm:$0xff] %v265_v12  ;;  %v287_v20 = vld [vmem:[%s213_s17] sm:$0xff]  ;;  %v2334_v21 = vld [vmem:[%s213_s17 + $0x8] sm:$0xff]  ;;  %v2336_v22 = vld [vmem:[%s213_s17 + $0x10] sm:$0xff]  ;;  %s217_s23 = scalar_lea.vmem [#allocation3], %s2763_s28  ;;  %s2783_s24 = scalar_lea.vmem [#allocation9], %s2763_s28  ;;  %v344_v28 = vadd.s32 8, %v334_v24 }
  0x33   : > { %2327 = vst [vmem:[%s264_s11 + $0x8] sm:$0xff] %v2326_v13  ;;  %v298_v23 = vld [vmem:[%s217_s23] sm:$0xff]  ;;  %v2338_v25 = vld [vmem:[%s217_s23 + $0x8] sm:$0xff]  ;;  %v2340_v26 = vld [vmem:[%s217_s23 + $0x10] sm:$0xff]  ;;  %v351_v29 = vadd.s32 16, %v334_v24  ;;  %s2790_s25 = scalar_lea.vmem [#allocation10], %s2763_s28  ;;  %v361_v24 = vmov %v2776_v24 }
  0x34   : > { %2329 = vst [vmem:[%s264_s11 + $0x10] sm:$0xff] %v2328_v15  ;;  %vm345_vm1 = vcmp.eq.s32.totalorder %v344_v28, %v331_v27  ;;  %s2797_s26 = scalar_lea.vmem [#allocation11], %s2763_s28  ;;  %v371_v36 = vadd.s32 8, %v361_v24  ;;  %v378_v37 = vadd.s32 16, %v361_v24  ;;  %s2147_s28 = smov [#allocation12] }
  0x35   : > { %277 = vst [vmem:[%s275_s30] sm:$0xff] %v276_v16  ;;  %vm352_vm2 = vcmp.eq.s32.totalorder %v351_v29, %v331_v27  ;;  %v358_v27 = vmov %v2778_v27  ;;  %s2182_s29 = smov [#allocation13]  ;;  %s2211_s11 = smov [#allocation14] }
  0x36   : > { %2331 = vst [vmem:[%s275_s30 + $0x8] sm:$0xff] %v2330_v17  ;;  %vm365_vm3 = vcmp.eq.s32.totalorder %v361_v24, %v358_v27  ;;  %vm372_vm4 = vcmp.eq.s32.totalorder %v371_v36, %v358_v27  ;;  %vm379_vm5 = vcmp.eq.s32.totalorder %v378_v37, %v358_v27  ;;  %v2146_v24 = vmov %v2776_v24 }
  0x37   : > { %2333 = vst [vmem:[%s275_s30 + $0x10] sm:$0xff] %v2332_v18  ;;  %v2178_v27 = vmov %v2778_v27  ;;  %v2162_v59 = vadd.s32 8, %v2146_v24  ;;  %s2240_s30 = smov [#allocation15]  ;;  %v2171_v8 = vadd.s32 16, %v2146_v24 }
  0x38   : > { %288 = vst [vmem:[%s286_s16] sm:$0xff] %v287_v20  ;;  %v2143_v27 = vmov %v2778_v27 }
  0x39   : > { %2335 = vst [vmem:[%s286_s16 + $0x8] sm:$0xff] %v2334_v21  ;;  %vm2156_vm7 = vcmp.eq.s32.totalorder %v2146_v24, %v2143_v27  ;;  %vm2163_vm8 = vcmp.eq.s32.totalorder %v2162_v59, %v2143_v27  ;;  %vm2172_vm9 = vcmp.eq.s32.totalorder %v2171_v8, %v2143_v27  ;;  %v2181_v24 = vmov %v2776_v24 }
  0x3a   : > { %2337 = vst [vmem:[%s286_s16 + $0x10] sm:$0xff] %v2336_v22  ;;  %v2207_v27 = vmov %v2778_v27  ;;  %v2210_v24 = vmov %v2776_v24 }
  0x3b   : > { %299 = vst [vmem:[%s297_s20] sm:$0xff] %v298_v23  ;;  %v2153_v44 = vld [vmem:[%s2147_s28] sm:$0xff]  ;;  %v2358_v45 = vld [vmem:[%s2147_s28 + $0x8] sm:$0xff]  ;;  %v2359_v46 = vld [vmem:[%s2147_s28 + $0x10] sm:$0xff]  ;;  %v2239_v24 = vmov %v2776_v24  ;;  %v2236_v27 = vmov %v2778_v27 }
  0x3c   : > { %2339 = vst [vmem:[%s297_s20 + $0x8] sm:$0xff] %v2338_v25  ;;  %v2154_v47 = vsel %vm2151_vm6, %v2153_v44, 0.0  ;;  %v2160_v48 = vsel %vm2151_vm6, %v2358_v45, 0.0  ;;  %v2169_v49 = vsel %vm2151_vm6, %v2359_v46, 0.0  ;;  %vm2249_vm10 = vcmp.eq.s32.totalorder %v2239_v24, %v2236_v27 }
  0x3d   : > { %2341 = vst [vmem:[%s297_s20 + $0x10] sm:$0xff] %v2340_v26  ;;  %v2155_v52 = vmul.f32 %v2154_v47, %v2154_v47  ;;  %v2161_v53 = vmul.f32 %v2160_v48, %v2160_v48  ;;  %v2170_v54 = vmul.f32 %v2169_v49, %v2169_v49 }
  0x3e   : > { %2343 = vst [vmem:[%s2769_s14 + $0x10] sm:$0xff] %v2657_v14  ;;  %s328_s14 = smov %s2769_s14  ;;  %v2188_v50 = vld [vmem:[%s2182_s29] sm:$0xff]  ;;  %v2360_v51 = vld [vmem:[%s2182_s29 + $0x8] sm:$0xff]  ;;  %v2361_v56 = vld [vmem:[%s2182_s29 + $0x10] sm:$0xff] }
  0x3f   : > { %313 = vst [vmem:[%s2783_s24] sm:$0xff] %v2657_v14  ;;  %v2189_v55 = vsel %vm2151_vm6, %v2188_v50, 0.0  ;;  %v2195_v57 = vsel %vm2151_vm6, %v2360_v51, 0.0  ;;  %v2166_v60 = vadd.f32 %v2161_v53, %v2155_v52  ;;  %v2201_v62 = vsel %vm2151_vm6, %v2361_v56, 0.0 }
  0x40   : > { %2344 = vst [vmem:[%s2783_s24 + $0x8] sm:$0xff] %v2657_v14  ;;  %v2190_v61 = vmul.f32 %v2189_v55, %v2189_v55  ;;  %v2196_v0 = vmul.f32 %v2195_v57, %v2195_v57  ;;  %v2157_v3 = vsel %vm2156_vm7, 0.0, %v2155_v52  ;;  %v2202_v5 = vmul.f32 %v2201_v62, %v2201_v62 }
  0x41   : > { %2345 = vst [vmem:[%s2783_s24 + $0x10] sm:$0xff] %v2657_v14  ;;  %v2217_v58 = vld [vmem:[%s2211_s11] sm:$0xff]  ;;  %v2175_v63 = vadd.f32 %v2170_v54, %v2166_v60  ;;  %v2362_v2 = vld [vmem:[%s2211_s11 + $0x8] sm:$0xff]  ;;  %v2363_v6 = vld [vmem:[%s2211_s11 + $0x10] sm:$0xff]  ;;  %v2164_v7 = vsel %vm2163_vm8, 0.0, %v2161_v53  ;;  %v2173_v15 = vsel %vm2172_vm9, 0.0, %v2170_v54 }
  0x42   : > { %318 = vst [vmem:[%s2790_s25] sm:$0xff] %v2657_v14  ;;  %v2218_v1 = vsel %vm2151_vm6, %v2217_v58, 0.0  ;;  %v2224_v10 = vsel %vm2151_vm6, %v2362_v2, 0.0  ;;  %v2165_v11 = vadd.f32 %v2164_v7, %v2157_v3 }
  0x43   : > { %2346 = vst [vmem:[%s2790_s25 + $0x8] sm:$0xff] %v2657_v14  ;;  %v2192_v4 = vadd.f32 %v2190_v61, %v2175_v63  ;;  %v2219_v9 = vmul.f32 %v2218_v1, %v2218_v1  ;;  %v2225_v17 = vmul.f32 %v2224_v10, %v2224_v10 }
  0x44   : > { %2347 = vst [vmem:[%s2790_s25 + $0x10] sm:$0xff] %v2657_v14  ;;  %v2246_v13 = vld [vmem:[%s2240_s30] sm:$0xff]  ;;  %v2364_v18 = vld [vmem:[%s2240_s30 + $0x8] sm:$0xff]  ;;  %v2174_v19 = vadd.f32 %v2173_v15, %v2165_v11  ;;  %v2365_v23 = vld [vmem:[%s2240_s30 + $0x10] sm:$0xff] }
  0x45   : > { %323 = vst [vmem:[%s2797_s26] sm:$0xff] %v2657_v14  ;;  %v335_v30 = vld [vmem:[%s328_s14] sm:$0xff]  ;;  %v2350_v31 = vld [vmem:[%s328_s14 + $0x8] sm:$0xff]  ;;  %v2352_v32 = vld [vmem:[%s328_s14 + $0x10] sm:$0xff]  ;;  %v2198_v12 = vadd.f32 %v2196_v0, %v2192_v4  ;;  %v2247_v20 = vsel %vm2151_vm6, %v2246_v13, 0.0  ;;  %v2255_v26 = vsel %vm2151_vm6, %v2364_v18, 0.0 }
  0x46   : > { %2348 = vst [vmem:[%s2797_s26 + $0x8] sm:$0xff] %v2657_v14  ;;  %v339_v33 = vsel %vm338_vm0, 1.0, %v335_v30  ;;  %v346_v34 = vsel %vm345_vm1, 1.0, %v2350_v31  ;;  %v353_v35 = vsel %vm352_vm2, 1.0, %v2352_v32  ;;  %v2191_v25 = vadd.f32 %v2190_v61, %v2174_v19 }
  0x47   : > { %2349 = vst [vmem:[%s2797_s26 + $0x10] sm:$0xff] %v2657_v14  ;;  %s355_s26 = smov %s2797_s26  ;;  %v2230_v14 = vsel %vm2151_vm6, %v2363_v6, 0.0  ;;  %v2204_v16 = vadd.f32 %v2202_v5, %v2198_v12  ;;  %v2248_v29 = vmul.f32 %v2247_v20, %v2247_v20  ;;  %v2264_v31 = vsel %vm2151_vm6, %v2365_v23, 0.0 }
  0x48   : > { %340 = vst [vmem:[%s328_s14] sm:$0xff] %v339_v33  ;;  %v2231_v22 = vmul.f32 %v2230_v14, %v2230_v14  ;;  %v2197_v30 = vadd.f32 %v2196_v0, %v2191_v25  ;;  %v2256_v33 = vmul.f32 %v2255_v26, %v2255_v26  ;;  %v2265_v37 = vmul.f32 %v2264_v31, %v2264_v31 }
  0x49   : > { %2351 = vst [vmem:[%s328_s14 + $0x8] sm:$0xff] %v346_v34  ;;  %v2221_v21 = vadd.f32 %v2219_v9, %v2204_v16 }
  0x4a   : > { %2353 = vst [vmem:[%s328_s14 + $0x10] sm:$0xff] %v353_v35  ;;  %v2203_v34 = vadd.f32 %v2202_v5, %v2197_v30  ;;  %v2257_v35 = vadd.s32 8, %v2239_v24 }
  0x4b   : > { %v2227_v28 = vadd.f32 %v2225_v17, %v2221_v21 }
  0x4c   : > { %vm2258_vm11 = vcmp.eq.s32.totalorder %v2257_v35, %v2236_v27 }
  0x4d   : > { %v2233_v32 = vadd.f32 %v2231_v22, %v2227_v28  ;;  %v2259_v45 = vsel %vm2258_vm11, 0.0, %v2256_v33 }
  0x4e   : > { %v362_v38 = vld [vmem:[%s355_s26] sm:$0xff]  ;;  %v2354_v39 = vld [vmem:[%s355_s26 + $0x8] sm:$0xff]  ;;  %v2356_v40 = vld [vmem:[%s355_s26 + $0x10] sm:$0xff] }
  0x4f   : > { %v366_v41 = vsel %vm365_vm3, 1.0, %v362_v38  ;;  %v373_v42 = vsel %vm372_vm4, 1.0, %v2354_v39  ;;  %v380_v43 = vsel %vm379_vm5, 1.0, %v2356_v40  ;;  %v2252_v36 = vadd.f32 %v2248_v29, %v2233_v32 }
  0x50   : > { %367 = vst [vmem:[%s355_s26] sm:$0xff] %v366_v41  ;;  %v2220_v38 = vadd.f32 %v2219_v9, %v2203_v34  ;;  %v2266_v39 = vadd.s32 16, %v2239_v24 }
  0x51   : > { %2355 = vst [vmem:[%s355_s26 + $0x8] sm:$0xff] %v373_v42  ;;  %v2261_v40 = vadd.f32 %v2256_v33, %v2252_v36  ;;  %v2250_v42 = vsel %vm2249_vm10, 0.0, %v2248_v29 }
  0x52   : > { %2357 = vst [vmem:[%s355_s26 + $0x10] sm:$0xff] %v380_v43  ;;  %v2226_v41 = vadd.f32 %v2225_v17, %v2220_v38  ;;  %vm2267_vm12 = vcmp.eq.s32.totalorder %v2266_v39, %v2236_v27 }
  0x53   : > { %v2270_v43 = vadd.f32 %v2265_v37, %v2261_v40  ;;  %v2268_v47 = vsel %vm2267_vm12, 0.0, %v2265_v37 }
  0x54   : > { %v2232_v44 = vadd.f32 %v2231_v22, %v2226_v41 }
  0x55   : > { %2271 = vadd.xlane.f32.xlu0 %v2270_v43 }
  0x56   : > { %v2251_v46 = vadd.f32 %v2250_v42, %v2232_v44 }
  0x58   : > { %v2260_v48 = vadd.f32 %v2259_v45, %v2251_v46 }
  0x5a   : > { %v2269_v49 = vadd.f32 %v2268_v47, %v2260_v48 }
  0x5d   : > { %2279 = vadd.xlane.f32.xlu0 %v2269_v49 }
  0xc8   : > { %v2272_v50 = vpop.xlane.xlu0 %2271 }
  0xc9   : > { %v2273_v51 = vrot.slane %v2272_v50, 4 }
  0xcb   : > { %v2274_v52 = vadd.f32 %v2273_v51, %v2272_v50 }
  0xcd   : > { %v2275_v53 = vrot.slane %v2274_v52, 2 }
  0xcf   : > { %v2276_v57 = vadd.f32 %v2275_v53, %v2274_v52 }
  0xd0   : > { %v2280_v54 = vpop.xlane.xlu0 %2279 }
  0xd1   : > { %v2281_v55 = vrot.slane %v2280_v54, 4  ;;  %v2277_v60 = vrot.slane %v2276_v57, 1 }
  0xd3   : > { %v2282_v56 = vadd.f32 %v2281_v55, %v2280_v54  ;;  %v2278_v63 = vadd.f32 %v2277_v60, %v2276_v57 }
  0xd5   : > { %v2283_v58 = vrot.slane %v2282_v56, 2 }
  0xd7   : > { %v2284_v59 = vadd.f32 %v2283_v58, %v2282_v56 }
  0xd9   : > { %v2285_v61 = vrot.slane %v2284_v59, 1 }
  0xdb   : > { %v2286_v62 = vadd.f32 %v2285_v61, %v2284_v59 }
  0xdd   : > { %2557 = vpush %v2286_v62 }
  0xde   : > { %2559 = vpush %v2278_v63 }
 0x10e   : > { %s2558_s15 = spop %2557 }
 0x10f   : > { %s2560_s16 = spop %2559 }
 0x110   : > { %s2289_s17 = smul.f32 1e-10, %s2560_s16 }
 0x112   : > { %p2290_p8 = scmp.le.f32.partialorder %s2558_s15, %s2289_s17 }
 0x113   : > { %s2840_s20 = smov (!%p2290_p8), 0  }
 0x114   : > { %2293 = sbr.rel (%p2290_p8) target bundleno = 1047 (0x417), region = 517 }
 0x119 LB: >> { %s2845_s23 = smov 0   ;;  %s2651_s20 = sphi %s2840_s20, %s3469_s20  }
 0x11a LB: >>> { %s550_s28 = smov [#allocation12]  ;;  %v554_v27 = vmov %v2778_v27  ;;  %v557_v24 = vmov %v2776_v24  ;;  %s582_s29 = smov [#allocation13]  ;;  %s2655_s23 = sphi %s2845_s23, %s549_s23  }
 0x11b   : >>> { %v586_v27 = vmov %v2778_v27  ;;  %v589_v24 = vmov %v2776_v24  ;;  %v558_v0 = vld [vmem:[%s550_s28] sm:$0xff]  ;;  %vm561_vm13 = vcmp.eq.s32.totalorder %v557_v24, %v554_v27  ;;  %v2366_v1 = vld [vmem:[%s550_s28 + $0x8] sm:$0xff]  ;;  %v566_v2 = vadd.s32 8, %v557_v24  ;;  %v2367_v5 = vld [vmem:[%s550_s28 + $0x10] sm:$0xff]  ;;  %s614_s11 = smov [#allocation15]  ;;  %s551_s30 = smov [#allocation16] }
 0x11c   : >>> { %v572_v3 = vadd.s32 16, %v557_v24  ;;  %vm593_vm14 = vcmp.eq.s32.totalorder %v589_v24, %v586_v27  ;;  %v562_v4 = vsel %vm561_vm13, %v558_v0, 0.0  ;;  %v590_v6 = vld [vmem:[%s582_s29] sm:$0xff]  ;;  %v2368_v7 = vld [vmem:[%s582_s29 + $0x8] sm:$0xff]  ;;  %v598_v8 = vadd.s32 8, %v589_v24  ;;  %v2369_v10 = vld [vmem:[%s582_s29 + $0x10] sm:$0xff]  ;;  %s2880_s14 = smov %s2769_s14  ;;  %s2886_s24 = smov %s2783_s24 }
 0x11d   : >>> { %v618_v27 = vmov %v2778_v27  ;;  %v621_v24 = vmov %v2776_v24  ;;  %vm567_vm15 = vcmp.eq.s32.totalorder %v566_v2, %v554_v27  ;;  %v594_v9 = vsel %vm593_vm14, %v590_v6, 0.0  ;;  %v622_v13 = vld [vmem:[%s614_s11] sm:$0xff]  ;;  %v2370_v14 = vld [vmem:[%s614_s11 + $0x8] sm:$0xff]  ;;  %v2371_v21 = vld [vmem:[%s614_s11 + $0x10] sm:$0xff]  ;;  %s583_s15 = smov [#allocation17]  ;;  %s615_s16 = smov [#allocation18] }
 0x11e   : >>> { %vm573_vm0 = vcmp.eq.s32.totalorder %v572_v3, %v554_v27  ;;  %v604_v11 = vadd.s32 16, %v589_v24  ;;  %v568_v12 = vsel %vm567_vm15, %v2366_v1, %v562_v4  ;;  %vm599_vm1 = vcmp.eq.s32.totalorder %v598_v8, %v586_v27  ;;  %s650_s17 = smov [#allocation17]  ;;  %s648_s28 = smov [#allocation16] }
 0x11f   : >>> { %vm625_vm2 = vcmp.eq.s32.totalorder %v621_v24, %v618_v27  ;;  %v630_v15 = vadd.s32 8, %v621_v24  ;;  %v574_v16 = vsel %vm573_vm0, %v2367_v5, %v568_v12  ;;  %v600_v17 = vsel %vm599_vm1, %v2368_v7, %v594_v9  ;;  %s652_s29 = smov [#allocation18]  ;;  %s727_s11 = smov [#allocation19] }
 0x120   : >>> { %vm605_vm3 = vcmp.eq.s32.totalorder %v604_v11, %v586_v27  ;;  %v626_v18 = vsel %vm625_vm2, %v622_v13, 0.0  ;;  %v575_v19 = vrot.slane %v574_v16, 4  ;;  %v636_v22 = vadd.s32 16, %v621_v24  ;;  %s2873_s27 = smov [#allocation12]  ;;  %s2882_s21 = smov [#allocation13] }
 0x121   : >>> { %v606_v20 = vsel %vm605_vm3, %v2369_v10, %v600_v17  ;;  %vm631_vm4 = vcmp.eq.s32.totalorder %v630_v15, %v618_v27  ;;  %v757_v24 = vmov %v2776_v24  ;;  %s2891_s25 = smov %s2790_s25  ;;  %s2894_s26 = smov %s2797_s26 }
 0x122   : >>> { %v607_v23 = vrot.slane %v606_v20, 4  ;;  %v632_v25 = vsel %vm631_vm4, %v2370_v14, %v626_v18  ;;  %v576_v26 = vadd.f32 %v575_v19, %v574_v16  ;;  %vm637_vm5 = vcmp.eq.s32.totalorder %v636_v22, %v618_v27  ;;  %s3178_s0 = smov [#allocation14]  ;;  %s3189_s1 = smov [#allocation13] }
 0x123   : >>> { %v638_v29 = vsel %vm637_vm5, %v2371_v21, %v632_v25  ;;  %v773_v24 = vmov %v2776_v24  ;;  %v739_v27 = vmov %v2778_v27  ;;  %s3193_s2 = smov [#allocation15]  ;;  %s3196_s3 = smov [#allocation14] }
 0x124   : >>> { %v608_v28 = vadd.f32 %v607_v23, %v606_v20  ;;  %v577_v30 = vrot.slane %v576_v26, 2  ;;  %v639_v31 = vrot.slane %v638_v29, 4  ;;  %v754_v27 = vmov %v2778_v27  ;;  %s3204_s18 = smov [#allocation15]  ;;  %s549_s23 = sadd.s32 1, %s2655_s23  }
 0x125   : >>> { %v770_v27 = vmov %v2778_v27  ;;  %p546_p9 = scmp.ge.s32.totalorder %s549_s23, 47  }
 0x126   : >>> { %v609_v32 = vrot.slane %v608_v28, 2  ;;  %v578_v33 = vadd.f32 %v577_v30, %v576_v26  ;;  %v640_v34 = vadd.f32 %v639_v31, %v638_v29  ;;  %s487_s23 = smov (%p546_p9), [#allocation15] }
 0x128   : >>> { %v610_v35 = vadd.f32 %v609_v32, %v608_v28  ;;  %v579_v36 = vrot.slane %v578_v33, 1  ;;  %v641_v37 = vrot.slane %v640_v34, 2 }
 0x12a   : >>> { %v611_v38 = vrot.slane %v610_v35, 1  ;;  %v580_v39 = vadd.f32 %v579_v36, %v578_v33  ;;  %v642_v40 = vadd.f32 %v641_v37, %v640_v34 }
 0x12c   : >>> { %v612_v41 = vadd.f32 %v611_v38, %v610_v35  ;;  %581 = vst [vmem:[%s551_s30] sm:$0x1] %v580_v39  ;;  %v643_v42 = vrot.slane %v642_v40, 1  ;;  %s729_s30 = smov [#allocation20] }
 0x12e   : >>> { %613 = vst [vmem:[%s583_s15] sm:$0x1] %v612_v41  ;;  %v644_v43 = vadd.f32 %v643_v42, %v642_v40  ;;  %s646_s15 = smov [#allocation21]  ;;  %v758_v42 = vadd.s32 8, %v757_v24  ;;  %v742_v24 = vmov %v2776_v24 }
 0x12f   : >>> { %s731_s15 = smov %s646_s15 }
 0x130   : >>> { %645 = vst [vmem:[%s615_s16] sm:$0x1] %v644_v43  ;;  %s647_s16 = smov [#allocation22]  ;;  %v774_v43 = vadd.s32 16, %v773_v24  ;;  %v804_v24 = vmov %v2776_v24 }
 0x131   : >>> { %s733_s16 = smov %s647_s16 }
 0x133   : >>> { %v649_v51 = vld [vmem:[%s648_s28] sm:$0xff]  ;;  %s750_s28 = smov [#allocation21] }
 0x134   : >>> { %v703_v11 = vand.u32 2147483647, %v649_v51 }
 0x135   : >>> { %v2856_v44 = vld [vmem:[%s650_s17] sm:$0xff]  ;;  %s735_s17 = smov [#allocation21] }
 0x136   : >>> { %v655_v45 = vmul.f32 2.0, %v2856_v44  ;;  %v704_v19 = vand.u32 2147483647, %v2856_v44 }
 0x137   : >>> { %v653_v52 = vld [vmem:[%s652_s29] sm:$0xff]  ;;  %s766_s29 = smov [#allocation21] }
 0x138   : >>> { %2609 = vrcp.f32 %v655_v45  ;;  %v667_v48 = vand.u32 2147483648, %v655_v45  ;;  %vm661_vm7 = vweird.f32 %v655_v45  ;;  %v665_v50 = vand.u32 2147483647, %v655_v45 }
 0x139   : >>> { %v654_v55 = vsub.f32 %v653_v52, %v649_v51  ;;  %v705_v12 = vand.u32 2147483647, %v653_v52 }
 0x13a   : >>> { %v668_v54 = vor.u32 1.1754944e-38, %v667_v48  ;;  %vm666_vm10 = vcmp.eq.f32.partialorder %v665_v50, 8.507059e+37 }
 0x13b   : >>> { %v706_v14 = vmin.f32 %v703_v11, %v705_v12  ;;  %v1463_v12 = vld [vmem:[%s2891_s25] sm:$0xff] }
 0x13d   : >>> { %v707_v20 = vmul.f32 1.1920929e-08, %v706_v14 }
 0x13e   : >>> { %v2610_v46 = vpop.eup %2609 }
 0x13f   : >>> { %v657_v47 = vmul.f32 %v2610_v46, %v655_v45  ;;  %vm662_vm8 = vweird.f32 %v2610_v46  ;;  %vm708_vm2 = vcmp.le.f32.partialorder %v704_v19, %v707_v20 }
 0x140   : >>> { %vm663_vm9 = vmor %vm661_vm7, %vm662_vm8  ;;  %vm744_vm7 = vcmp.eq.s32.totalorder %v742_v24, %v739_v27  ;;  %vm759_vm8 = vcmp.eq.s32.totalorder %v758_v42, %v754_v27  ;;  %v820_v24 = vmov %v2776_v24 }
 0x141   : >>> { %v658_v49 = vsub.f32 1.0, %v657_v47  ;;  %v789_v24 = vmov %v2776_v24  ;;  %v821_v50 = vadd.s32 16, %v820_v24 }
 0x143   : >>> { %v659_v53 = vmul.f32 %v2610_v46, %v658_v49 }
 0x145   : >>> { %v660_v56 = vadd.f32 %v2610_v46, %v659_v53 }
 0x147   : >>> { %v664_v57 = vsel %vm663_vm9, %v2610_v46, %v660_v56  ;;  %vm775_vm9 = vcmp.eq.s32.totalorder %v774_v43, %v770_v27  ;;  %v786_v27 = vmov %v2778_v27  ;;  %v805_v46 = vadd.s32 8, %v804_v24 }
 0x148   : >>> { %v669_v58 = vsel %vm666_vm10, %v668_v54, %v664_v57  ;;  %v801_v27 = vmov %v2778_v27  ;;  %vm791_vm10 = vcmp.eq.s32.totalorder %v789_v24, %v786_v27 }
 0x149   : >>> { %v670_v59 = vmul.f32 %v669_v58, %v654_v55  ;;  %v817_v27 = vmov %v2778_v27 }
 0x14b   : >>> { %v672_v60 = vmul.f32 %v670_v59, %v670_v59  ;;  %vm671_vm13 = vcmp.ge.f32.partialorder %v670_v59, 0.0 }
 0x14d   : >>> { %v673_v61 = vadd.f32 1.0, %v672_v60 }
 0x14f   : >>> { %2611 = vrsqrt.f32 %v673_v61  ;;  %vm681_vm11 = vcmp.eq.f32.partialorder %v673_v61, inf  ;;  %v684_v4 = vand.u32 2147483648, %v673_v61  ;;  %vm683_vm12 = vcmp.eq.f32.partialorder %v673_v61, 0.0 }
 0x155   : >>> { %v2612_v62 = vpop.eup %2611 }
 0x156   : >>> { %v675_v63 = vmul.f32 %v2612_v62, %v673_v61 }
 0x158   : >>> { %v676_v0 = vmul.f32 %v2612_v62, %v675_v63 }
 0x15a   : >>> { %v677_v1 = vmul.f32 0.5, %v676_v0  ;;  %v837_v0 = vld [vmem:[%s2873_s27] sm:$0xff] }
 0x15c   : >>> { %v678_v2 = vsub.f32 1.5, %v677_v1 }
 0x15e   : >>> { %v679_v3 = vmul.f32 %v2612_v62, %v678_v2 }
 0x160   : >>> { %v680_v5 = vmul.f32 %v679_v3, %v673_v61 }
 0x162   : >>> { %v682_v6 = vsel %vm681_vm11, %v673_v61, %v680_v5  ;;  %vm806_vm11 = vcmp.eq.s32.totalorder %v805_v46, %v801_v27 }
 0x163   : >>> { %v685_v7 = vsel %vm683_vm12, %v684_v4, %v682_v6  ;;  %vm822_vm12 = vcmp.eq.s32.totalorder %v821_v50, %v817_v27  ;;  %v1461_v4 = vld [vmem:[%s2880_s14] sm:$0xff]  ;;  %v1043_v27 = vmov %v2778_v27 }
 0x164   : >>> { %v686_v8 = vxor.u32 2147483648, %v685_v7  ;;  %v1462_v6 = vld [vmem:[%s2886_s24] sm:$0xff]  ;;  %v1013_v27 = vmov %v2778_v27 }
 0x166   : >>> { %v687_v9 = vsel %vm671_vm13, %v685_v7, %v686_v8  ;;  %v838_v7 = vld [vmem:[%s2882_s21] sm:$0xff]  ;;  %vm1333_vm13 = vcmp.eq.s32.totalorder %v2776_v24, 0 }
 0x167   : >>> { %v688_v10 = vadd.f32 %v687_v9, %v670_v59 }
 0x169   : >>> { %2613 = vrcp.f32 %v688_v10  ;;  %v700_v16 = vand.u32 2147483648, %v688_v10  ;;  %vm694_vm14 = vweird.f32 %v688_v10  ;;  %v698_v18 = vand.u32 2147483647, %v688_v10 }
 0x16b   : >>> { %v701_v22 = vor.u32 1.1754944e-38, %v700_v16  ;;  %vm699_vm1 = vcmp.eq.f32.partialorder %v698_v18, 8.507059e+37 }
 0x16f   : >>> { %v2614_v13 = vpop.eup %2613 }
 0x170   : >>> { %v690_v15 = vmul.f32 %v2614_v13, %v688_v10  ;;  %vm695_vm15 = vweird.f32 %v2614_v13 }
 0x171   : >>> { %vm696_vm0 = vmor %vm694_vm14, %vm695_vm15  ;;  %vm1368_vm14 = vcmp.eq.s32.totalorder %v2776_v24, 7  ;;  %v1046_v24 = vmov %v2776_v24 }
 0x172   : >>> { %v691_v17 = vsub.f32 1.0, %v690_v15  ;;  %v1016_v24 = vmov %v2776_v24  ;;  %vm1050_vm15 = vcmp.eq.s32.totalorder %v1046_v24, %v1043_v27 }
 0x174   : >>> { %v692_v21 = vmul.f32 %v2614_v13, %v691_v17 }
 0x176   : >>> { %v693_v23 = vadd.f32 %v2614_v13, %v692_v21 }
 0x178   : >>> { %v697_v25 = vsel %vm696_vm0, %v2614_v13, %v693_v23  ;;  %v1464_v13 = vld [vmem:[%s2894_s26] sm:$0xff] }
 0x179   : >>> { %v702_v26 = vsel %vm699_vm1, %v701_v22, %v697_v25 }
 0x17a   : >>> { %v709_v28 = vsel %vm708_vm2, 0.0, %v702_v26  ;;  %vm1021_vm2 = vcmp.eq.s32.totalorder %v1016_v24, %v1013_v27 }
 0x17b   : >>> { %v710_v29 = vmul.f32 %v709_v28, %v709_v28  ;;  %v723_v30 = vmul.f32 %v709_v28, %v2856_v44 }
 0x17d   : >>> { %v711_v31 = vadd.f32 1.0, %v710_v29  ;;  %v724_v32 = vsub.f32 %v649_v51, %v723_v30  ;;  %v726_v33 = vadd.f32 %v723_v30, %v653_v52 }
 0x17f   : >>> { %2615 = vrsqrt.f32 %v711_v31  ;;  %728 = vst [vmem:[%s727_s11] sm:$0xff] %v724_v32  ;;  %vm718_vm3 = vweird.f32 %v711_v31  ;;  %s782_s11 = smov [#allocation22] }
 0x180   : >>> { %730 = vst [vmem:[%s729_s30] sm:$0xff] %v726_v33  ;;  %s797_s30 = smov [#allocation22] }
 0x185   : >>> { %v2616_v34 = vpop.eup %2615 }
 0x186   : >>> { %v713_v35 = vmul.f32 %v2616_v34, %v711_v31  ;;  %vm719_vm4 = vweird.f32 %v2616_v34 }
 0x187   : >>> { %vm720_vm5 = vmor %vm718_vm3, %vm719_vm4 }
 0x188   : >>> { %v714_v36 = vmul.f32 %v2616_v34, %v713_v35 }
 0x18a   : >>> { %v715_v37 = vmul.f32 0.5, %v714_v36 }
 0x18c   : >>> { %v716_v38 = vsub.f32 1.5, %v715_v37 }
 0x18e   : >>> { %v717_v39 = vmul.f32 %v2616_v34, %v716_v38 }
 0x190   : >>> { %v721_v40 = vsel %vm720_vm5, %v2616_v34, %v717_v39 }
 0x191   : >>> { %732 = vst [vmem:[%s731_s15] sm:$0xff] %v721_v40  ;;  %v722_v41 = vmul.f32 %v721_v40, %v709_v28  ;;  %s813_s15 = smov [#allocation22] }
 0x193   : >>> { %734 = vst [vmem:[%s733_s16] sm:$0xff] %v722_v41  ;;  %s748_s16 = smov [#allocation23] }
 0x198   : >>> { %v736_v44 = vld [vmem:[%s735_s17] ss:$0 sm:$0xff]  ;;  %s763_s17 = smov [#allocation23] }
 0x199   : >>> { %v751_v45 = vld [vmem:[%s750_s28] ss:$0 sm:$0xff]  ;;  %v745_v47 = vsel %vm744_vm7, %v736_v44, 0.0  ;;  %s779_s28 = smov [#allocation23] }
 0x19a   : >>> { %v760_v48 = vsel %vm759_vm8, %v751_v45, 0.0  ;;  %v767_v49 = vld [vmem:[%s766_s29] ss:$0 sm:$0xff]  ;;  %746 = vadd.xlane.f32.xlu0 %v745_v47  ;;  %s795_s29 = smov [#allocation24] }
 0x19b   : >>> { %761 = vadd.xlane.f32.xlu1 %v760_v48  ;;  %v776_v51 = vsel %vm775_vm9, %v767_v49, 0.0  ;;  %v783_v52 = vld [vmem:[%s782_s11] ss:$0 sm:$0xff]  ;;  %s810_s11 = smov [#allocation24] }
 0x19c   : >>> { %777 = vadd.xlane.f32.xlu2 %v776_v51  ;;  %v798_v53 = vld [vmem:[%s797_s30] ss:$0 sm:$0xff]  ;;  %v792_v55 = vsel %vm791_vm10, %v783_v52, 0.0  ;;  %s826_s30 = smov [#allocation24] }
 0x19d   : >>> { %v814_v54 = vld [vmem:[%s813_s15] ss:$0 sm:$0xff]  ;;  %v807_v56 = vsel %vm806_vm11, %v798_v53, 0.0  ;;  %s829_s15 = smov [#allocation23] }
 0x19e   : >>> { %v823_v57 = vsel %vm822_vm12, %v814_v54, 0.0  ;;  %vm1153_vm12 = vcmp.eq.s32.totalorder %v2778_v27, 23 }
 0x1a2   : >>> { %793 = vadd.xlane.f32.xlu0 %v792_v55 }
 0x1a3   : >>> { %808 = vadd.xlane.f32.xlu1 %v807_v56 }
 0x1a4   : >>> { %824 = vadd.xlane.f32.xlu2 %v823_v57 }
 0x20d   : >>> { %v747_v58 = vpop.xlane.xlu0 %746 }
 0x20e   : >>> { %v762_v59 = vpop.xlane.xlu1 %761  ;;  %749 = vst [vmem:[%s748_s16] sm:$0xff] %v747_v58  ;;  %s2875_s16 = smov [#allocation14] }
 0x20f   : >>> { %v778_v60 = vpop.xlane.xlu2 %777  ;;  %2372 = vst [vmem:[%s763_s17 + $0x8] sm:$0xff] %v762_v59  ;;  %s2877_s17 = smov [#allocation15]  ;;  %v839_v1 = vld [vmem:[%s2875_s16] sm:$0xff] }
 0x210   : >>> { %2373 = vst [vmem:[%s779_s28 + $0x10] sm:$0xff] %v778_v60  ;;  %s1453_s28 = smov [#allocation23]  ;;  %v840_v2 = vld [vmem:[%s2877_s17] sm:$0xff] }
 0x215   : >>> { %v794_v61 = vpop.xlane.xlu0 %793 }
 0x216   : >>> { %v809_v62 = vpop.xlane.xlu1 %808  ;;  %796 = vst [vmem:[%s795_s29] sm:$0xff] %v794_v61  ;;  %s831_s29 = smov [#allocation24] }
 0x217   : >>> { %v825_v63 = vpop.xlane.xlu2 %824  ;;  %2374 = vst [vmem:[%s810_s11 + $0x8] sm:$0xff] %v809_v62  ;;  %v830_v3 = vld [vmem:[%s829_s15] sm:$0xff]  ;;  %s1455_s11 = smov [#allocation24]  ;;  %s860_s15 = smov [#allocation24] }
 0x218   : >>> { %2375 = vst [vmem:[%s826_s30 + $0x10] sm:$0xff] %v825_v63  ;;  %v1454_v5 = vld [vmem:[%s1453_s28] sm:$0xff]  ;;  %v841_v8 = vmul.f32 %v837_v0, %v830_v3  ;;  %v848_v9 = vmul.f32 %v839_v1, %v830_v3  ;;  %v851_v10 = vmul.f32 %v840_v2, %v830_v3  ;;  %v844_v34 = vmul.f32 %v838_v7, %v830_v3  ;;  %s857_s30 = smov [#allocation23]  ;;  %s2905_s28 = smov [#allocation12] }
 0x219   : >>> { %v1465_v14 = vmul.f32 %v1461_v4, %v1454_v5  ;;  %v1468_v19 = vmul.f32 %v1462_v6, %v1454_v5  ;;  %v1472_v29 = vmul.f32 %v1463_v12, %v1454_v5  ;;  %v1475_v32 = vmul.f32 %v1464_v13, %v1454_v5  ;;  %v2376_v38 = vld [vmem:[%s857_s30 + $0x8] sm:$0xff]  ;;  %s894_s30 = smov [#allocation24] }
 0x21f   : >>> { %v832_v11 = vld [vmem:[%s831_s29] sm:$0xff]  ;;  %s2908_s29 = smov [#allocation14]  ;;  %v2377_v39 = vld [vmem:[%s860_s15 + $0x8] sm:$0xff]  ;;  %s2939_s15 = smov [#allocation12] }
 0x220   : >>> { %v842_v15 = vmul.f32 %v839_v1, %v832_v11  ;;  %v847_v16 = vmul.f32 %v837_v0, %v832_v11  ;;  %v850_v17 = vmul.f32 %v838_v7, %v832_v11  ;;  %v1456_v18 = vld [vmem:[%s1455_s11] sm:$0xff]  ;;  %v845_v30 = vmul.f32 %v840_v2, %v832_v11  ;;  %s891_s11 = smov [#allocation23]  ;;  %v2387_v11 = vld [vmem:[%s894_s30 + $0x10] sm:$0xff]  ;;  %s2987_s30 = smov [#allocation12] }
 0x221   : >>> { %v1466_v20 = vmul.f32 %v1463_v12, %v1456_v18  ;;  %v1469_v21 = vmul.f32 %v1464_v13, %v1456_v18  ;;  %v1471_v22 = vmul.f32 %v1461_v4, %v1456_v18  ;;  %v1474_v28 = vmul.f32 %v1462_v6, %v1456_v18 }
 0x222   : >>> { %v843_v23 = vsub.f32 %v841_v8, %v842_v15  ;;  %v849_v25 = vadd.f32 %v848_v9, %v847_v16  ;;  %v852_v26 = vadd.f32 %v851_v10, %v850_v17  ;;  %v846_v37 = vsub.f32 %v844_v34, %v845_v30  ;;  %v2386_v10 = vld [vmem:[%s891_s11 + $0x10] sm:$0xff]  ;;  %s927_s11 = smov [#allocation22] }
 0x223   : >>> { %v1467_v31 = vsub.f32 %v1465_v14, %v1466_v20  ;;  %v1470_v33 = vsub.f32 %v1468_v19, %v1469_v21  ;;  %v1473_v35 = vadd.f32 %v1472_v29, %v1471_v22  ;;  %v1476_v36 = vadd.f32 %v1475_v32, %v1474_v28 }
 0x224   : >>> { %853 = vst [vmem:[%s2873_s27] sm:$0xff] %v843_v23  ;;  %s1481_s27 = smov [#allocation23] }
 0x225   : >>> { %855 = vst [vmem:[%s2875_s16] sm:$0xff] %v849_v25  ;;  %s2915_s16 = smov [#allocation15]  ;;  %v2484_v44 = vld [vmem:[%s1481_s27 + $0x8] sm:$0xff]  ;;  %s1518_s27 = smov [#allocation24] }
 0x226   : >>> { %856 = vst [vmem:[%s2877_s17] sm:$0xff] %v852_v26  ;;  %s1484_s17 = smov [#allocation24]  ;;  %v2495_v21 = vld [vmem:[%s1518_s27 + $0x10] sm:$0xff]  ;;  %s953_s27 = smov [#allocation12] }
 0x227   : >>> { %1477 = vst [vmem:[%s2880_s14] sm:$0xff] %v1467_v31  ;;  %s2912_s14 = smov %s2769_s14  ;;  %v2485_v48 = vld [vmem:[%s1484_s17 + $0x8] sm:$0xff]  ;;  %s2965_s17 = smov [#allocation13] }
 0x228   : >>> { %1478 = vst [vmem:[%s2886_s24] sm:$0xff] %v1470_v33  ;;  %s2920_s24 = smov %s2783_s24 }
 0x229   : >>> { %1479 = vst [vmem:[%s2891_s25] sm:$0xff] %v1473_v35  ;;  %s2924_s25 = smov %s2790_s25 }
 0x22a   : >>> { %1480 = vst [vmem:[%s2894_s26] sm:$0xff] %v1476_v36  ;;  %s2927_s26 = smov %s2797_s26 }
 0x22b   : >>> { %v2378_v40 = vld [vmem:[%s2905_s28 + $0x8] sm:$0xff]  ;;  %854 = vst [vmem:[%s2882_s21] sm:$0xff] %v846_v37  ;;  %s2932_s21 = smov [#allocation13] }
 0x22c   : >>> { %v2380_v41 = vld [vmem:[%s2908_s29 + $0x8] sm:$0xff]  ;;  %v875_v42 = vmul.f32 %v2378_v40, %v2376_v38  ;;  %v881_v43 = vmul.f32 %v2378_v40, %v2377_v39 }
 0x22d   : >>> { %v876_v45 = vmul.f32 %v2380_v41, %v2377_v39  ;;  %v882_v46 = vmul.f32 %v2380_v41, %v2376_v38  ;;  %v2381_v47 = vld [vmem:[%s2915_s16 + $0x8] sm:$0xff] }
 0x22e   : >>> { %v2486_v49 = vld [vmem:[%s2912_s14 + $0x8] sm:$0xff]  ;;  %v879_v58 = vmul.f32 %v2381_v47, %v2377_v39  ;;  %v885_v62 = vmul.f32 %v2381_v47, %v2376_v38 }
 0x22f   : >>> { %v877_v50 = vsub.f32 %v875_v42, %v876_v45  ;;  %v883_v51 = vadd.f32 %v882_v46, %v881_v43  ;;  %v2487_v52 = vld [vmem:[%s2920_s24 + $0x8] sm:$0xff]  ;;  %v1499_v53 = vmul.f32 %v2486_v49, %v2484_v44  ;;  %v1505_v54 = vmul.f32 %v2486_v49, %v2485_v48 }
 0x230   : >>> { %v2488_v55 = vld [vmem:[%s2924_s25 + $0x8] sm:$0xff]  ;;  %v1502_v56 = vmul.f32 %v2487_v52, %v2484_v44  ;;  %v1508_v57 = vmul.f32 %v2487_v52, %v2485_v48 }
 0x231   : >>> { %2382 = vst [vmem:[%s2905_s28 + $0x8] sm:$0xff] %v877_v50  ;;  %v2489_v59 = vld [vmem:[%s2927_s26 + $0x8] sm:$0xff]  ;;  %v1500_v60 = vmul.f32 %v2488_v55, %v2485_v48  ;;  %v1506_v61 = vmul.f32 %v2488_v55, %v2484_v44  ;;  %s2942_s28 = smov [#allocation14] }
 0x232   : >>> { %2384 = vst [vmem:[%s2908_s29 + $0x8] sm:$0xff] %v883_v51  ;;  %v1503_v63 = vmul.f32 %v2489_v59, %v2485_v48  ;;  %v1509_v0 = vmul.f32 %v2489_v59, %v2484_v44  ;;  %v2379_v1 = vld [vmem:[%s2932_s21 + $0x8] sm:$0xff]  ;;  %s1515_s29 = smov [#allocation23] }
 0x233   : >>> { %v1501_v2 = vsub.f32 %v1499_v53, %v1500_v60  ;;  %v1507_v3 = vadd.f32 %v1506_v61, %v1505_v54  ;;  %v878_v4 = vmul.f32 %v2379_v1, %v2376_v38  ;;  %v884_v5 = vmul.f32 %v2379_v1, %v2377_v39  ;;  %v2494_v18 = vld [vmem:[%s1515_s29 + $0x10] sm:$0xff]  ;;  %s2995_s29 = smov [#allocation15]  ;;  %v3018_v61 = vld [vmem:[%s927_s11] ss:$0 sm:$0xff]  ;;  %s981_s11 = smov [#allocation12] }
 0x234   : >>> { %v1504_v6 = vsub.f32 %v1502_v56, %v1503_v63  ;;  %v1510_v7 = vadd.f32 %v1509_v0, %v1508_v57 }
 0x235   : >>> { %2490 = vst [vmem:[%s2912_s14 + $0x8] sm:$0xff] %v1501_v2  ;;  %v880_v8 = vsub.f32 %v878_v4, %v879_v58  ;;  %v886_v9 = vadd.f32 %v885_v62, %v884_v5  ;;  %s2949_s14 = smov %s2769_s14 }
 0x236   : >>> { %2491 = vst [vmem:[%s2920_s24 + $0x8] sm:$0xff] %v1504_v6  ;;  %s2954_s24 = smov %s2783_s24 }
 0x237   : >>> { %2492 = vst [vmem:[%s2924_s25 + $0x8] sm:$0xff] %v1507_v3  ;;  %s2958_s25 = smov %s2790_s25 }
 0x238   : >>> { %v2388_v12 = vld [vmem:[%s2939_s15 + $0x10] sm:$0xff]  ;;  %2493 = vst [vmem:[%s2927_s26 + $0x8] sm:$0xff] %v1510_v7  ;;  %s2961_s26 = smov %s2797_s26 }
 0x239   : >>> { %v2390_v13 = vld [vmem:[%s2942_s28 + $0x10] sm:$0xff]  ;;  %v909_v14 = vmul.f32 %v2388_v12, %v2386_v10  ;;  %v915_v15 = vmul.f32 %v2388_v12, %v2387_v11  ;;  %2383 = vst [vmem:[%s2932_s21 + $0x8] sm:$0xff] %v880_v8  ;;  %s925_s21 = smov [#allocation21] }
 0x23a   : >>> { %v910_v16 = vmul.f32 %v2390_v13, %v2387_v11  ;;  %v916_v17 = vmul.f32 %v2390_v13, %v2386_v10  ;;  %2385 = vst [vmem:[%s2915_s16 + $0x8] sm:$0xff] %v886_v9  ;;  %s2969_s16 = smov [#allocation15]  ;;  %v3016_v60 = vld [vmem:[%s925_s21] ss:$0 sm:$0xff]  ;;  %s959_s21 = smov [#allocation15] }
 0x23c   : >>> { %v911_v19 = vsub.f32 %v909_v14, %v910_v16  ;;  %v917_v20 = vadd.f32 %v916_v17, %v915_v15  ;;  %v2496_v22 = vld [vmem:[%s2949_s14 + $0x10] sm:$0xff] }
 0x23d   : >>> { %v2497_v23 = vld [vmem:[%s2954_s24 + $0x10] sm:$0xff]  ;;  %v1533_v25 = vmul.f32 %v2496_v22, %v2494_v18  ;;  %v1539_v26 = vmul.f32 %v2496_v22, %v2495_v21 }
 0x23e   : >>> { %2392 = vst [vmem:[%s2939_s15 + $0x10] sm:$0xff] %v911_v19  ;;  %v2498_v28 = vld [vmem:[%s2958_s25 + $0x10] sm:$0xff]  ;;  %v1536_v29 = vmul.f32 %v2497_v23, %v2494_v18  ;;  %v1542_v30 = vmul.f32 %v2497_v23, %v2495_v21  ;;  %s2989_s15 = smov [#allocation13] }
 0x23f   : >>> { %v2499_v31 = vld [vmem:[%s2961_s26 + $0x10] sm:$0xff]  ;;  %v1534_v32 = vmul.f32 %v2498_v28, %v2495_v21  ;;  %v1540_v33 = vmul.f32 %v2498_v28, %v2494_v18  ;;  %2394 = vst [vmem:[%s2942_s28 + $0x10] sm:$0xff] %v917_v20  ;;  %s2993_s28 = smov [#allocation14] }
 0x240   : >>> { %v1537_v34 = vmul.f32 %v2499_v31, %v2495_v21  ;;  %v1543_v35 = vmul.f32 %v2499_v31, %v2494_v18  ;;  %v2389_v36 = vld [vmem:[%s2965_s17 + $0x10] sm:$0xff] }
 0x241   : >>> { %v1535_v37 = vsub.f32 %v1533_v25, %v1534_v32  ;;  %v1541_v38 = vadd.f32 %v1540_v33, %v1539_v26  ;;  %v2391_v39 = vld [vmem:[%s2969_s16 + $0x10] sm:$0xff]  ;;  %v912_v40 = vmul.f32 %v2389_v36, %v2386_v10  ;;  %v918_v41 = vmul.f32 %v2389_v36, %v2387_v11 }
 0x242   : >>> { %v1538_v42 = vsub.f32 %v1536_v29, %v1537_v34  ;;  %v1544_v43 = vadd.f32 %v1543_v35, %v1542_v30  ;;  %v913_v44 = vmul.f32 %v2391_v39, %v2387_v11  ;;  %v919_v45 = vmul.f32 %v2391_v39, %v2386_v10 }
 0x243   : >>> { %2500 = vst [vmem:[%s2949_s14 + $0x10] sm:$0xff] %v1535_v37  ;;  %s2980_s14 = smov %s2769_s14 }
 0x244   : >>> { %2501 = vst [vmem:[%s2954_s24 + $0x10] sm:$0xff] %v1538_v42  ;;  %v914_v46 = vsub.f32 %v912_v40, %v913_v44  ;;  %v920_v47 = vadd.f32 %v919_v45, %v918_v41  ;;  %s3006_s24 = smov %s2783_s24 }
 0x245   : >>> { %2502 = vst [vmem:[%s2958_s25 + $0x10] sm:$0xff] %v1541_v38  ;;  %s2983_s25 = smov %s2790_s25  ;;  %v933_v1 = vld [vmem:[%s2987_s30] sm:$0xff] }
 0x246   : >>> { %2503 = vst [vmem:[%s2961_s26 + $0x10] sm:$0xff] %v1544_v43  ;;  %s3033_s26 = smov %s2797_s26  ;;  %v935_v12 = vld [vmem:[%s2993_s28] sm:$0xff]  ;;  %v937_v20 = vmul.f32 %v933_v1, %v3016_v60  ;;  %v940_v26 = vmul.f32 %v933_v1, %v3018_v61 }
 0x247   : >>> { %2393 = vst [vmem:[%s2965_s17 + $0x10] sm:$0xff] %v914_v46  ;;  %v943_v31 = vmul.f32 %v935_v12, %v3016_v60  ;;  %v946_v35 = vmul.f32 %v935_v12, %v3018_v61  ;;  %s955_s17 = smov [#allocation13]  ;;  %v1056_v12 = vadd.s32 8, %v1046_v24 }
 0x248   : >>> { %2395 = vst [vmem:[%s2969_s16 + $0x10] sm:$0xff] %v920_v47  ;;  %s957_s16 = smov [#allocation14] }
 0x249   : >>> { %vm1057_vm0 = vcmp.eq.s32.totalorder %v1056_v12, %v1043_v27 }
 0x24a   : >>> { %v1551_v48 = vld [vmem:[%s2980_s14] ss:$0 sm:$0xff]  ;;  %v2505_v50 = vld [vmem:[%s2980_s14 + $0x7] ss:$0 sm:$0xff]  ;;  %v2506_v52 = vld [vmem:[%s2980_s14 + $0x7] sm:$0xfe] }
 0x24b   : >>> { %v2504_v49 = vld [vmem:[%s2980_s14 - $0x1] sm:$0xfe]  ;;  %v2507_v53 = vld [vmem:[%s2980_s14 + $0xf] ss:$0 sm:$0xff]  ;;  %v2509_v54 = vld [vmem:[%s2980_s14 + $0xf] sm:$0xfe]  ;;  %v1569_v55 = vsel %vm1333_vm13, %v2505_v50, %v2506_v52 }
 0x24c   : >>> { %v1558_v51 = vsel %vm1333_vm13, %v1551_v48, %v2504_v49  ;;  %v1580_v56 = vsel %vm1333_vm13, %v2507_v53, %v2509_v54  ;;  %v2510_v57 = vld [vmem:[%s2980_s14 + $0x17] ss:$0 sm:$0xff]  ;;  %v1584_v58 = vld [vmem:[%s2983_s25] ss:$0 sm:$0xff]  ;;  %2508 = vst [vmem:[%s2980_s14 + $0x8] sm:$0xff] %v1569_v55 }
 0x24d   : >>> { %1561 = vst [vmem:[%s2980_s14] sm:$0xff] %v1558_v51  ;;  %v2513_v59 = vld [vmem:[%s2983_s25 + $0x11] sm:$0x7f]  ;;  %v2514_v63 = vld [vmem:[%s2983_s25 + $0x10] ss:$0 sm:$0xff]  ;;  %v2516_v0 = vld [vmem:[%s2983_s25 + $0x9] sm:$0x7f] }
 0x24e   : >>> { %v1593_v62 = vsel %vm1368_vm14, %v2510_v57, %v2513_v59  ;;  %2511 = vst [vmem:[%s2980_s14 + $0x10] sm:$0xff] %v1580_v56  ;;  %v1602_v2 = vsel %vm1368_vm14, %v2514_v63, %v2516_v0  ;;  %v2517_v3 = vld [vmem:[%s2983_s25 + $0x8] ss:$0 sm:$0xff]  ;;  %v2519_v4 = vld [vmem:[%s2983_s25 + $0x1] sm:$0x7f] }
 0x24f   : >>> { %v934_v5 = vld [vmem:[%s2989_s15] sm:$0xff]  ;;  %2512 = vst [vmem:[%s2980_s14 + $0x1] sm:$0x1] %v1584_v58  ;;  %v1610_v6 = vsel %vm1368_vm14, %v2517_v3, %v2519_v4  ;;  %v2522_v11 = vld [vmem:[%s3006_s24 + $0x7] sm:$0xfe] }
 0x250   : >>> { %v1615_v7 = vld [vmem:[%s3006_s24] ss:$0 sm:$0xff]  ;;  %2515 = vst [vmem:[%s2983_s25 + $0x10] sm:$0xff] %v1593_v62  ;;  %v2521_v10 = vld [vmem:[%s3006_s24 + $0x7] ss:$0 sm:$0xff]  ;;  %v938_v21 = vmul.f32 %v934_v5, %v3018_v61  ;;  %v941_v28 = vmul.f32 %v934_v5, %v3016_v60 }
 0x251   : >>> { %v2520_v8 = vld [vmem:[%s3006_s24 - $0x1] sm:$0xfe]  ;;  %2518 = vst [vmem:[%s2983_s25 + $0x8] sm:$0xff] %v1602_v2  ;;  %v1633_v13 = vsel %vm1333_vm13, %v2521_v10, %v2522_v11  ;;  %v2523_v14 = vld [vmem:[%s3006_s24 + $0xf] ss:$0 sm:$0xff] }
 0x252   : >>> { %v1622_v9 = vsel %vm1333_vm13, %v1615_v7, %v2520_v8  ;;  %v2525_v15 = vld [vmem:[%s3006_s24 + $0xf] sm:$0xfe]  ;;  %v936_v16 = vld [vmem:[%s2995_s29] sm:$0xff]  ;;  %1612 = vst [vmem:[%s2983_s25] sm:$0xff] %v1610_v6  ;;  %v2526_v18 = vld [vmem:[%s3006_s24 + $0x17] ss:$0 sm:$0xff]  ;;  %v939_v38 = vsub.f32 %v937_v20, %v938_v21  ;;  %v942_v39 = vadd.f32 %v941_v28, %v940_v26 }
 0x253   : >>> { %v1644_v17 = vsel %vm1333_vm13, %v2523_v14, %v2525_v15  ;;  %v2529_v19 = vld [vmem:[%s3033_s26 + $0x11] sm:$0x7f]  ;;  %1625 = vst [vmem:[%s3006_s24] sm:$0xff] %v1622_v9  ;;  %v2530_v22 = vld [vmem:[%s3033_s26 + $0x10] ss:$0 sm:$0xff]  ;;  %v2532_v23 = vld [vmem:[%s3033_s26 + $0x9] sm:$0x7f]  ;;  %v944_v32 = vmul.f32 %v936_v16, %v3018_v61  ;;  %v947_v36 = vmul.f32 %v936_v16, %v3016_v60 }
 0x254   : >>> { %v2533_v25 = vld [vmem:[%s3033_s26 + $0x8] ss:$0 sm:$0xff]  ;;  %2524 = vst [vmem:[%s3006_s24 + $0x8] sm:$0xff] %v1633_v13  ;;  %v1657_v29 = vsel %vm1368_vm14, %v2526_v18, %v2529_v19  ;;  %v2535_v30 = vld [vmem:[%s3033_s26 + $0x1] sm:$0x7f]  ;;  %v1666_v34 = vsel %vm1368_vm14, %v2530_v22, %v2532_v23  ;;  %v1063_v13 = vadd.s32 16, %v1046_v24 }
 0x255   : >>> { %2527 = vst [vmem:[%s3006_s24 + $0x10] sm:$0xff] %v1644_v17  ;;  %v1648_v33 = vld [vmem:[%s3033_s26] ss:$0 sm:$0xff]  ;;  %v1674_v37 = vsel %vm1368_vm14, %v2533_v25, %v2535_v30  ;;  %v945_v40 = vsub.f32 %v943_v31, %v944_v32  ;;  %v948_v41 = vadd.f32 %v947_v36, %v946_v35  ;;  %v1028_v14 = vadd.s32 8, %v1016_v24 }
 0x256   : >>> { %2528 = vst [vmem:[%s3006_s24 + $0x1] sm:$0x1] %v1648_v33  ;;  %v1073_v24 = vmov %v2776_v24  ;;  %vm1064_vm1 = vcmp.eq.s32.totalorder %v1063_v13, %v1043_v27  ;;  %v1070_v27 = vmov %v2778_v27 }
 0x257   : >>> { %2531 = vst [vmem:[%s3033_s26 + $0x10] sm:$0xff] %v1657_v29  ;;  %v1083_v15 = vadd.s32 8, %v1073_v24  ;;  %vm1029_vm3 = vcmp.eq.s32.totalorder %v1028_v14, %v1013_v27  ;;  %v1090_v19 = vadd.s32 16, %v1073_v24  ;;  %vm1077_vm5 = vcmp.eq.s32.totalorder %v1073_v24, %v1070_v27 }
 0x258   : >>> { %2534 = vst [vmem:[%s3033_s26 + $0x8] sm:$0xff] %v1666_v34 }
 0x259   : >>> { %1676 = vst [vmem:[%s3033_s26] sm:$0xff] %v1674_v37  ;;  %vm1084_vm7 = vcmp.eq.s32.totalorder %v1083_v15, %v1070_v27  ;;  %vm1091_vm8 = vcmp.eq.s32.totalorder %v1090_v19, %v1070_v27 }
 0x25a   : >>> { %949 = vst [vmem:[%s2987_s30] sm:$0xff] %v939_v38  ;;  %s983_s30 = smov [#allocation13] }
 0x25b   : >>> { %950 = vst [vmem:[%s2989_s15] sm:$0xff] %v942_v39  ;;  %s985_s15 = smov [#allocation14] }
 0x25c   : >>> { %951 = vst [vmem:[%s2993_s28] sm:$0xff] %v945_v40  ;;  %s987_s28 = smov [#allocation15] }
 0x25d   : >>> { %952 = vst [vmem:[%s2995_s29] sm:$0xff] %v948_v41  ;;  %s1010_s29 = smov [#allocation19] }
 0x261   : >>> { %v2396_v42 = vld [vmem:[%s953_s27 + $0x8] sm:$0xff] }
 0x262   : >>> { %v2397_v43 = vld [vmem:[%s955_s17 + $0x8] sm:$0xff]  ;;  %v965_v44 = vmul.f32 %v2396_v42, %v3016_v60  ;;  %v968_v45 = vmul.f32 %v2396_v42, %v3018_v61 }
 0x263   : >>> { %v966_v46 = vmul.f32 %v2397_v43, %v3018_v61  ;;  %v969_v47 = vmul.f32 %v2397_v43, %v3016_v60  ;;  %v2398_v48 = vld [vmem:[%s957_s16 + $0x8] sm:$0xff] }
 0x264   : >>> { %v2399_v49 = vld [vmem:[%s959_s21 + $0x8] sm:$0xff]  ;;  %v971_v50 = vmul.f32 %v2398_v48, %v3016_v60  ;;  %v974_v51 = vmul.f32 %v2398_v48, %v3018_v61 }
 0x265   : >>> { %v967_v52 = vsub.f32 %v965_v44, %v966_v46  ;;  %v970_v53 = vadd.f32 %v969_v47, %v968_v45  ;;  %v972_v54 = vmul.f32 %v2399_v49, %v3018_v61  ;;  %v975_v55 = vmul.f32 %v2399_v49, %v3016_v60 }
 0x267   : >>> { %2400 = vst [vmem:[%s953_s27 + $0x8] sm:$0xff] %v967_v52  ;;  %v973_v56 = vsub.f32 %v971_v50, %v972_v54  ;;  %v976_v57 = vadd.f32 %v975_v55, %v974_v51  ;;  %s3108_s27 = smov [#allocation13] }
 0x268   : >>> { %2401 = vst [vmem:[%s955_s17 + $0x8] sm:$0xff] %v970_v53  ;;  %s3110_s17 = smov [#allocation12] }
 0x269   : >>> { %2402 = vst [vmem:[%s957_s16 + $0x8] sm:$0xff] %v973_v56  ;;  %s3112_s16 = smov [#allocation14] }
 0x26a   : >>> { %2403 = vst [vmem:[%s959_s21 + $0x8] sm:$0xff] %v976_v57  ;;  %s3125_s21 = smov [#allocation15] }
 0x26e   : >>> { %v2404_v58 = vld [vmem:[%s981_s11 + $0x10] sm:$0xff] }
 0x26f   : >>> { %v2405_v59 = vld [vmem:[%s983_s30 + $0x10] sm:$0xff]  ;;  %v996_v62 = vmul.f32 %v2404_v58, %v3018_v61  ;;  %v993_v63 = vmul.f32 %v2404_v58, %v3016_v60 }
 0x270   : >>> { %v994_v0 = vmul.f32 %v2405_v59, %v3018_v61  ;;  %v997_v1 = vmul.f32 %v2405_v59, %v3016_v60  ;;  %v2406_v2 = vld [vmem:[%s985_s15 + $0x10] sm:$0xff] }
 0x271   : >>> { %v2407_v3 = vld [vmem:[%s987_s28 + $0x10] sm:$0xff]  ;;  %v999_v4 = vmul.f32 %v2406_v2, %v3016_v60  ;;  %v1002_v5 = vmul.f32 %v2406_v2, %v3018_v61 }
 0x272   : >>> { %v998_v6 = vadd.f32 %v997_v1, %v996_v62  ;;  %v995_v7 = vsub.f32 %v993_v63, %v994_v0  ;;  %v1000_v8 = vmul.f32 %v2407_v3, %v3018_v61  ;;  %v1003_v9 = vmul.f32 %v2407_v3, %v3016_v60  ;;  %v1017_v61 = vld [vmem:[%s1010_s29] ss:$0 sm:$0xff]  ;;  %s2658_s29 = smov 1  }
 0x273   : >>> { %v1036_v60 = vadd.s32 16, %v1016_v24  ;;  %v1101_v24 = vmov %v2776_v24 }
 0x274   : >>> { %2409 = vst [vmem:[%s983_s30 + $0x10] sm:$0xff] %v998_v6  ;;  %v1001_v10 = vsub.f32 %v999_v4, %v1000_v8  ;;  %v1004_v11 = vadd.f32 %v1003_v9, %v1002_v5  ;;  %v1113_v30 = vadd.s32 8, %v1101_v24  ;;  %v1121_v33 = vadd.s32 16, %v1101_v24  ;;  %s3139_s30 = smov [#allocation13] }
 0x275   : >>> { %2408 = vst [vmem:[%s981_s11 + $0x10] sm:$0xff] %v995_v7  ;;  %vm1037_vm4 = vcmp.eq.s32.totalorder %v1036_v60, %v1013_v27  ;;  %s1095_s11 = smov [#allocation20]  ;;  %v1098_v27 = vmov %v2778_v27 }
 0x276   : >>> { %2410 = vst [vmem:[%s985_s15 + $0x10] sm:$0xff] %v1001_v10  ;;  %v1102_v37 = vld [vmem:[%s1095_s11] ss:$0 sm:$0xff]  ;;  %vm1106_vm9 = vcmp.eq.s32.totalorder %v1101_v24, %v1098_v27  ;;  %vm1114_vm10 = vcmp.eq.s32.totalorder %v1113_v30, %v1098_v27  ;;  %vm1122_vm11 = vcmp.eq.s32.totalorder %v1121_v33, %v1098_v27  ;;  %s3145_s15 = smov [#allocation12]  ;;  %s3176_s11 = smov [#allocation15]  ;;  %v389_v24 = vmov (%p546_p9), %v2776_v24 }
 0x277   : >>> { %2411 = vst [vmem:[%s987_s28 + $0x10] sm:$0xff] %v1004_v11  ;;  %s3147_s28 = smov [#allocation12]  ;;  %v428_v24 = vmov (%p546_p9), %v2776_v24 }
 0x27b   : >>> { %v1047_v16 = vld [vmem:[%s3108_s27] sm:$0xff]  ;;  %v2416_v17 = vld [vmem:[%s3108_s27 + $0x8] sm:$0xff]  ;;  %v2418_v18 = vld [vmem:[%s3108_s27 + $0x10] sm:$0xff] }
 0x27c   : >>> { %v1051_v20 = vsel %vm1050_vm15, 0.0, %v1047_v16  ;;  %v1058_v21 = vsel %vm1057_vm0, 0.0, %v2416_v17  ;;  %v1065_v22 = vsel %vm1064_vm1, 0.0, %v2418_v18  ;;  %v1018_v23 = vld [vmem:[%s3110_s17] sm:$0xff]  ;;  %v2412_v25 = vld [vmem:[%s3110_s17 + $0x8] sm:$0xff]  ;;  %v2414_v26 = vld [vmem:[%s3110_s17 + $0x10] sm:$0xff] }
 0x27d   : >>> { %1052 = vst [vmem:[%s3108_s27] sm:$0xff] %v1051_v20  ;;  %v1022_v28 = vsel %vm1021_vm2, %v1017_v61, %v1018_v23  ;;  %v1074_v29 = vld [vmem:[%s3112_s16] sm:$0xff]  ;;  %v1030_v31 = vsel %vm1029_vm3, %v1017_v61, %v2412_v25  ;;  %v2420_v32 = vld [vmem:[%s3112_s16 + $0x8] sm:$0xff]  ;;  %v1038_v34 = vsel %vm1037_vm4, %v1017_v61, %v2414_v26  ;;  %v2422_v35 = vld [vmem:[%s3112_s16 + $0x10] sm:$0xff]  ;;  %vm1140_vm15 = vcmp.eq.s32.totalorder %v2778_v27, 1 }
 0x27e   : >>> { %2417 = vst [vmem:[%s3108_s27 + $0x8] sm:$0xff] %v1058_v21  ;;  %v1078_v36 = vsel %vm1077_vm5, 0.0, %v1074_v29  ;;  %v1103_v38 = vld [vmem:[%s3125_s21] sm:$0xff]  ;;  %v1085_v39 = vsel %vm1084_vm7, 0.0, %v2420_v32  ;;  %v2424_v40 = vld [vmem:[%s3125_s21 + $0x8] sm:$0xff]  ;;  %v1092_v41 = vsel %vm1091_vm8, 0.0, %v2422_v35 }
 0x27f   : >>> { %2419 = vst [vmem:[%s3108_s27 + $0x10] sm:$0xff] %v1065_v22  ;;  %v2426_v42 = vld [vmem:[%s3125_s21 + $0x10] sm:$0xff]  ;;  %v1107_v43 = vsel %vm1106_vm9, %v1102_v37, %v1103_v38  ;;  %v1115_v44 = vsel %vm1114_vm10, %v1102_v37, %v2424_v40  ;;  %s3160_s27 = smov [#allocation14]  ;;  %vm1136_vm0 = vcmp.eq.s32.totalorder %v2778_v27, 0  ;;  %v386_v27 = vmov (%p546_p9), %v2778_v27 }
 0x280   : >>> { %1023 = vst [vmem:[%s3110_s17] sm:$0xff] %v1022_v28  ;;  %v1123_v45 = vsel %vm1122_vm11, %v1102_v37, %v2426_v42  ;;  %v425_v27 = vmov (%p546_p9), %v2778_v27 }
 0x281   : >>> { %2413 = vst [vmem:[%s3110_s17 + $0x8] sm:$0xff] %v1030_v31 }
 0x282   : >>> { %2415 = vst [vmem:[%s3110_s17 + $0x10] sm:$0xff] %v1038_v34  ;;  %s3165_s17 = smov [#allocation13] }
 0x283   : >>> { %1079 = vst [vmem:[%s3112_s16] sm:$0xff] %v1078_v36 }
 0x284   : >>> { %2421 = vst [vmem:[%s3112_s16 + $0x8] sm:$0xff] %v1085_v39 }
 0x285   : >>> { %2423 = vst [vmem:[%s3112_s16 + $0x10] sm:$0xff] %v1092_v41  ;;  %s2659_s16 = smov 127  }
 0x286   : >>> { %v1127_v46 = vld [vmem:[%s3139_s30] sm:$0xff]  ;;  %1108 = vst [vmem:[%s3125_s21] sm:$0xff] %v1107_v43  ;;  %v2428_v50 = vld [vmem:[%s3165_s17 + $0x8] sm:$0xff]  ;;  %v2432_v54 = vld [vmem:[%s3189_s1 + $0x10] sm:$0xff] }
 0x287   : >>> { %1128 = vrot.lane.b32.xlu0 %v1127_v46, %s2658_s29  ;;  %2425 = vst [vmem:[%s3125_s21 + $0x8] sm:$0xff] %v1115_v44 }
 0x288   : >>> { %2427 = vst [vmem:[%s3125_s21 + $0x10] sm:$0xff] %v1123_v45  ;;  %s3171_s21 = smov [#allocation12] }
 0x289   : >>> { %v3154_v47 = vld [vmem:[%s3145_s15 + $0x8] sm:$0xff]  ;;  %v1131_v48 = vld [vmem:[%s3147_s28] sm:$0xff]  ;;  %v3174_v51 = vld [vmem:[%s3171_s21 + $0x10] sm:$0xff] }
 0x28a   : >>> { %1164 = vrot.lane.b32.xlu2 %v3154_v47, %s2658_s29  ;;  %1132 = vrot.lane.b32.xlu1 %v1131_v48, %s2658_s29 }
 0x28c   : >>> { %v3163_v49 = vld [vmem:[%s3160_s27] sm:$0xff]  ;;  %v3184_v53 = vld [vmem:[%s3178_s0 + $0x8] sm:$0xff]  ;;  %v3200_v56 = vld [vmem:[%s3196_s3 + $0x10] sm:$0xff] }
 0x28f   : >>> { %1232 = vrot.lane.b32.xlu0 %v3163_v49, %s2658_s29  ;;  %v1227_v52 = vld [vmem:[%s3176_s11] sm:$0xff]  ;;  %v2440_v55 = vld [vmem:[%s3193_s2 + $0x8] sm:$0xff]  ;;  %v2444_v57 = vld [vmem:[%s3204_s18 + $0x10] sm:$0xff] }
 0x292   : >>> { %1149 = vrot.lane.b32.xlu2 %v1127_v46, %s2659_s16  ;;  %1160 = vrot.lane.b32.xlu1 %v2428_v50, %s2658_s29 }
 0x297   : >>> { %1196 = vrot.lane.b32.xlu0 %v3174_v51, %s2658_s29 }
 0x29a   : >>> { %1228 = vrot.lane.b32.xlu2 %v1227_v52, %s2658_s29  ;;  %1264 = vrot.lane.b32.xlu1 %v3184_v53, %s2658_s29 }
 0x29f   : >>> { %1181 = vrot.lane.b32.xlu0 %v2428_v50, %s2659_s16 }
 0x2a2   : >>> { %1192 = vrot.lane.b32.xlu2 %v2432_v54, %s2658_s29  ;;  %1249 = vrot.lane.b32.xlu1 %v1227_v52, %s2659_s16 }
 0x2a7   : >>> { %1260 = vrot.lane.b32.xlu0 %v2440_v55, %s2658_s29 }
 0x2aa   : >>> { %1296 = vrot.lane.b32.xlu2 %v3200_v56, %s2658_s29  ;;  %1213 = vrot.lane.b32.xlu1 %v2432_v54, %s2659_s16 }
 0x2af   : >>> { %1281 = vrot.lane.b32.xlu0 %v2440_v55, %s2659_s16 }
 0x2b2   : >>> { %1292 = vrot.lane.b32.xlu2 %v2444_v57, %s2658_s29  ;;  %1313 = vrot.lane.b32.xlu1 %v2444_v57, %s2659_s16 }
 0x2e4   : >>> { %v1165_v58 = vpop.permute.xlu2 %1164 }
 0x2e5   : >>> { %v1169_v9 = vsel %vm1136_vm0, %v3154_v47, %v1165_v58 }
 0x2ec   : >>> { %v1150_v59 = vpop.permute.xlu2 %1149 }
 0x2ed   : >>> { %v1154_v62 = vsel %vm1153_vm12, %v1131_v48, %v1150_v59 }
 0x2ee   : >>> { %1220 = vst [vmem:[%s3139_s30] sm:$0xff] %v1154_v62  ;;  %s3245_s30 = smov [#allocation12] }
 0x2f4   : >>> { %v1229_v63 = vpop.permute.xlu2 %1228 }
 0x2f9   : >>> { %v1129_v0 = vpop.permute.xlu0 %1128 }
 0x2fc   : >>> { %v1133_v1 = vpop.permute.xlu1 %1132  ;;  %v1193_v6 = vpop.permute.xlu2 %1192 }
 0x2fd   : >>> { %v1137_v2 = vsel %vm1136_vm0, %v1131_v48, %v1133_v1 }
 0x2fe   : >>> { %v1141_v3 = vsel %vm1140_vm15, %v1129_v0, %v1137_v2 }
 0x2ff   : >>> { %v1147_v4 = vsel %vm2151_vm6, %v1141_v3, 0.0 }
 0x300   : >>> { %1219 = vst [vmem:[%s3147_s28] sm:$0xff] %v1147_v4  ;;  %s3293_s28 = smov [#allocation13] }
 0x301   : >>> { %v1233_v5 = vpop.permute.xlu0 %1232 }
 0x302   : >>> { %v1237_v7 = vsel %vm1136_vm0, %v3163_v49, %v1233_v5 }
 0x303   : >>> { %v1241_v8 = vsel %vm1140_vm15, %v1229_v63, %v1237_v7 }
 0x304   : >>> { %v1247_v10 = vsel %vm2151_vm6, %v1241_v8, 0.0  ;;  %v1161_v11 = vpop.permute.xlu1 %1160  ;;  %v1297_v15 = vpop.permute.xlu2 %1296 }
 0x305   : >>> { %v1173_v12 = vsel %vm1140_vm15, %v1161_v11, %v1169_v9  ;;  %1319 = vst [vmem:[%s3160_s27] sm:$0xff] %v1247_v10  ;;  %v1301_v35 = vsel %vm1136_vm0, %v3200_v56, %v1297_v15 }
 0x306   : >>> { %v1179_v13 = vsel %vm2151_vm6, %v1173_v12, 0.0 }
 0x307   : >>> { %2436 = vst [vmem:[%s3145_s15 + $0x8] sm:$0xff] %v1179_v13  ;;  %s3291_s15 = smov [#allocation14] }
 0x309   : >>> { %v1197_v14 = vpop.permute.xlu0 %1196 }
 0x30a   : >>> { %v1201_v60 = vsel %vm1136_vm0, %v3174_v51, %v1197_v14 }
 0x30b   : >>> { %v1205_v61 = vsel %vm1140_vm15, %v1193_v6, %v1201_v60 }
 0x30c   : >>> { %v1211_v16 = vsel %vm2151_vm6, %v1205_v61, 0.0  ;;  %v1265_v17 = vpop.permute.xlu1 %1264  ;;  %v1293_v31 = vpop.permute.xlu2 %1292 }
 0x30d   : >>> { %2438 = vst [vmem:[%s3171_s21 + $0x10] sm:$0xff] %v1211_v16  ;;  %v1305_v36 = vsel %vm1140_vm15, %v1293_v31, %v1301_v35  ;;  %v1269_v37 = vsel %vm1136_vm0, %v3184_v53, %v1265_v17 }
 0x30e   : >>> { %v1311_v41 = vsel %vm2151_vm6, %v1305_v36, 0.0 }
 0x311   : >>> { %v1182_v18 = vpop.permute.xlu0 %1181 }
 0x312   : >>> { %v1186_v19 = vsel %vm1153_vm12, %v3154_v47, %v1182_v18 }
 0x313   : >>> { %2437 = vst [vmem:[%s3165_s17 + $0x8] sm:$0xff] %v1186_v19 }
 0x314   : >>> { %v1250_v20 = vpop.permute.xlu1 %1249  ;;  %v1327_v21 = vld [vmem:[%s3245_s30] ss:$0 sm:$0xff]  ;;  %v2453_v23 = vld [vmem:[%s3245_s30 + $0x7] ss:$0 sm:$0xff]  ;;  %v2454_v28 = vld [vmem:[%s3245_s30 + $0x7] sm:$0xfe] }
 0x315   : >>> { %v2452_v22 = vld [vmem:[%s3245_s30 - $0x1] sm:$0xfe]  ;;  %v1254_v25 = vsel %vm1153_vm12, %v3163_v49, %v1250_v20  ;;  %v2455_v29 = vld [vmem:[%s3245_s30 + $0xf] ss:$0 sm:$0xff]  ;;  %v2457_v30 = vld [vmem:[%s3245_s30 + $0xf] sm:$0xfe]  ;;  %v1345_v32 = vsel %vm1333_vm13, %v2453_v23, %v2454_v28 }
 0x316   : >>> { %v1334_v26 = vsel %vm1333_vm13, %v1327_v21, %v2452_v22  ;;  %1320 = vst [vmem:[%s3176_s11] sm:$0xff] %v1254_v25  ;;  %v1356_v33 = vsel %vm1333_vm13, %v2455_v29, %v2457_v30  ;;  %v2458_v34 = vld [vmem:[%s3245_s30 + $0x17] ss:$0 sm:$0xff]  ;;  %v408_v29 = vadd.s32 (%p546_p9), 8, %v389_v24 }
 0x317   : >>> { %1337 = vst [vmem:[%s3245_s30] sm:$0xff] %v1334_v26 }
 0x318   : >>> { %2456 = vst [vmem:[%s3245_s30 + $0x8] sm:$0xff] %v1345_v32 }
 0x319   : >>> { %v1261_v38 = vpop.permute.xlu0 %1260  ;;  %2459 = vst [vmem:[%s3245_s30 + $0x10] sm:$0xff] %v1356_v33 }
 0x31a   : >>> { %v1273_v39 = vsel %vm1140_vm15, %v1261_v38, %v1269_v37 }
 0x31b   : >>> { %v1279_v40 = vsel %vm2151_vm6, %v1273_v39, 0.0 }
 0x31c   : >>> { %v1214_v42 = vpop.permute.xlu1 %1213  ;;  %2448 = vst [vmem:[%s3178_s0 + $0x8] sm:$0xff] %v1279_v40  ;;  %s1390_s0 = smov [#allocation15] }
 0x31d   : >>> { %v1218_v43 = vsel %vm1153_vm12, %v3174_v51, %v1214_v42  ;;  %2450 = vst [vmem:[%s3196_s3 + $0x10] sm:$0xff] %v1311_v41  ;;  %s429_s3 = smov (%p546_p9), [#allocation13]  ;;  %v418_v42 = vadd.s32 (%p546_p9), 16, %v389_v24 }
 0x31e   : >>> { %2439 = vst [vmem:[%s3189_s1 + $0x10] sm:$0xff] %v1218_v43  ;;  %s1677_s1 = sadd.s32 (%p546_p9), 1, %s2651_s20  }
 0x31f   : >> { %vm419_vm1 = vcmp.eq.s32.totalorder (%p546_p9), %v418_v42, %v386_v27  ;;  %p542_p10 = scmp.ge.s32.totalorder (%p546_p9), %s1677_s1, 15  ;;  %s3469_s20 = smov (%p546_p9), %s1677_s1 }
 0x321   : >>> { %v1282_v44 = vpop.permute.xlu0 %1281 }
 0x322   : >>> { %v1286_v45 = vsel %vm1153_vm12, %v3184_v53, %v1282_v44 }
 0x323   : >>> { %2449 = vst [vmem:[%s3193_s2 + $0x8] sm:$0xff] %v1286_v45  ;;  %s390_s2 = smov (%p546_p9), [#allocation12] }
 0x324   : >>> { %v2462_v46 = vld [vmem:[%s3291_s15 + $0x10] ss:$0 sm:$0xff]  ;;  %v1360_v55 = vld [vmem:[%s3291_s15] ss:$0 sm:$0xff]  ;;  %v1314_v53 = vpop.permute.xlu1 %1313  ;;  %v2464_v62 = vld [vmem:[%s3291_s15 + $0x9] sm:$0x7f] }
 0x325   : >>> { %v1391_v47 = vld [vmem:[%s3293_s28] ss:$0 sm:$0xff]  ;;  %v2469_v49 = vld [vmem:[%s3293_s28 + $0x7] ss:$0 sm:$0xff]  ;;  %v2470_v51 = vld [vmem:[%s3293_s28 + $0x7] sm:$0xfe]  ;;  %v1378_v1 = vsel %vm1368_vm14, %v2462_v46, %v2464_v62  ;;  %v1318_v4 = vsel %vm1153_vm12, %v3200_v56, %v1314_v53 }
 0x326   : >>> { %v2468_v48 = vld [vmem:[%s3293_s28 - $0x1] sm:$0xfe]  ;;  %v2471_v52 = vld [vmem:[%s3293_s28 + $0xf] ss:$0 sm:$0xff]  ;;  %v2473_v54 = vld [vmem:[%s3293_s28 + $0xf] sm:$0xfe]  ;;  %v1409_v57 = vsel %vm1333_vm13, %v2469_v49, %v2470_v51 }
 0x327   : >>> { %v1398_v50 = vsel %vm1333_vm13, %v1391_v47, %v2468_v48  ;;  %v1420_v58 = vsel %vm1333_vm13, %v2471_v52, %v2473_v54  ;;  %v2474_v59 = vld [vmem:[%s3293_s28 + $0x17] ss:$0 sm:$0xff]  ;;  %v2465_v63 = vld [vmem:[%s3291_s15 + $0x8] ss:$0 sm:$0xff]  ;;  %2472 = vst [vmem:[%s3293_s28 + $0x8] sm:$0xff] %v1409_v57  ;;  %vm401_vm13 = vcmp.eq.s32.totalorder (%p546_p9), %v389_v24, %v386_v27  ;;  %v457_v24 = vmov (%p546_p9), %v2776_v24 }
 0x328   : >>> { %1401 = vst [vmem:[%s3293_s28] sm:$0xff] %v1398_v50  ;;  %v2461_v0 = vld [vmem:[%s3291_s15 + $0x11] sm:$0x7f]  ;;  %v2467_v2 = vld [vmem:[%s3291_s15 + $0x1] sm:$0x7f]  ;;  %v486_v24 = vmov (%p546_p9), %v2776_v24 }
 0x329   : >>> { %2475 = vst [vmem:[%s3293_s28 + $0x10] sm:$0xff] %v1420_v58  ;;  %v1386_v3 = vsel %vm1368_vm14, %v2465_v63, %v2467_v2  ;;  %v1369_v5 = vsel %vm1368_vm14, %v2458_v34, %v2461_v0 }
 0x32a   : >>> { %2466 = vst [vmem:[%s3291_s15 + $0x8] sm:$0xff] %v1378_v1 }
 0x32b   : >>> { %1388 = vst [vmem:[%s3291_s15] sm:$0xff] %v1386_v3 }
 0x32c   : >>> { %2451 = vst [vmem:[%s3204_s18 + $0x10] sm:$0xff] %v1318_v4  ;;  %s3346_s18 = smov (%p546_p9), [#allocation14] }
 0x32d   : >>> { %2460 = vst [vmem:[%s3245_s30 + $0x1] sm:$0x1] %v1360_v55 }
 0x32e   : >>> { %2463 = vst [vmem:[%s3291_s15 + $0x10] sm:$0xff] %v1369_v5 }
 0x333   : >>> { %v1424_v6 = vld [vmem:[%s1390_s0] ss:$0 sm:$0xff]  ;;  %v2477_v7 = vld [vmem:[%s1390_s0 + $0x11] sm:$0x7f]  ;;  %v2478_v8 = vld [vmem:[%s1390_s0 + $0x10] ss:$0 sm:$0xff] }
 0x334   : >>> { %2476 = vst [vmem:[%s3293_s28 + $0x1] sm:$0x1] %v1424_v6  ;;  %v1433_v9 = vsel %vm1368_vm14, %v2474_v59, %v2477_v7  ;;  %v2480_v10 = vld [vmem:[%s1390_s0 + $0x9] sm:$0x7f]  ;;  %v2481_v11 = vld [vmem:[%s1390_s0 + $0x8] ss:$0 sm:$0xff] }
 0x335   : >>> { %2479 = vst [vmem:[%s1390_s0 + $0x10] sm:$0xff] %v1433_v9  ;;  %v1442_v56 = vsel %vm1368_vm14, %v2478_v8, %v2480_v10  ;;  %v2483_v12 = vld [vmem:[%s1390_s0 + $0x1] sm:$0x7f]  ;;  %v2536_v60 = vld [vmem:[%s390_s2 + $0x8] sm:$0xff] (%p546_p9)  ;;  %v2537_v61 = vld [vmem:[%s390_s2 + $0x10] sm:$0xff] (%p546_p9)  ;;  %v507_v6 = vadd.s32 (%p546_p9), 8, %v486_v24 }
 0x336   : >>> { %2482 = vst [vmem:[%s1390_s0 + $0x8] sm:$0xff] %v1442_v56  ;;  %v1450_v13 = vsel %vm1368_vm14, %v2481_v11, %v2483_v12  ;;  %v396_v14 = vld [vmem:[%s390_s2] sm:$0xff] (%p546_p9)  ;;  %v405_v16 = vsel (%p546_p9), %vm2151_vm6, %v2536_v60, 0.0  ;;  %v415_v17 = vsel (%p546_p9), %vm2151_vm6, %v2537_v61, 0.0  ;;  %v2540_v36 = vld [vmem:[%s3346_s18 + $0x8] sm:$0xff] (%p546_p9)  ;;  %vm409_vm14 = vcmp.eq.s32.totalorder (%p546_p9), %v408_v29, %v386_v27  ;;  %v2541_v40 = vld [vmem:[%s3346_s18 + $0x10] sm:$0xff] (%p546_p9) }
 0x337   : >>> { %1452 = vst [vmem:[%s1390_s0] sm:$0xff] %v1450_v13  ;;  %v397_v15 = vsel (%p546_p9), %vm2151_vm6, %v396_v14, 0.0  ;;  %v406_v21 = vmul.f32 (%p546_p9), %v405_v16, %v405_v16  ;;  %v416_v22 = vmul.f32 (%p546_p9), %v415_v17, %v415_v17  ;;  %v464_v28 = vld [vmem:[%s3346_s18] sm:$0xff] (%p546_p9)  ;;  %v471_v44 = vsel (%p546_p9), %vm2151_vm6, %v2540_v36, 0.0 }
 0x338   : >> { %548 = sbr.rel (!%p546_p9) target bundleno = 282 (0x11a), region = 512  ;;  %v398_v20 = vmul.f32 (%p546_p9), %v397_v15, %v397_v15  ;;  %v465_v35 = vsel (%p546_p9), %vm2151_vm6, %v464_v28, 0.0  ;;  %v454_v27 = vmov (%p546_p9), %v2778_v27  ;;  %v477_v48 = vsel (%p546_p9), %vm2151_vm6, %v2541_v40, 0.0 }
 0x339   : >> { %v410_v41 = vsel (%p546_p9), %vm409_vm14, 0.0, %v406_v21  ;;  %v466_v43 = vmul.f32 (%p546_p9), %v465_v35, %v465_v35  ;;  %v420_v49 = vsel (%p546_p9), %vm419_vm1, 0.0, %v416_v22  ;;  %v472_v51 = vmul.f32 (%p546_p9), %v471_v44, %v471_v44 }
 0x33a   : >> { %v412_v30 = vadd.f32 (%p546_p9), %v406_v21, %v398_v20  ;;  %v402_v37 = vsel (%p546_p9), %vm401_vm13, 0.0, %v398_v20  ;;  %v478_v57 = vmul.f32 (%p546_p9), %v477_v48, %v477_v48  ;;  %v483_v27 = vmov (%p546_p9), %v2778_v27 }
 0x33b   : >> { %v435_v18 = vld [vmem:[%s429_s3] sm:$0xff] (%p546_p9)  ;;  %v2538_v19 = vld [vmem:[%s429_s3 + $0x8] sm:$0xff] (%p546_p9)  ;;  %v2539_v25 = vld [vmem:[%s429_s3 + $0x10] sm:$0xff] (%p546_p9)  ;;  %v411_v45 = vadd.f32 (%p546_p9), %v410_v41, %v402_v37  ;;  %vm498_vm2 = vcmp.eq.s32.totalorder (%p546_p9), %v486_v24, %v483_v27  ;;  %v517_v10 = vadd.s32 (%p546_p9), 16, %v486_v24  ;;  %vm508_vm3 = vcmp.eq.s32.totalorder (%p546_p9), %v507_v6, %v483_v27 }
 0x33c   : >> { %v436_v23 = vsel (%p546_p9), %vm2151_vm6, %v435_v18, 0.0  ;;  %v442_v26 = vsel (%p546_p9), %vm2151_vm6, %v2538_v19, 0.0  ;;  %v448_v32 = vsel (%p546_p9), %vm2151_vm6, %v2539_v25, 0.0  ;;  %v422_v33 = vadd.f32 (%p546_p9), %v416_v22, %v412_v30 }
 0x33d   : >> { %v437_v31 = vmul.f32 %v436_v23, %v436_v23  ;;  %v443_v34 = vmul.f32 %v442_v26, %v442_v26  ;;  %v449_v39 = vmul.f32 %v448_v32, %v448_v32  ;;  %v421_v54 = vadd.f32 %v420_v49, %v411_v45 }
 0x33e   : >> { %v493_v47 = vld [vmem:[%s487_s23] sm:$0xff]  ;;  %v2542_v52 = vld [vmem:[%s487_s23 + $0x8] sm:$0xff]  ;;  %v2543_v58 = vld [vmem:[%s487_s23 + $0x10] sm:$0xff]  ;;  %vm518_vm4 = vcmp.eq.s32.totalorder %v517_v10, %v483_v27 }
 0x33f   : >> { %v439_v38 = vadd.f32 %v437_v31, %v422_v33  ;;  %v494_v55 = vsel %vm2151_vm6, %v493_v47, 0.0  ;;  %v438_v59 = vadd.f32 %v437_v31, %v421_v54  ;;  %v504_v62 = vsel %vm2151_vm6, %v2542_v52, 0.0 }
 0x340   : >> { %v495_v0 = vmul.f32 %v494_v55, %v494_v55  ;;  %v514_v2 = vsel %vm2151_vm6, %v2543_v58, 0.0  ;;  %v505_v4 = vmul.f32 %v504_v62, %v504_v62 }
 0x341   : >> { %v445_v46 = vadd.f32 %v443_v34, %v439_v38  ;;  %v444_v1 = vadd.f32 %v443_v34, %v438_v59  ;;  %v515_v8 = vmul.f32 %v514_v2, %v514_v2 }
 0x342   : >> { %v499_v12 = vsel %vm498_vm2, 0.0, %v495_v0  ;;  %v509_v60 = vsel %vm508_vm3, 0.0, %v505_v4 }
 0x343   : >> { %v451_v50 = vadd.f32 %v449_v39, %v445_v46  ;;  %v450_v5 = vadd.f32 %v449_v39, %v444_v1  ;;  %v519_v15 = vsel %vm518_vm4, 0.0, %v515_v8 }
 0x345   : >> { %v468_v53 = vadd.f32 %v466_v43, %v451_v50  ;;  %v467_v9 = vadd.f32 %v466_v43, %v450_v5 }
 0x347   : >> { %v474_v63 = vadd.f32 %v472_v51, %v468_v53  ;;  %v473_v56 = vadd.f32 %v472_v51, %v467_v9 }
 0x349   : >> { %v480_v3 = vadd.f32 %v478_v57, %v474_v63  ;;  %v479_v14 = vadd.f32 %v478_v57, %v473_v56 }
 0x34b   : >> { %v501_v7 = vadd.f32 %v495_v0, %v480_v3  ;;  %v500_v61 = vadd.f32 %v499_v12, %v479_v14 }
 0x34d   : >> { %v511_v11 = vadd.f32 %v505_v4, %v501_v7  ;;  %v510_v16 = vadd.f32 %v509_v60, %v500_v61 }
 0x34f   : >> { %v521_v13 = vadd.f32 %v515_v8, %v511_v11  ;;  %v520_v17 = vadd.f32 %v519_v15, %v510_v16 }
 0x351   : >> { %522 = vadd.xlane.f32.xlu0 %v521_v13 }
 0x359   : >> { %530 = vadd.xlane.f32.xlu0 %v520_v17 }
 0x3c4   : >> { %v523_v18 = vpop.xlane.xlu0 %522 }
 0x3c5   : >> { %v524_v19 = vrot.slane %v523_v18, 4 }
 0x3c7   : >> { %v525_v20 = vadd.f32 %v524_v19, %v523_v18 }
 0x3c9   : >> { %v526_v21 = vrot.slane %v525_v20, 2 }
 0x3cb   : >> { %v527_v26 = vadd.f32 %v526_v21, %v525_v20 }
 0x3cc   : >> { %v531_v22 = vpop.xlane.xlu0 %530 }
 0x3cd   : >> { %v532_v23 = vrot.slane %v531_v22, 4  ;;  %v528_v30 = vrot.slane %v527_v26, 1 }
 0x3cf   : >> { %v533_v25 = vadd.f32 %v532_v23, %v531_v22  ;;  %v529_v33 = vadd.f32 %v528_v30, %v527_v26 }
 0x3d1   : >> { %v534_v28 = vrot.slane %v533_v25, 2 }
 0x3d3   : >> { %v535_v29 = vadd.f32 %v534_v28, %v533_v25 }
 0x3d5   : >> { %v536_v31 = vrot.slane %v535_v29, 1 }
 0x3d7   : >> { %v537_v32 = vadd.f32 %v536_v31, %v535_v29 }
 0x3d9   : >> { %2561 = vpush %v537_v32 }
 0x3da   : >> { %2563 = vpush %v529_v33 }
 0x40a   : >> { %s2562_s29 = spop %2561 }
 0x40b   : >> { %s2564_s27 = spop %2563 }
 0x40c   : >> { %s540_s17 = smul.f32 1e-10, %s2564_s27 }
 0x40e   : >> { %p541_p11 = scmp.le.f32.partialorder %s2562_s29, %s540_s17 }
 0x410   : >> { %p543_p12 = por %p542_p10, %p541_p11 }
 0x412   : > { %1679 = sbr.rel (!%p543_p12) target bundleno = 281 (0x119), region = 523 }
 0x417 PF: > { %s1684_s16 = smov [#allocation12]  ;;  %v1688_v27 = vmov %v2778_v27  ;;  %v1691_v24 = vmov %v2776_v24  ;;  %s1716_s20 = smov [#allocation15] }
 0x418   : > { %v1720_v27 = vmov %v2778_v27  ;;  %v1723_v24 = vmov %v2776_v24  ;;  %v1692_v34 = vld [vmem:[%s1684_s16] sm:$0xff]  ;;  %vm1695_vm5 = vcmp.eq.s32.totalorder %v1691_v24, %v1688_v27  ;;  %v2544_v35 = vld [vmem:[%s1684_s16 + $0x8] sm:$0xff]  ;;  %v1700_v36 = vadd.s32 8, %v1691_v24  ;;  %v2545_v38 = vld [vmem:[%s1684_s16 + $0x10] sm:$0xff]  ;;  %s1680_s21 = sand.u32 7, %s2726_s12   ;;  %s3470_s15 = scalar_lea.vmem [#allocation5], %s2765_s22 }
 0x419   : > { %vm1727_vm7 = vcmp.eq.s32.totalorder %v1723_v24, %v1720_v27  ;;  %v1696_v37 = vsel %vm1695_vm5, %v1692_v34, 0.0  ;;  %v1706_v39 = vadd.s32 16, %v1691_v24  ;;  %v1732_v40 = vadd.s32 8, %v1723_v24  ;;  %v1724_v42 = vld [vmem:[%s1716_s20] sm:$0xff]  ;;  %v2546_v43 = vld [vmem:[%s1716_s20 + $0x8] sm:$0xff]  ;;  %v2547_v44 = vld [vmem:[%s1716_s20 + $0x10] sm:$0xff] }
 0x41a   : > { %v1738_v41 = vadd.s32 16, %v1723_v24  ;;  %vm1701_vm6 = vcmp.eq.s32.totalorder %v1700_v36, %v1688_v27  ;;  %v1728_v46 = vsel %vm1727_vm7, %v1724_v42, 0.0  ;;  %s1681_s11 = scalar_lea.vmem [#allocation4], %s1680_s21  ;;  %s1683_s30 = scalar_lea.vmem [#allocation6], %s1680_s21 }
 0x41b   : > { %v1702_v45 = vsel %vm1701_vm6, %v2544_v35, %v1696_v37  ;;  %vm1707_vm8 = vcmp.eq.s32.totalorder %v1706_v39, %v1688_v27  ;;  %vm1733_vm9 = vcmp.eq.s32.totalorder %v1732_v40, %v1720_v27  ;;  %s1685_s11 = smov %s1681_s11  ;;  %s1717_s30 = smov %s1683_s30 }
 0x41c   : > { %v1708_v47 = vsel %vm1707_vm8, %v2545_v38, %v1702_v45  ;;  %v1734_v48 = vsel %vm1733_vm9, %v2546_v43, %v1728_v46  ;;  %vm1739_vm10 = vcmp.eq.s32.totalorder %v1738_v41, %v1720_v27  ;;  %s3471_s28 = scalar_lea.vmem [#allocation7], %s2765_s22  ;;  %s1787_s0 = sshrl.u32 (%p2740_p3), %s2726_s12, 3 }
 0x41d   : > { %v1709_v49 = vrot.slane %v1708_v47, 4  ;;  %v1740_v50 = vsel %vm1739_vm10, %v2547_v44, %v1734_v48  ;;  %s3472_s1 = scalar_lea.vmem (%p2740_p3), [#allocation5], %s2765_s22  ;;  %s2550_s2 = sshll.u32 (%p2740_p3), %s1787_s0, 1 }
 0x41e   : > { %v1741_v51 = vrot.slane %v1740_v50, 4  ;;  %s1789_s23 = scalar_lea.vmem (%p2740_p3), %s3453_s4, %s2550_s2 }
 0x41f   : > { %v1710_v52 = vadd.f32 %v1709_v49, %v1708_v47 }
 0x420   : > { %v1742_v54 = vadd.f32 %v1741_v51, %v1740_v50 }
 0x421   : > { %v1711_v24 = vrot.slane %v1710_v52, 2 }
 0x422   : > { %v1743_v55 = vrot.slane %v1742_v54, 2 }
 0x423   : > { %v1712_v53 = vadd.f32 %v1711_v24, %v1710_v52 }
 0x424   : > { %v1744_v57 = vadd.f32 %v1743_v55, %v1742_v54 }
 0x425   : > { %v1713_v58 = vrot.slane %v1712_v53, 1 }
 0x426   : > { %v1745_v59 = vrot.slane %v1744_v57, 1 }
 0x427   : > { %v1714_v62 = vadd.f32 %v1713_v58, %v1712_v53 }
 0x428   : > { %v1746_v27 = vadd.f32 %v1745_v59, %v1744_v57 }
 0x429   : > { %1715 = vst [vmem:[%s1685_s11] sm:$0x1] %v1714_v62 }
 0x42a   : > { %1747 = vst [vmem:[%s1717_s30] sm:$0x1] %v1746_v27 }
 0x42e   : > { %1786 = sbr.rel (!%p2740_p3) target bundleno = 1082 (0x43a), region = 114 }
 0x430   : > { %v1750_v63 = vld [vmem:[#allocation4] sm:$0x3] }
 0x431   : > { %1753 = vst [vmem:[%s3470_s15] sm:$0x3] %v1750_v63  ;;  %v1756_v0 = vld [vmem:[#allocation6] sm:$0x3] }
 0x432   : > { %1759 = vst [vmem:[%s3471_s28] sm:$0x3] %v1756_v0 }
 0x438   : > { %v1806_v1 = vld [vmem:[%s3472_s1] sm:$0x3] }
 0x439   : > { %1807 = vst [vmem:[%s1789_s23] sm:$0x3] %v1806_v1 }
 0x43a PF: > { %1825 = sbr.rel (!%p2740_p3) target bundleno = 1090 (0x442), region = 148  ;;  %s1826_s29 = sshrl.u32 (%p2740_p3), %s2726_s12, 3 }
 0x43b   : > { %s3473_s27 = scalar_lea.vmem (%p2740_p3), [#allocation7], %s2765_s22  ;;  %s2551_s17 = sshll.u32 (%p2740_p3), %s1826_s29, 1 }
 0x43c   : > { %s1828_s21 = scalar_lea.vmem (%p2740_p3), %s3454_s5, %s2551_s17 }
 0x440   : > { %v1845_v2 = vld [vmem:[%s3473_s27] sm:$0x3] }
 0x441   : > { %1846 = vst [vmem:[%s1828_s21] sm:$0x3] %v1845_v2 }
 0x442 PF: > { %s2565_s19 = smul.u32 24, %s2726_s12  ;;  %v1876_v3 = vld [vmem:[%s2769_s14] sm:$0xff]  ;;  %v1878_v4 = vld [vmem:[%s2769_s14 + $0x8] sm:$0xff]  ;;  %v1880_v5 = vld [vmem:[%s2769_s14 + $0x10] sm:$0xff] }
 0x443   : > { %v1899_v6 = vld [vmem:[%s2783_s24] sm:$0xff]  ;;  %v1901_v7 = vld [vmem:[%s2783_s24 + $0x8] sm:$0xff]  ;;  %v1903_v8 = vld [vmem:[%s2783_s24 + $0x10] sm:$0xff] }
 0x444   : > { %s1863_s30 = scalar_lea.vmem %s3455_s6, %s2565_s19  ;;  %s1886_s0 = scalar_lea.vmem %s3456_s7, %s2565_s19  ;;  %v1922_v9 = vld [vmem:[%s2790_s25] sm:$0xff]  ;;  %v1924_v10 = vld [vmem:[%s2790_s25 + $0x8] sm:$0xff]  ;;  %v1926_v11 = vld [vmem:[%s2790_s25 + $0x10] sm:$0xff] }
 0x445   : > { %1877 = vst [vmem:[%s1863_s30] sm:$0xff] %v1876_v3  ;;  %s1909_s2 = scalar_lea.vmem %s3457_s8, %s2565_s19  ;;  %s1932_s18 = scalar_lea.vmem %s3458_s9, %s2565_s19  ;;  %v1945_v56 = vld [vmem:[%s2797_s26] sm:$0xff]  ;;  %v1947_v12 = vld [vmem:[%s2797_s26 + $0x8] sm:$0xff]  ;;  %v1949_v13 = vld [vmem:[%s2797_s26 + $0x10] sm:$0xff] }
 0x446   : > { %1879 = vst [vmem:[%s1863_s30 + $0x8] sm:$0xff] %v1878_v4 }
 0x447   : > { %1881 = vst [vmem:[%s1863_s30 + $0x10] sm:$0xff] %v1880_v5 }
 0x448   : > { %1900 = vst [vmem:[%s1886_s0] sm:$0xff] %v1899_v6 }
 0x449   : > { %1902 = vst [vmem:[%s1886_s0 + $0x8] sm:$0xff] %v1901_v7 }
 0x44a   : > { %1904 = vst [vmem:[%s1886_s0 + $0x10] sm:$0xff] %v1903_v8 }
 0x44b   : > { %1923 = vst [vmem:[%s1909_s2] sm:$0xff] %v1922_v9 }
 0x44c   : > { %1925 = vst [vmem:[%s1909_s2 + $0x8] sm:$0xff] %v1924_v10 }
 0x44d   : > { %1927 = vst [vmem:[%s1909_s2 + $0x10] sm:$0xff] %v1926_v11 }
 0x44e   : > { %1946 = vst [vmem:[%s1932_s18] sm:$0xff] %v1945_v56 }
 0x44f   : > { %1948 = vst [vmem:[%s1932_s18 + $0x8] sm:$0xff] %v1947_v12 }
 0x450   : > { %1950 = vst [vmem:[%s1932_s18 + $0x10] sm:$0xff] %v1949_v13 }
 0x451 PF: > { %s3474_s24 = sld [smem:[#allocation25_spill]]  ;;  %p13_p13 = scmp.ge.s32.totalorder %s2729_s13, 4  }
 0x452   : > { %s3475_s30 = smov %s2643_s10  ;;  %s3477_s11 = smov %s2729_s13 }
 0x453   :  { %15 = sbr.rel (!%p13_p13) target bundleno = 7 (0x7), region = 534 }
 0x457   : > { %s3476_s10 = smov %s3474_s24 }

// kernel: spdnet_forward.4
= control target key start
LH: loop header
LB: loop body
LE: loop exit
PB: predicated region body
PF: predicated region fallthrough
CT: control target
= control target key end

     0   :  { %vm38_vm0 = vcmask 785408   ;;  %vm128_vm1 = vcmask 392192   ;;  %s439_s28 = smov 48   ;;  %vm290_vm2 = vcmask 785792   ;;  %s664_s1 = inlined_call_operand.vmem [shape: f32[96,48], index: 1, kind: input, shape index: {}]   ;;  %s665_s0 = inlined_call_operand.vmem [shape: f32[192,96], index: 0, kind: input, shape index: {}]   ;;  %s666_s2 = inlined_call_operand.vmem [shape: f32[48,96], index: 2, kind: input, shape index: {}]   ;;  %s667_s3 = inlined_call_operand.vmem [shape: f32[48,96], index: 3, kind: output, shape index: {}]  }
   0x1   :  { %v25_v0 = vld [vmem:[%s664_s1 + $0x58] sm:$0xff]  ;;  %v24_v1 = vld [vmem:[%s664_s1 + $0x50] sm:$0xff]  ;;  %v23_v2 = vld [vmem:[%s664_s1 + $0x48] sm:$0xff] }
   0x2   :  { %414 = vmatpush.msra.mxu3 %v25_v0  ;;  %193 = vmatpush.msra.mxu1 %v25_v0  ;;  %v22_v3 = vld [vmem:[%s664_s1 + $0x40] sm:$0xff]  ;;  %v21_v4 = vld [vmem:[%s664_s1 + $0x38] sm:$0xff]  ;;  %v20_v5 = vld [vmem:[%s664_s1 + $0x30] sm:$0xff] }
   0x3   :  { %79 = vmatpush.msra.mxu0 %v25_v0  ;;  %v19_v6 = vld [vmem:[%s664_s1 + $0x28] sm:$0xff]  ;;  %v18_v7 = vld [vmem:[%s664_s1 + $0x20] sm:$0xff]  ;;  %v17_v8 = vld [vmem:[%s664_s1 + $0x18] sm:$0xff] }
   0x4   :  { %415 = vmatpush.msra.mxu3 %v24_v1  ;;  %194 = vmatpush.msra.mxu1 %v24_v1  ;;  %v16_v9 = vld [vmem:[%s664_s1 + $0x10] sm:$0xff]  ;;  %v15_v10 = vld [vmem:[%s664_s1 + $0x8] sm:$0xff]  ;;  %v14_v11 = vld [vmem:[%s664_s1] sm:$0xff] }
   0x5   :  { %80 = vmatpush.msra.mxu0 %v24_v1  ;;  %v34_v12 = vld [vmem:[%s665_s0 + $0x40] sm:$0xff]  ;;  %v35_v14 = vld [vmem:[%s665_s0 + $0x48] sm:$0xff]  ;;  %v36_v16 = vld [vmem:[%s665_s0 + $0x50] sm:$0xff] }
   0x6   :  { %416 = vmatpush.msra.mxu3 %v23_v2  ;;  %195 = vmatpush.msra.mxu1 %v23_v2  ;;  %v141_v13 = vld [vmem:[%s665_s0 + $0x60] sm:$0xff]  ;;  %v142_v15 = vld [vmem:[%s665_s0 + $0x68] sm:$0xff]  ;;  %v143_v17 = vld [vmem:[%s665_s0 + $0x70] sm:$0xff] }
   0x7   :  { %81 = vmatpush.msra.mxu0 %v23_v2  ;;  %v37_v18 = vld [vmem:[%s665_s0 + $0x58] sm:$0xff]  ;;  %v26_v20 = vld [vmem:[%s665_s0] sm:$0xff]  ;;  %v146_v23 = vld [vmem:[%s665_s0 + $0x88] sm:$0xff] }
   0x8   :  { %417 = vmatpush.msra.mxu3 %v22_v3  ;;  %196 = vmatpush.msra.mxu1 %v22_v3  ;;  %v144_v19 = vld [vmem:[%s665_s0 + $0x78] sm:$0xff]  ;;  %v145_v21 = vld [vmem:[%s665_s0 + $0x80] sm:$0xff]  ;;  %v150_v24 = vld [vmem:[%s665_s0 + $0xa8] sm:$0xff] }
   0x9   :  { %82 = vmatpush.msra.mxu0 %v22_v3  ;;  %v149_v22 = vld [vmem:[%s665_s0 + $0xa0] sm:$0xff]  ;;  %v147_v25 = vld [vmem:[%s665_s0 + $0x90] sm:$0xff]  ;;  %v148_v27 = vld [vmem:[%s665_s0 + $0x98] sm:$0xff] }
   0xa   :  { %418 = vmatpush.msra.mxu3 %v21_v4  ;;  %197 = vmatpush.msra.mxu1 %v21_v4  ;;  %v151_v26 = vld [vmem:[%s665_s0 + $0xb0] sm:$0xff]  ;;  %v152_v28 = vld [vmem:[%s665_s0 + $0xb8] sm:$0xff]  ;;  %v27_v29 = vld [vmem:[%s665_s0 + $0x8] sm:$0xff] }
   0xb   :  { %83 = vmatpush.msra.mxu0 %v21_v4  ;;  %v28_v30 = vld [vmem:[%s665_s0 + $0x10] sm:$0xff]  ;;  %v29_v31 = vld [vmem:[%s665_s0 + $0x18] sm:$0xff]  ;;  %v30_v32 = vld [vmem:[%s665_s0 + $0x20] sm:$0xff] }
   0xc   :  { %419 = vmatpush.msra.mxu3 %v20_v5  ;;  %198 = vmatpush.msra.mxu1 %v20_v5  ;;  %v31_v35 = vld [vmem:[%s665_s0 + $0x28] sm:$0xff]  ;;  %v32_v38 = vld [vmem:[%s665_s0 + $0x30] sm:$0xff]  ;;  %v33_v41 = vld [vmem:[%s665_s0 + $0x38] sm:$0xff] }
   0xd   :  { %84 = vmatpush.msra.mxu0 %v20_v5 }
   0xe   :  { %420 = vmatpush.msra.mxu3 %v19_v6  ;;  %199 = vmatpush.msra.mxu1 %v19_v6 }
   0xf   :  { %85 = vmatpush.msra.mxu0 %v19_v6 }
  0x10   :  { %421 = vmatpush.msra.mxu3 %v18_v7  ;;  %200 = vmatpush.msra.mxu1 %v18_v7 }
  0x11   :  { %86 = vmatpush.msra.mxu0 %v18_v7 }
  0x12   :  { %422 = vmatpush.msra.mxu3 %v17_v8  ;;  %201 = vmatpush.msra.mxu1 %v17_v8 }
  0x13   :  { %87 = vmatpush.msra.mxu0 %v17_v8 }
  0x14   :  { %423 = vmatpush.msra.mxu3 %v16_v9  ;;  %202 = vmatpush.msra.mxu1 %v16_v9 }
  0x15   :  { %88 = vmatpush.msra.mxu0 %v16_v9 }
  0x16   :  { %424 = vmatpush.msra.mxu3 %v15_v10  ;;  %203 = vmatpush.msra.mxu1 %v15_v10 }
  0x17   :  { %89 = vmatpush.msra.mxu0 %v15_v10 }
  0x18   :  { %425 = vmatpush.msra.mxu3 %v14_v11  ;;  %204 = vmatpush.msra.mxu1 %v14_v11 }
  0x19   :  { %392 = vmatmul.msk.f32.vlgmr.msra.gmra.mxu3 %vm38_vm0, %v34_v12  ;;  %396 = vmatmul.msk.f32.vlgmr.msra.gmra.mxu1 %vm38_vm0, %v141_v13 }
  0x1a   :  { %426 = vmatpush.msrb.mxu3 %v25_v0  ;;  %90 = vmatpush.msra.mxu0 %v14_v11 }
  0x1b   :  { %384 = vmatmul.msk.f32.vlgmr.msra.gmra.mxu0 %vm38_vm0, %v26_v20 }
  0x1c   :  { %427 = vmatpush.msrb.mxu3 %v24_v1 }
  0x1e   :  { %428 = vmatpush.msrb.mxu3 %v23_v2 }
  0x20   :  { %429 = vmatpush.msrb.mxu3 %v22_v3 }
  0x21   :  { %393 = vmatmul.msk.f32.gmra.mxu3 %vm38_vm0, %v35_v14  ;;  %397 = vmatmul.msk.f32.gmra.mxu1 %vm38_vm0, %v142_v15 }
  0x22   :  { %430 = vmatpush.msrb.mxu3 %v21_v4 }
  0x23   :  { %385 = vmatmul.msk.f32.gmra.mxu0 %vm38_vm0, %v27_v29 }
  0x24   :  { %431 = vmatpush.msrb.mxu3 %v20_v5 }
  0x26   :  { %432 = vmatpush.msrb.mxu3 %v19_v6 }
  0x28   :  { %433 = vmatpush.msrb.mxu3 %v18_v7 }
  0x29   :  { %394 = vmatmul.msk.f32.gmra.mxu3 %vm38_vm0, %v36_v16  ;;  %398 = vmatmul.msk.f32.gmra.mxu1 %vm38_vm0, %v143_v17 }
  0x2a   :  { %434 = vmatpush.msrb.mxu3 %v17_v8 }
  0x2b   :  { %386 = vmatmul.msk.f32.gmra.mxu0 %vm38_vm0, %v28_v30 }
  0x2c   :  { %435 = vmatpush.msrb.mxu3 %v16_v9 }
  0x2e   :  { %436 = vmatpush.msrb.mxu3 %v15_v10 }
  0x30   :  { %437 = vmatpush.msrb.mxu3 %v14_v11 }
  0x31   :  { %395 = vmatmul.msk.f32.gmra.mxu3 %vm38_vm0, %v37_v18  ;;  %399 = vmatmul.msk.f32.gmra.mxu1 %vm38_vm0, %v144_v19  ;;  %v303_v19 = vld [vmem:[%s666_s2] sm:$0xff] }
  0x33   :  { %387 = vmatmul.msk.f32.gmra.mxu0 %vm38_vm0, %v29_v31 }
  0x39   :  { %400 = vmatmul.msk.f32.gmra.mxu1 %vm38_vm0, %v145_v21  ;;  %404 = vmatmul.msk.f32.vlgmr.msrb.gmra.mxu3 %vm38_vm0, %v149_v22  ;;  %v304_v21 = vld [vmem:[%s666_s2 + $0x8] sm:$0xff]  ;;  %v305_v22 = vld [vmem:[%s666_s2 + $0x10] sm:$0xff] }
  0x3b   :  { %388 = vmatmul.msk.f32.gmra.mxu0 %vm38_vm0, %v30_v32 }
  0x41   :  { %401 = vmatmul.msk.f32.gmra.mxu1 %vm38_vm0, %v146_v23  ;;  %405 = vmatmul.msk.f32.gmra.mxu3 %vm38_vm0, %v150_v24  ;;  %v306_v23 = vld [vmem:[%s666_s2 + $0x18] sm:$0xff]  ;;  %v307_v24 = vld [vmem:[%s666_s2 + $0x20] sm:$0xff] }
  0x43   :  { %389 = vmatmul.msk.f32.gmra.mxu0 %vm38_vm0, %v31_v35 }
  0x49   :  { %402 = vmatmul.msk.f32.gmra.mxu1 %vm38_vm0, %v147_v25  ;;  %406 = vmatmul.msk.f32.gmra.mxu3 %vm38_vm0, %v151_v26  ;;  %v308_v25 = vld [vmem:[%s666_s2 + $0x28] sm:$0xff] }
  0x4b   :  { %390 = vmatmul.msk.f32.gmra.mxu0 %vm38_vm0, %v32_v38 }
  0x51   :  { %403 = vmatmul.msk.f32.gmra.mxu1 %vm38_vm0, %v148_v27  ;;  %407 = vmatmul.msk.f32.gmra.mxu3 %vm38_vm0, %v152_v28 }
  0x53   :  { %391 = vmatmul.msk.f32.gmra.mxu0 %vm38_vm0, %v33_v41 }
  0x96   :  { %v206_v33 = vpop.f32.mrf.mxu1 }
  0x98   :  { %v92_v50 = vpop.f32.mrf.mxu0 }
  0x99   :  { %129 = vst.msk [vmem:[#allocation2] sm:$0xff] %vm128_vm1, %v92_v50 }
  0x9c   :  { %v116_v34 = vpop.f32.mrf.mxu3 }
  0x9d   :  { %137 = vst.msk [vmem:[#allocation2 + $0x40] sm:$0xff] %vm128_vm1, %v116_v34 }
  0x9e   :  { %v209_v36 = vpop.f32.mrf.mxu1 }
  0xa0   :  { %v95_v53 = vpop.f32.mrf.mxu0 }
  0xa1   :  { %130 = vst.msk [vmem:[#allocation2 + $0x8] sm:$0xff] %vm128_vm1, %v95_v53 }
  0xa4   :  { %v119_v37 = vpop.f32.mrf.mxu3 }
  0xa5   :  { %138 = vst.msk [vmem:[#allocation2 + $0x48] sm:$0xff] %vm128_vm1, %v119_v37 }
  0xa6   :  { %v212_v39 = vpop.f32.mrf.mxu1 }
  0xa8   :  { %v98_v54 = vpop.f32.mrf.mxu0 }
  0xa9   :  { %131 = vst.msk [vmem:[#allocation2 + $0x10] sm:$0xff] %vm128_vm1, %v98_v54 }
  0xac   :  { %v122_v40 = vpop.f32.mrf.mxu3 }
  0xad   :  { %139 = vst.msk [vmem:[#allocation2 + $0x50] sm:$0xff] %vm128_vm1, %v122_v40 }
  0xae   :  { %v215_v42 = vpop.f32.mrf.mxu1 }
  0xb0   :  { %v101_v55 = vpop.f32.mrf.mxu0 }
  0xb1   :  { %132 = vst.msk [vmem:[#allocation2 + $0x18] sm:$0xff] %vm128_vm1, %v101_v55 }
  0xb4   :  { %v125_v43 = vpop.f32.mrf.mxu3 }
  0xb5   :  { %140 = vst.msk [vmem:[#allocation2 + $0x58] sm:$0xff] %vm128_vm1, %v125_v43 }
  0xb6   :  { %v218_v44 = vpop.f32.mrf.mxu1 }
  0xb8   :  { %v104_v56 = vpop.f32.mrf.mxu0 }
  0xb9   :  { %133 = vst.msk [vmem:[#allocation2 + $0x20] sm:$0xff] %vm128_vm1, %v104_v56 }
  0xbc   :  { %v230_v45 = vpop.f32.mrf.mxu3 }
  0xbe   :  { %v221_v46 = vpop.f32.mrf.mxu1 }
  0xc0   :  { %v107_v57 = vpop.f32.mrf.mxu0 }
  0xc1   :  { %134 = vst.msk [vmem:[#allocation2 + $0x28] sm:$0xff] %vm128_vm1, %v107_v57 }
  0xc4   :  { %v233_v47 = vpop.f32.mrf.mxu3 }
  0xc5   :  { %272 = vrot.lane.b32.xlu1 %v233_v47, %s439_s28 }
  0xc6   :  { %v224_v48 = vpop.f32.mrf.mxu1 }
  0xc8   :  { %v110_v58 = vpop.f32.mrf.mxu0 }
  0xc9   :  { %135 = vst.msk [vmem:[#allocation2 + $0x30] sm:$0xff] %vm128_vm1, %v110_v58 }
  0xcc   :  { %v236_v49 = vpop.f32.mrf.mxu3 }
  0xcd   :  { %270 = vrot.lane.b32.xlu1 %v230_v45, %s439_s28 }
  0xce   :  { %v227_v51 = vpop.f32.mrf.mxu1 }
  0xcf   :  { %268 = vrot.lane.b32.xlu2 %v227_v51, %s439_s28 }
  0xd0   :  { %v113_v60 = vpop.f32.mrf.mxu0 }
  0xd1   :  { %136 = vst.msk [vmem:[#allocation2 + $0x38] sm:$0xff] %vm128_vm1, %v113_v60 }
  0xd4   :  { %v239_v52 = vpop.f32.mrf.mxu3 }
  0xd5   :  { %262 = vrot.lane.b32.xlu1 %v218_v44, %s439_s28  ;;  %276 = vrot.lane.b32.xlu0 %v239_v52, %s439_s28 }
  0xd7   :  { %266 = vrot.lane.b32.xlu2 %v224_v48, %s439_s28 }
  0xdd   :  { %256 = vrot.lane.b32.xlu1 %v209_v36, %s439_s28  ;;  %274 = vrot.lane.b32.xlu0 %v236_v49, %s439_s28 }
  0xdf   :  { %260 = vrot.lane.b32.xlu2 %v215_v42, %s439_s28 }
  0xe5   :  { %264 = vrot.lane.b32.xlu0 %v221_v46, %s439_s28 }
  0xe7   :  { %254 = vrot.lane.b32.xlu2 %v206_v33, %s439_s28 }
  0xed   :  { %258 = vrot.lane.b32.xlu0 %v212_v39, %s439_s28 }
 0x129   :  { %v269_v59 = vpop.permute.xlu2 %268 }
 0x12a   :  { %298 = vst.msk [vmem:[#allocation2 + $0x38] sm:$0xff] %vm290_vm2, %v269_v59 }
 0x131   :  { %v267_v61 = vpop.permute.xlu2 %266  ;;  %v316_v11 = vld [vmem:[#allocation2 + $0x38] sm:$0xff] }
 0x132   :  { %297 = vst.msk [vmem:[#allocation2 + $0x30] sm:$0xff] %vm290_vm2, %v267_v61 }
 0x137   :  { %v273_v62 = vpop.permute.xlu1 %272 }
 0x138   :  { %300 = vst.msk [vmem:[#allocation2 + $0x48] sm:$0xff] %vm290_vm2, %v273_v62 }
 0x139   :  { %v261_v63 = vpop.permute.xlu2 %260  ;;  %v315_v13 = vld [vmem:[#allocation2 + $0x30] sm:$0xff] }
 0x13a   :  { %294 = vst.msk [vmem:[#allocation2 + $0x18] sm:$0xff] %vm290_vm2, %v261_v63 }
 0x13f   :  { %v271_v0 = vpop.permute.xlu1 %270  ;;  %v318_v9 = vld [vmem:[#allocation2 + $0x48] sm:$0xff] }
 0x140   :  { %299 = vst.msk [vmem:[#allocation2 + $0x40] sm:$0xff] %vm290_vm2, %v271_v0 }
 0x141   :  { %v255_v1 = vpop.permute.xlu2 %254  ;;  %v312_v16 = vld [vmem:[#allocation2 + $0x18] sm:$0xff] }
 0x142   :  { %291 = vst.msk [vmem:[#allocation2] sm:$0xff] %vm290_vm2, %v255_v1 }
 0x147   :  { %v263_v2 = vpop.permute.xlu1 %262  ;;  %v277_v3 = vpop.permute.xlu0 %276  ;;  %v317_v10 = vld [vmem:[#allocation2 + $0x40] sm:$0xff] }
 0x148   :  { %295 = vst.msk [vmem:[#allocation2 + $0x20] sm:$0xff] %vm290_vm2, %v263_v2 }
 0x149   :  { %302 = vst.msk [vmem:[#allocation2 + $0x58] sm:$0xff] %vm290_vm2, %v277_v3  ;;  %v309_v20 = vld [vmem:[#allocation2] sm:$0xff] }
 0x14f   :  { %v257_v4 = vpop.permute.xlu1 %256  ;;  %v275_v5 = vpop.permute.xlu0 %274  ;;  %v313_v15 = vld [vmem:[#allocation2 + $0x20] sm:$0xff] }
 0x150   :  { %292 = vst.msk [vmem:[#allocation2 + $0x8] sm:$0xff] %vm290_vm2, %v257_v4  ;;  %v320_v6 = vld [vmem:[#allocation2 + $0x58] sm:$0xff] }
 0x151   :  { %301 = vst.msk [vmem:[#allocation2 + $0x50] sm:$0xff] %vm290_vm2, %v275_v5  ;;  %343 = vmatpush.msra.mxu2 %v320_v6 }
 0x157   :  { %v265_v7 = vpop.permute.xlu0 %264  ;;  %v310_v18 = vld [vmem:[#allocation2 + $0x8] sm:$0xff] }
 0x158   :  { %296 = vst.msk [vmem:[#allocation2 + $0x28] sm:$0xff] %vm290_vm2, %v265_v7  ;;  %v319_v8 = vld [vmem:[#allocation2 + $0x50] sm:$0xff] }
 0x159   :  { %344 = vmatpush.msra.mxu2 %v319_v8 }
 0x15b   :  { %345 = vmatpush.msra.mxu2 %v318_v9 }
 0x15d   :  { %346 = vmatpush.msra.mxu2 %v317_v10 }
 0x15f   :  { %347 = vmatpush.msra.mxu2 %v316_v11  ;;  %v259_v12 = vpop.permute.xlu0 %258  ;;  %v314_v14 = vld [vmem:[#allocation2 + $0x28] sm:$0xff] }
 0x160   :  { %293 = vst.msk [vmem:[#allocation2 + $0x10] sm:$0xff] %vm290_vm2, %v259_v12 }
 0x161   :  { %348 = vmatpush.msra.mxu2 %v315_v13 }
 0x163   :  { %349 = vmatpush.msra.mxu2 %v314_v14 }
 0x165   :  { %350 = vmatpush.msra.mxu2 %v313_v15 }
 0x167   :  { %351 = vmatpush.msra.mxu2 %v312_v16  ;;  %v311_v17 = vld [vmem:[#allocation2 + $0x10] sm:$0xff] }
 0x169   :  { %352 = vmatpush.msra.mxu2 %v311_v17 }
 0x16b   :  { %353 = vmatpush.msra.mxu2 %v310_v18 }
 0x16d   :  { %354 = vmatpush.msra.mxu2 %v309_v20 }
 0x16e   :  { %408 = vmatmul.msk.f32.vlgmr.msra.gmra.mxu2 %vm38_vm0, %v303_v19 }
 0x176   :  { %409 = vmatmul.msk.f32.gmra.mxu2 %vm38_vm0, %v304_v21 }
 0x17e   :  { %410 = vmatmul.msk.f32.gmra.mxu2 %vm38_vm0, %v305_v22 }
 0x186   :  { %411 = vmatmul.msk.f32.gmra.mxu2 %vm38_vm0, %v306_v23 }
 0x18e   :  { %412 = vmatmul.msk.f32.gmra.mxu2 %vm38_vm0, %v307_v24 }
 0x196   :  { %413 = vmatmul.msk.f32.gmra.mxu2 %vm38_vm0, %v308_v25 }
 0x1f1   :  { %v356_v26 = vpop.f32.mrf.mxu2 }
 0x1f2   :  { %374 = vst.msk [vmem:[%s667_s3] sm:$0xff] %vm38_vm0, %v356_v26 }
 0x1f9   :  { %v359_v27 = vpop.f32.mrf.mxu2 }
 0x1fa   :  { %375 = vst.msk [vmem:[%s667_s3 + $0x8] sm:$0xff] %vm38_vm0, %v359_v27 }
 0x201   :  { %v362_v28 = vpop.f32.mrf.mxu2 }
 0x202   :  { %376 = vst.msk [vmem:[%s667_s3 + $0x10] sm:$0xff] %vm38_vm0, %v362_v28 }
 0x209   :  { %v365_v29 = vpop.f32.mrf.mxu2 }
 0x20a   :  { %377 = vst.msk [vmem:[%s667_s3 + $0x18] sm:$0xff] %vm38_vm0, %v365_v29 }
 0x211   :  { %v368_v30 = vpop.f32.mrf.mxu2 }
 0x212   :  { %378 = vst.msk [vmem:[%s667_s3 + $0x20] sm:$0xff] %vm38_vm0, %v368_v30 }
 0x219   :  { %v371_v31 = vpop.f32.mrf.mxu2 }
 0x21a   :  { %379 = vst.msk [vmem:[%s667_s3 + $0x28] sm:$0xff] %vm38_vm0, %v371_v31 }

// kernel: custom-call.5
= control target key start
LH: loop header
LB: loop body
LE: loop exit
PB: predicated region body
PF: predicated region fallthrough
CT: control target
= control target key end

     0   :  { %s2674_s0 = inlined_call_operand.vmem [shape: f32[2,12,12], index: 0, kind: input, shape index: {}]   ;;  %s2675_s1 = inlined_call_operand.vmem [shape: f32[2,12,12], index: 1, kind: input, shape index: {}]   ;;  %s2676_s2 = inlined_call_operand.vmem [shape: f32[2,12,12], index: 2, kind: input, shape index: {}]   ;;  %s2677_s3 = inlined_call_operand.vmem [shape: f32[2,12,12], index: 3, kind: input, shape index: {}]   ;;  %s2678_s4 = inlined_call_operand.vmem [shape: f32[2,12], index: 4, kind: output, shape index: {0}]   ;;  %s2679_s5 = inlined_call_operand.vmem [shape: f32[2,12], index: 5, kind: output, shape index: {1}]   ;;  %s2680_s6 = inlined_call_operand.vmem [shape: f32[2,12,12], index: 6, kind: output, shape index: {2}]   ;;  %s2681_s7 = inlined_call_operand.vmem [shape: f32[2,12,12], index: 7, kind: output, shape index: {3}]   ;;  %s2682_s8 = inlined_call_operand.vmem [shape: f32[2,12,12], index: 8, kind: output, shape index: {4}]   ;;  %s2683_s9 = inlined_call_operand.vmem [shape: f32[2,12,12], index: 9, kind: output, shape index: {5}]  }
   0x1   :  { %2684 = sst [smem:[#allocation25_spill]] %s2674_s0 }
   0x2   :  { %s2163_s30 = smov 0   ;;  %s2165_s10 = smov 0  }
   0x3   :  { %s2167_s11 = smov 0  }
   0x4 LB: > { %s2179_s12 = sadd.s32 4294967295, %s2100_s11   ;;  %s2182_s13 = sadd.s32 1, %s2100_s11   ;;  %s2100_s11 = sphi %s2167_s11, %s2694_s11   ;;  %s2096_s10 = sphi %s2165_s10, %s2693_s10   ;;  %s2092_s30 = sphi %s2163_s30, %s2692_s30  }
   0x5   : > { %s20_s14 = sshrl.u32 %s2100_s11, 3  ;;  %s21_s15 = sshrl.u32 %s2182_s13, 3 }
   0x6   : > { %s22_s16 = ssub.s32 %s20_s14, %s21_s15  ;;  %s25_s17 = sadd.s32 1, %s2096_s10 }
   0x7   : > { %p23_p0 = scmp.eq.s32.totalorder %s22_s16, 0  ;;  %p35_p1 = scmp.ne.s32.totalorder %s2096_s10, %s2092_s30 }
   0x8   : > { %p36_p2 = scmp.eq.s32.totalorder %s2179_s12, 1  ;;  %p1858_p4 = scmp.ge.s32.totalorder %s2100_s11, 2 }
   0x9   : > { %s2191_s18 = scalar_select %p23_p0, %s2096_s10, %s25_s17  }
   0xa   : > { %p2193_p3 = por %p36_p2, %p35_p1  ;;  %86 = sbr.rel (%p1858_p4) target bundleno = 26 (0x1a), region = 16 }
   0xb   : > { %s88_s20 = sand.u32 (!%p1858_p4), 1, %s2100_s11   ;;  %s1860_s21 = sshll.u32 (!%p1858_p4), %s2100_s11, 4 }
   0xc   : > { %s1859_s22 = sshll.u32 (!%p1858_p4), %s88_s20, 4  ;;  %s2686_s0 = sld [smem:[#allocation25_spill]] (!%p1858_p4) }
   0xd   : > { %s90_s26 = scalar_lea.vmem (!%p1858_p4), [#allocation0], %s1859_s22  ;;  %s117_s29 = scalar_lea.vmem (!%p1858_p4), %s2675_s1, %s1860_s21 }
   0xe   : > { %s142_s16 = scalar_lea.vmem (!%p1858_p4), %s2676_s2, %s1860_s21  ;;  %s115_s17 = scalar_lea.vmem (!%p1858_p4), [#allocation1], %s1859_s22 }
   0xf   : > { %v130_v2 = vld [vmem:[%s117_s29] sm:$0xff]  ;;  %v132_v3 = vld [vmem:[%s117_s29 + $0x8] sm:$0xff]  ;;  %s167_s24 = scalar_lea.vmem %s2677_s3, %s1860_s21 }
  0x10   : > { %131 = vst [vmem:[%s115_s17] sm:$0xff] %v130_v2  ;;  %v155_v4 = vld [vmem:[%s142_s16] sm:$0xff]  ;;  %v157_v5 = vld [vmem:[%s142_s16 + $0x8] sm:$0xff] }
  0x11   : > { %133 = vst [vmem:[%s115_s17 + $0x8] sm:$0xff] %v132_v3  ;;  %v180_v6 = vld [vmem:[%s167_s24] sm:$0xff]  ;;  %v182_v7 = vld [vmem:[%s167_s24 + $0x8] sm:$0xff] }
  0x12   : > { %s92_s25 = scalar_lea.vmem %s2686_s0, %s1860_s21 }
  0x13   : > { %v105_v0 = vld [vmem:[%s92_s25] sm:$0xff]  ;;  %v107_v1 = vld [vmem:[%s92_s25 + $0x8] sm:$0xff]  ;;  %s140_s25 = scalar_lea.vmem [#allocation2], %s1859_s22 }
  0x14   : > { %106 = vst [vmem:[%s90_s26] sm:$0xff] %v105_v0 }
  0x15   : > { %108 = vst [vmem:[%s90_s26 + $0x8] sm:$0xff] %v107_v1  ;;  %s165_s26 = scalar_lea.vmem [#allocation3], %s1859_s22 }
  0x16   : > { %156 = vst [vmem:[%s140_s25] sm:$0xff] %v155_v4 }
  0x17   : > { %158 = vst [vmem:[%s140_s25 + $0x8] sm:$0xff] %v157_v5 }
  0x18   : > { %181 = vst [vmem:[%s165_s26] sm:$0xff] %v180_v6 }
  0x19   : > { %183 = vst [vmem:[%s165_s26 + $0x8] sm:$0xff] %v182_v7 }
  0x1a PF: > { %p1867_p5 = scmp.ge.s32.totalorder %s2100_s11, 1  ;;  %p188_p6 = scmp.lt.s32.totalorder %s2100_s11, 3 }
  0x1c   : > { %p189_p7 = pnand %p1867_p5, %p188_p6 }
  0x1e   : > { %192 = sbr.rel (%p189_p7) target bundleno = 1021 (0x3fd), region = 96 }
  0x23   : > { %s195_s27 = sand.u32 1, %s2179_s12   ;;  %s229_s21 = sand.u32 1, %s2092_s30   ;;  %v297_v8 = vlaneseq  ;;  %v2110_v11 = vmov 0.0  }
  0x24   : > { %s2216_s28 = sshll.u32 %s195_s27, 4  ;;  %s2218_s29 = sshll.u32 %s229_s21, 1 }
  0x25   : > { %s197_s22 = scalar_lea.vmem [#allocation0], %s2216_s28  ;;  %s2222_s14 = scalar_lea.vmem [#allocation8], %s2216_s28  ;;  %v2225_v12 = vshrl.u32 %v297_v8, 7  ;;  %v2230_v16 = vand.u32 127, %v297_v8 }
  0x26   : > { %v257_v9 = vld [vmem:[%s197_s22] sm:$0xff]  ;;  %v1878_v10 = vld [vmem:[%s197_s22 + $0x8] sm:$0xff]  ;;  %284 = vst [vmem:[%s2222_s14] sm:$0xff] %v2110_v11  ;;  %s256_s30 = smov [#allocation12]  ;;  %s263_s11 = smov [#allocation13] }
  0x27   : > { %s201_s15 = scalar_lea.vmem [#allocation1], %s2216_s28  ;;  %1886 = vst [vmem:[%s2222_s14 + $0x8] sm:$0xff] %v2110_v11  ;;  %s270_s16 = smov [#allocation14]  ;;  %v302_v12 = vmov %v2225_v12  ;;  %v299_v16 = vmov %v2230_v16  ;;  %vm1717_vm4 = vcmp.lt.s32.totalorder %v2230_v16, 12 }
  0x28   : > { %v264_v13 = vld [vmem:[%s201_s15] sm:$0xff]  ;;  %258 = vst [vmem:[%s256_s30] sm:$0xff] %v257_v9  ;;  %v1880_v14 = vld [vmem:[%s201_s15 + $0x8] sm:$0xff]  ;;  %s205_s17 = scalar_lea.vmem [#allocation2], %s2216_s28  ;;  %s277_s20 = smov [#allocation15]  ;;  %v312_v20 = vadd.s32 8, %v302_v12  ;;  %vm306_vm0 = vcmp.eq.s32.totalorder %v302_v12, %v299_v16  ;;  %v322_v12 = vmov %v2225_v12 }
  0x29   : > { %1879 = vst [vmem:[%s256_s30 + $0x8] sm:$0xff] %v1878_v10  ;;  %v271_v15 = vld [vmem:[%s205_s17] sm:$0xff]  ;;  %v1882_v17 = vld [vmem:[%s205_s17 + $0x8] sm:$0xff]  ;;  %s209_s23 = scalar_lea.vmem [#allocation3], %s2216_s28  ;;  %s296_s14 = smov %s2222_s14  ;;  %v332_v25 = vadd.s32 8, %v322_v12 }
  0x2a   : > { %265 = vst [vmem:[%s263_s11] sm:$0xff] %v264_v13  ;;  %v278_v18 = vld [vmem:[%s209_s23] sm:$0xff]  ;;  %v1884_v19 = vld [vmem:[%s209_s23 + $0x8] sm:$0xff]  ;;  %s2237_s24 = scalar_lea.vmem [#allocation9], %s2216_s28  ;;  %vm313_vm1 = vcmp.eq.s32.totalorder %v312_v20, %v299_v16  ;;  %s2242_s25 = scalar_lea.vmem [#allocation10], %s2216_s28  ;;  %v319_v16 = vmov %v2230_v16 }
  0x2b   : > { %1881 = vst [vmem:[%s263_s11 + $0x8] sm:$0xff] %v1880_v14  ;;  %s2248_s26 = scalar_lea.vmem [#allocation11], %s2216_s28  ;;  %vm326_vm2 = vcmp.eq.s32.totalorder %v322_v12, %v319_v16  ;;  %vm333_vm3 = vcmp.eq.s32.totalorder %v332_v25, %v319_v16  ;;  %s1713_s28 = smov [#allocation12]  ;;  %v1709_v16 = vmov %v2230_v16  ;;  %v1738_v12 = vmov %v2225_v12 }
  0x2c   : > { %272 = vst [vmem:[%s270_s16] sm:$0xff] %v271_v15  ;;  %s1739_s22 = smov [#allocation13]  ;;  %s1762_s30 = smov [#allocation14]  ;;  %v1735_v16 = vmov %v2230_v16  ;;  %v1712_v12 = vmov %v2225_v12 }
  0x2d   : > { %1883 = vst [vmem:[%s270_s16 + $0x8] sm:$0xff] %v1882_v17  ;;  %s1785_s11 = smov [#allocation15]  ;;  %vm1722_vm5 = vcmp.eq.s32.totalorder %v1712_v12, %v1709_v16  ;;  %v1728_v48 = vadd.s32 8, %v1712_v12  ;;  %v1758_v16 = vmov %v2230_v16  ;;  %v1761_v12 = vmov %v2225_v12 }
  0x2e   : > { %279 = vst [vmem:[%s277_s20] sm:$0xff] %v278_v18  ;;  %v303_v21 = vld [vmem:[%s296_s14] sm:$0xff]  ;;  %v1890_v22 = vld [vmem:[%s296_s14 + $0x8] sm:$0xf]  ;;  %v1784_v12 = vmov %v2225_v12 }
  0x2f   : > { %1885 = vst [vmem:[%s277_s20 + $0x8] sm:$0xff] %v1884_v19  ;;  %v307_v23 = vsel %vm306_vm0, 1.0, %v303_v21  ;;  %v314_v24 = vsel %vm313_vm1, 1.0, %v1890_v22  ;;  %vm1729_vm6 = vcmp.eq.s32.totalorder %v1728_v48, %v1709_v16  ;;  %v1781_v16 = vmov %v2230_v16 }
  0x30   : > { %287 = vst [vmem:[%s2237_s24] sm:$0xff] %v2110_v11  ;;  %v1719_v30 = vld [vmem:[%s1713_s28] sm:$0xff]  ;;  %v1894_v31 = vld [vmem:[%s1713_s28 + $0x8] sm:$0xf]  ;;  %v1802_v0 = vadd.s32 8, %v1784_v12  ;;  %vm1794_vm7 = vcmp.eq.s32.totalorder %v1784_v12, %v1781_v16 }
  0x31   : > { %1887 = vst [vmem:[%s2237_s24 + $0x8] sm:$0xff] %v2110_v11  ;;  %v1720_v33 = vsel %vm1717_vm4, %v1719_v30, 0.0  ;;  %v1726_v34 = vsel %vm1717_vm4, %v1894_v31, 0.0 }
  0x32   : > { %290 = vst [vmem:[%s2242_s25] sm:$0xff] %v2110_v11  ;;  %v1745_v32 = vld [vmem:[%s1739_s22] sm:$0xff]  ;;  %v1895_v36 = vld [vmem:[%s1739_s22 + $0x8] sm:$0xf]  ;;  %v1721_v38 = vmul.f32 %v1720_v33, %v1720_v33  ;;  %v1727_v39 = vmul.f32 %v1726_v34, %v1726_v34  ;;  %vm1803_vm8 = vcmp.eq.s32.totalorder %v1802_v0, %v1781_v16 }
  0x33   : > { %1888 = vst [vmem:[%s2242_s25 + $0x8] sm:$0xff] %v2110_v11  ;;  %v1746_v35 = vsel %vm1717_vm4, %v1745_v32, 0.0  ;;  %v1752_v41 = vsel %vm1717_vm4, %v1895_v36, 0.0 }
  0x34   : > { %293 = vst [vmem:[%s2248_s26] sm:$0xff] %v2110_v11  ;;  %v1768_v37 = vld [vmem:[%s1762_s30] sm:$0xff]  ;;  %v1747_v40 = vmul.f32 %v1746_v35, %v1746_v35  ;;  %v1896_v42 = vld [vmem:[%s1762_s30 + $0x8] sm:$0xf]  ;;  %v1732_v44 = vadd.f32 %v1727_v39, %v1721_v38  ;;  %v1753_v45 = vmul.f32 %v1752_v41, %v1752_v41  ;;  %v1723_v52 = vsel %vm1722_vm5, 0.0, %v1721_v38 }
  0x35   : > { %1889 = vst [vmem:[%s2248_s26 + $0x8] sm:$0xff] %v2110_v11  ;;  %s316_s26 = smov %s2248_s26  ;;  %v1769_v43 = vsel %vm1717_vm4, %v1768_v37, 0.0  ;;  %v1775_v47 = vsel %vm1717_vm4, %v1896_v42, 0.0  ;;  %v1730_v56 = vsel %vm1729_vm6, 0.0, %v1727_v39 }
  0x36   : > { %308 = vst [vmem:[%s296_s14] sm:$0xff] %v307_v23  ;;  %v1791_v46 = vld [vmem:[%s1785_s11] sm:$0xff]  ;;  %v1749_v49 = vadd.f32 %v1747_v40, %v1732_v44  ;;  %v1770_v50 = vmul.f32 %v1769_v43, %v1769_v43  ;;  %v1897_v51 = vld [vmem:[%s1785_s11 + $0x8] sm:$0xf]  ;;  %v1776_v55 = vmul.f32 %v1775_v47, %v1775_v47  ;;  %v1731_v58 = vadd.f32 %v1730_v56, %v1723_v52 }
  0x37   : > { %1891 = vst [vmem:[%s296_s14 + $0x8] sm:$0xf] %v314_v24  ;;  %v1792_v53 = vsel %vm1717_vm4, %v1791_v46, 0.0  ;;  %v1800_v57 = vsel %vm1717_vm4, %v1897_v51, 0.0 }
  0x38   : > { %v1755_v54 = vadd.f32 %v1753_v45, %v1749_v49  ;;  %v1793_v60 = vmul.f32 %v1792_v53, %v1792_v53  ;;  %v1748_v61 = vadd.f32 %v1747_v40, %v1731_v58  ;;  %v1801_v63 = vmul.f32 %v1800_v57, %v1800_v57 }
  0x3a   : > { %v1772_v59 = vadd.f32 %v1770_v50, %v1755_v54  ;;  %v1754_v1 = vadd.f32 %v1753_v45, %v1748_v61  ;;  %v1795_v5 = vsel %vm1794_vm7, 0.0, %v1793_v60  ;;  %v1804_v8 = vsel %vm1803_vm8, 0.0, %v1801_v63 }
  0x3c   : > { %v323_v26 = vld [vmem:[%s316_s26] sm:$0xff]  ;;  %v1892_v27 = vld [vmem:[%s316_s26 + $0x8] sm:$0xf]  ;;  %v1778_v62 = vadd.f32 %v1776_v55, %v1772_v59  ;;  %v1771_v3 = vadd.f32 %v1770_v50, %v1754_v1 }
  0x3d   : > { %v327_v28 = vsel %vm326_vm2, 1.0, %v323_v26  ;;  %v334_v29 = vsel %vm333_vm3, 1.0, %v1892_v27 }
  0x3e   : > { %328 = vst [vmem:[%s316_s26] sm:$0xff] %v327_v28  ;;  %v1797_v2 = vadd.f32 %v1793_v60, %v1778_v62  ;;  %v1777_v6 = vadd.f32 %v1776_v55, %v1771_v3 }
  0x3f   : > { %1893 = vst [vmem:[%s316_s26 + $0x8] sm:$0xf] %v334_v29 }
  0x40   : > { %v1806_v4 = vadd.f32 %v1801_v63, %v1797_v2  ;;  %v1796_v7 = vadd.f32 %v1795_v5, %v1777_v6 }
  0x42   : > { %1807 = vadd.xlane.f32.xlu0 %v1806_v4  ;;  %v1805_v9 = vadd.f32 %v1804_v8, %v1796_v7 }
  0x4a   : > { %1815 = vadd.xlane.f32.xlu0 %v1805_v9 }
  0xb5   : > { %v1808_v10 = vpop.xlane.xlu0 %1807 }
  0xb6   : > { %v1809_v11 = vrot.slane %v1808_v10, 4 }
  0xb8   : > { %v1810_v13 = vadd.f32 %v1809_v11, %v1808_v10 }
  0xba   : > { %v1811_v14 = vrot.slane %v1810_v13, 2 }
  0xbc   : > { %v1812_v19 = vadd.f32 %v1811_v14, %v1810_v13 }
  0xbd   : > { %v1816_v15 = vpop.xlane.xlu0 %1815 }
  0xbe   : > { %v1817_v17 = vrot.slane %v1816_v15, 4  ;;  %v1813_v22 = vrot.slane %v1812_v19, 1 }
  0xc0   : > { %v1818_v18 = vadd.f32 %v1817_v17, %v1816_v15  ;;  %v1814_v25 = vadd.f32 %v1813_v22, %v1812_v19 }
  0xc2   : > { %v1819_v20 = vrot.slane %v1818_v18, 2 }
  0xc4   : > { %v1820_v21 = vadd.f32 %v1819_v20, %v1818_v18 }
  0xc6   : > { %v1821_v23 = vrot.slane %v1820_v21, 1 }
  0xc8   : > { %v1822_v24 = vadd.f32 %v1821_v23, %v1820_v21 }
  0xca   : > { %2011 = vpush %v1822_v24 }
  0xcb   : > { %2013 = vpush %v1814_v25 }
  0xfb   : > { %s2012_s15 = spop %2011 }
  0xfc   : > { %s2014_s16 = spop %2013 }
  0xfd   : > { %s1825_s17 = smul.f32 1e-10, %s2014_s16 }
  0xff   : > { %p1826_p8 = scmp.le.f32.partialorder %s2012_s15, %s1825_s17 }
 0x100   : > { %s2281_s20 = smov (!%p1826_p8), 0  }
 0x101   : > { %1829 = sbr.rel (%p1826_p8) target bundleno = 969 (0x3c9), region = 448 }
 0x106 LB: >> { %s2286_s23 = smov 0   ;;  %s2104_s20 = sphi %s2281_s20, %s2687_s20  }
 0x107 LB: >>> { %s472_s28 = smov [#allocation12]  ;;  %v476_v16 = vmov %v2230_v16  ;;  %v479_v12 = vmov %v2225_v12  ;;  %s498_s22 = smov [#allocation13]  ;;  %s2108_s23 = sphi %s2286_s23, %s471_s23  }
 0x108   : >>> { %v502_v16 = vmov %v2230_v16  ;;  %v505_v12 = vmov %v2225_v12  ;;  %v480_v26 = vld [vmem:[%s472_s28] sm:$0xff]  ;;  %vm483_vm9 = vcmp.eq.s32.totalorder %v479_v12, %v476_v16  ;;  %v1898_v27 = vld [vmem:[%s472_s28 + $0x8] sm:$0xf]  ;;  %v488_v28 = vadd.s32 8, %v479_v12  ;;  %s524_s30 = smov [#allocation15]  ;;  %s473_s11 = smov [#allocation16] }
 0x109   : >>> { %vm509_vm10 = vcmp.eq.s32.totalorder %v505_v12, %v502_v16  ;;  %v528_v16 = vmov %v2230_v16  ;;  %v484_v29 = vsel %vm483_vm9, %v480_v26, 0.0  ;;  %v506_v30 = vld [vmem:[%s498_s22] sm:$0xff]  ;;  %v1899_v31 = vld [vmem:[%s498_s22 + $0x8] sm:$0xf]  ;;  %v514_v32 = vadd.s32 8, %v505_v12  ;;  %s499_s15 = smov [#allocation17]  ;;  %s2315_s14 = smov %s2222_s14 }
 0x10a   : >>> { %v531_v12 = vmov %v2225_v12  ;;  %vm489_vm11 = vcmp.eq.s32.totalorder %v488_v28, %v476_v16  ;;  %v510_v33 = vsel %vm509_vm10, %v506_v30, 0.0  ;;  %v532_v34 = vld [vmem:[%s524_s30] sm:$0xff]  ;;  %v1900_v35 = vld [vmem:[%s524_s30 + $0x8] sm:$0xf]  ;;  %s525_s16 = smov [#allocation18]  ;;  %s554_s17 = smov [#allocation17] }
 0x10b   : >>> { %vm535_vm12 = vcmp.eq.s32.totalorder %v531_v12, %v528_v16  ;;  %v540_v36 = vadd.s32 8, %v531_v12  ;;  %v490_v37 = vsel %vm489_vm11, %v1898_v27, %v484_v29  ;;  %vm515_vm13 = vcmp.eq.s32.totalorder %v514_v32, %v502_v16  ;;  %s552_s28 = smov [#allocation16]  ;;  %s556_s22 = smov [#allocation18] }
 0x10c   : >>> { %v536_v38 = vsel %vm535_vm12, %v532_v34, 0.0  ;;  %v491_v39 = vrot.slane %v490_v37, 4  ;;  %v516_v40 = vsel %vm515_vm13, %v1899_v31, %v510_v33  ;;  %s631_s30 = smov [#allocation19]  ;;  %v661_v12 = vmov %v2225_v12  ;;  %s1125_s21 = smov [#allocation23] }
 0x10d   : >>> { %vm541_vm14 = vcmp.eq.s32.totalorder %v540_v36, %v528_v16  ;;  %v517_v41 = vrot.slane %v516_v40, 4  ;;  %v643_v16 = vmov %v2230_v16  ;;  %s2318_s24 = smov %s2237_s24  ;;  %s2323_s25 = smov %s2242_s25 }
 0x10e   : >>> { %v542_v42 = vsel %vm541_vm14, %v1900_v35, %v536_v38  ;;  %v492_v43 = vadd.f32 %v491_v39, %v490_v37  ;;  %v658_v16 = vmov %v2230_v16  ;;  %s2327_s26 = smov %s2248_s26  ;;  %s2112_s27 = smov 127  }
 0x10f   : >>> { %v543_v44 = vrot.slane %v542_v42, 4  ;;  %v518_v45 = vadd.f32 %v517_v41, %v516_v40  ;;  %s2508_s0 = smov [#allocation13]  ;;  %s471_s23 = sadd.s32 1, %s2108_s23  }
 0x110   : >>> { %v493_v46 = vrot.slane %v492_v43, 2  ;;  %p468_p9 = scmp.ge.s32.totalorder %s471_s23, 23  }
 0x111   : >>> { %v544_v47 = vadd.f32 %v543_v44, %v542_v42  ;;  %v519_v48 = vrot.slane %v518_v45, 2 }
 0x112   : >>> { %v494_v49 = vadd.f32 %v493_v46, %v492_v43 }
 0x113   : >>> { %v545_v50 = vrot.slane %v544_v47, 2  ;;  %v520_v51 = vadd.f32 %v519_v48, %v518_v45 }
 0x114   : >>> { %v495_v52 = vrot.slane %v494_v49, 1 }
 0x115   : >>> { %v546_v53 = vadd.f32 %v545_v50, %v544_v47  ;;  %v521_v54 = vrot.slane %v520_v51, 1 }
 0x116   : >>> { %v496_v55 = vadd.f32 %v495_v52, %v494_v49 }
 0x117   : >>> { %v547_v56 = vrot.slane %v546_v53, 1  ;;  %v522_v57 = vadd.f32 %v521_v54, %v520_v51 }
 0x118   : >>> { %497 = vst [vmem:[%s473_s11] sm:$0x1] %v496_v55  ;;  %s633_s11 = smov [#allocation20] }
 0x119   : >>> { %v548_v58 = vadd.f32 %v547_v56, %v546_v53  ;;  %523 = vst [vmem:[%s499_s15] sm:$0x1] %v522_v57  ;;  %s550_s15 = smov [#allocation21]  ;;  %v662_v57 = vadd.s32 8, %v661_v12  ;;  %v646_v12 = vmov %v2225_v12 }
 0x11a   : >>> { %s635_s15 = smov %s550_s15  ;;  %v692_v12 = vmov %v2225_v12 }
 0x11b   : >>> { %549 = vst [vmem:[%s525_s16] sm:$0x1] %v548_v58  ;;  %s551_s16 = smov [#allocation22] }
 0x11c   : >>> { %s637_s16 = smov %s551_s16 }
 0x11f   : >>> { %v553_v2 = vld [vmem:[%s552_s28] sm:$0xff]  ;;  %s654_s28 = smov [#allocation21] }
 0x120   : >>> { %v2297_v59 = vld [vmem:[%s554_s17] sm:$0xff]  ;;  %v607_v28 = vand.u32 2147483647, %v553_v2  ;;  %s639_s17 = smov [#allocation21] }
 0x121   : >>> { %v559_v60 = vmul.f32 2.0, %v2297_v59  ;;  %v608_v36 = vand.u32 2147483647, %v2297_v59 }
 0x122   : >>> { %v557_v3 = vld [vmem:[%s556_s22] sm:$0xff]  ;;  %s670_s22 = smov [#allocation22] }
 0x123   : >>> { %2062 = vrcp.f32 %v559_v60  ;;  %v571_v63 = vand.u32 2147483648, %v559_v60  ;;  %vm565_vm15 = vweird.f32 %v559_v60  ;;  %v569_v1 = vand.u32 2147483647, %v559_v60 }
 0x124   : >>> { %v558_v6 = vsub.f32 %v557_v3, %v553_v2  ;;  %v609_v29 = vand.u32 2147483647, %v557_v3 }
 0x125   : >>> { %v572_v5 = vor.u32 1.1754944e-38, %v571_v63  ;;  %vm570_vm2 = vcmp.eq.f32.partialorder %v569_v1, 8.507059e+37 }
 0x126   : >>> { %v610_v31 = vmin.f32 %v607_v28, %v609_v29 }
 0x128   : >>> { %v611_v37 = vmul.f32 1.1920929e-08, %v610_v31 }
 0x129   : >>> { %v2063_v61 = vpop.eup %2062 }
 0x12a   : >>> { %v561_v62 = vmul.f32 %v2063_v61, %v559_v60  ;;  %vm566_vm0 = vweird.f32 %v2063_v61  ;;  %vm612_vm11 = vcmp.le.f32.partialorder %v608_v36, %v611_v37  ;;  %v693_v60 = vadd.s32 8, %v692_v12 }
 0x12b   : >>> { %vm567_vm1 = vmor %vm565_vm15, %vm566_vm0  ;;  %vm648_vm15 = vcmp.eq.s32.totalorder %v646_v12, %v643_v16  ;;  %vm663_vm0 = vcmp.eq.s32.totalorder %v662_v57, %v658_v16  ;;  %v674_v16 = vmov %v2230_v16  ;;  %v677_v12 = vmov %v2225_v12 }
 0x12c   : >>> { %v562_v0 = vsub.f32 1.0, %v561_v62  ;;  %v689_v16 = vmov %v2230_v16 }
 0x12e   : >>> { %v563_v4 = vmul.f32 %v2063_v61, %v562_v0 }
 0x130   : >>> { %v564_v7 = vadd.f32 %v2063_v61, %v563_v4 }
 0x132   : >>> { %v568_v8 = vsel %vm567_vm1, %v2063_v61, %v564_v7  ;;  %vm679_vm1 = vcmp.eq.s32.totalorder %v677_v12, %v674_v16 }
 0x133   : >>> { %v573_v9 = vsel %vm570_vm2, %v572_v5, %v568_v8  ;;  %vm694_vm2 = vcmp.eq.s32.totalorder %v693_v60, %v689_v16  ;;  %v865_v16 = vmov %v2230_v16 }
 0x134   : >>> { %v574_v10 = vmul.f32 %v573_v9, %v558_v6  ;;  %v1133_v9 = vld [vmem:[%s2315_s14] sm:$0xff]  ;;  %v823_v16 = vmov %v2230_v16 }
 0x135   : >>> { %v886_v16 = vmov %v2230_v16 }
 0x136   : >>> { %v576_v11 = vmul.f32 %v574_v10, %v574_v10  ;;  %vm575_vm6 = vcmp.ge.f32.partialorder %v574_v10, 0.0 }
 0x138   : >>> { %v577_v13 = vadd.f32 1.0, %v576_v11 }
 0x13a   : >>> { %2064 = vrsqrt.f32 %v577_v13  ;;  %vm585_vm3 = vcmp.eq.f32.partialorder %v577_v13, inf  ;;  %v588_v21 = vand.u32 2147483648, %v577_v13  ;;  %vm587_vm5 = vcmp.eq.f32.partialorder %v577_v13, 0.0 }
 0x140   : >>> { %v2065_v14 = vpop.eup %2064 }
 0x141   : >>> { %v579_v15 = vmul.f32 %v2065_v14, %v577_v13 }
 0x143   : >>> { %v580_v17 = vmul.f32 %v2065_v14, %v579_v15 }
 0x145   : >>> { %v581_v18 = vmul.f32 0.5, %v580_v17 }
 0x147   : >>> { %v582_v19 = vsub.f32 1.5, %v581_v18 }
 0x149   : >>> { %v583_v20 = vmul.f32 %v2065_v14, %v582_v19  ;;  %v1135_v14 = vld [vmem:[%s2323_s25] sm:$0xff] }
 0x14b   : >>> { %v584_v22 = vmul.f32 %v583_v20, %v577_v13 }
 0x14d   : >>> { %v586_v23 = vsel %vm585_vm3, %v577_v13, %v584_v22  ;;  %v1134_v13 = vld [vmem:[%s2318_s24] sm:$0xff]  ;;  %vm1045_vm3 = vcmp.eq.s32.totalorder %v2225_v12, 0 }
 0x14e   : >>> { %v589_v24 = vsel %vm587_vm5, %v588_v21, %v586_v23  ;;  %v1136_v21 = vld [vmem:[%s2327_s26] sm:$0xff]  ;;  %vm1069_vm5 = vcmp.eq.s32.totalorder %v2225_v12, 3 }
 0x14f   : >>> { %v590_v25 = vxor.u32 2147483648, %v589_v24 }
 0x151   : >>> { %v591_v26 = vsel %vm575_vm6, %v589_v24, %v590_v25  ;;  %vm1077_vm6 = vcmp.eq.s32.totalorder %v2225_v12, 7  ;;  %v868_v12 = vmov %v2225_v12 }
 0x152   : >>> { %v592_v27 = vadd.f32 %v591_v26, %v574_v10  ;;  %v826_v12 = vmov %v2225_v12 }
 0x154   : >>> { %2066 = vrcp.f32 %v592_v27  ;;  %v604_v33 = vand.u32 2147483648, %v592_v27  ;;  %vm598_vm7 = vweird.f32 %v592_v27  ;;  %v602_v35 = vand.u32 2147483647, %v592_v27 }
 0x156   : >>> { %v605_v39 = vor.u32 1.1754944e-38, %v604_v33  ;;  %vm603_vm10 = vcmp.eq.f32.partialorder %v602_v35, 8.507059e+37 }
 0x15a   : >>> { %v2067_v30 = vpop.eup %2066 }
 0x15b   : >>> { %v594_v32 = vmul.f32 %v2067_v30, %v592_v27  ;;  %vm599_vm8 = vweird.f32 %v2067_v30 }
 0x15c   : >>> { %vm600_vm9 = vmor %vm598_vm7, %vm599_vm8  ;;  %vm872_vm7 = vcmp.eq.s32.totalorder %v868_v12, %v865_v16 }
 0x15d   : >>> { %v595_v34 = vsub.f32 1.0, %v594_v32 }
 0x15f   : >>> { %v596_v38 = vmul.f32 %v2067_v30, %v595_v34 }
 0x161   : >>> { %v597_v40 = vadd.f32 %v2067_v30, %v596_v38 }
 0x163   : >>> { %v601_v41 = vsel %vm600_vm9, %v2067_v30, %v597_v40  ;;  %vm831_vm9 = vcmp.eq.s32.totalorder %v826_v12, %v823_v16 }
 0x164   : >>> { %v606_v42 = vsel %vm603_vm10, %v605_v39, %v601_v41 }
 0x165   : >>> { %v613_v43 = vsel %vm612_vm11, 0.0, %v606_v42 }
 0x166   : >>> { %v614_v44 = vmul.f32 %v613_v43, %v613_v43  ;;  %v627_v45 = vmul.f32 %v613_v43, %v2297_v59 }
 0x168   : >>> { %v615_v46 = vadd.f32 1.0, %v614_v44  ;;  %v628_v47 = vsub.f32 %v553_v2, %v627_v45  ;;  %v630_v48 = vadd.f32 %v627_v45, %v557_v3 }
 0x16a   : >>> { %2068 = vrsqrt.f32 %v615_v46  ;;  %632 = vst [vmem:[%s631_s30] sm:$0xff] %v628_v47  ;;  %vm622_vm12 = vweird.f32 %v615_v46  ;;  %s685_s30 = smov [#allocation22] }
 0x16b   : >>> { %634 = vst [vmem:[%s633_s11] sm:$0xff] %v630_v48  ;;  %s652_s11 = smov [#allocation23] }
 0x170   : >>> { %v2069_v49 = vpop.eup %2068 }
 0x171   : >>> { %v617_v50 = vmul.f32 %v2069_v49, %v615_v46  ;;  %vm623_vm13 = vweird.f32 %v2069_v49 }
 0x172   : >>> { %vm624_vm14 = vmor %vm622_vm12, %vm623_vm13 }
 0x173   : >>> { %v618_v51 = vmul.f32 %v2069_v49, %v617_v50 }
 0x175   : >>> { %v619_v52 = vmul.f32 0.5, %v618_v51 }
 0x177   : >>> { %v620_v53 = vsub.f32 1.5, %v619_v52 }
 0x179   : >>> { %v621_v54 = vmul.f32 %v2069_v49, %v620_v53 }
 0x17b   : >>> { %v625_v55 = vsel %vm624_vm14, %v2069_v49, %v621_v54 }
 0x17c   : >>> { %636 = vst [vmem:[%s635_s15] sm:$0xff] %v625_v55  ;;  %v626_v56 = vmul.f32 %v625_v55, %v613_v43  ;;  %s667_s15 = smov [#allocation23] }
 0x17e   : >>> { %638 = vst [vmem:[%s637_s16] sm:$0xff] %v626_v56  ;;  %s683_s16 = smov [#allocation24] }
 0x183   : >>> { %v640_v58 = vld [vmem:[%s639_s17] ss:$0 sm:$0xff]  ;;  %s698_s17 = smov [#allocation24] }
 0x184   : >>> { %v655_v59 = vld [vmem:[%s654_s28] ss:$0 sm:$0xff]  ;;  %v649_v61 = vsel %vm648_vm15, %v640_v58, 0.0  ;;  %s701_s28 = smov [#allocation23]  ;;  %vm916_vm15 = vcmp.eq.s32.totalorder %v2230_v16, 0 }
 0x185   : >>> { %v664_v62 = vsel %vm663_vm0, %v655_v59, 0.0  ;;  %650 = vadd.xlane.f32.xlu0 %v649_v61  ;;  %v671_v63 = vld [vmem:[%s670_s22] ss:$0 sm:$0xff]  ;;  %s2310_s22 = smov [#allocation13]  ;;  %vm920_vm0 = vcmp.eq.s32.totalorder %v2230_v16, 1 }
 0x186   : >>> { %665 = vadd.xlane.f32.xlu1 %v664_v62  ;;  %v686_v0 = vld [vmem:[%s685_s30] ss:$0 sm:$0xff]  ;;  %v680_v1 = vsel %vm679_vm1, %v671_v63, 0.0  ;;  %s2312_s30 = smov [#allocation15]  ;;  %vm933_vm1 = vcmp.eq.s32.totalorder %v2230_v16, 11 }
 0x187   : >>> { %v695_v2 = vsel %vm694_vm2, %v686_v0, 0.0  ;;  %v710_v7 = vld [vmem:[%s2310_s22] sm:$0xff] }
 0x188   : >>> { %v712_v8 = vld [vmem:[%s2312_s30] sm:$0xff] }
 0x18d   : >>> { %681 = vadd.xlane.f32.xlu0 %v680_v1 }
 0x18e   : >>> { %696 = vadd.xlane.f32.xlu1 %v695_v2 }
 0x1f8   : >>> { %v651_v3 = vpop.xlane.xlu0 %650 }
 0x1f9   : >>> { %v666_v4 = vpop.xlane.xlu1 %665  ;;  %653 = vst [vmem:[%s652_s11] sm:$0xff] %v651_v3  ;;  %s703_s11 = smov [#allocation24] }
 0x1fa   : >>> { %1901 = vst [vmem:[%s667_s15 + $0x8] sm:$0xff] %v666_v4  ;;  %s1127_s15 = smov [#allocation24] }
 0x200   : >>> { %v682_v5 = vpop.xlane.xlu0 %681 }
 0x201   : >>> { %v697_v6 = vpop.xlane.xlu1 %696  ;;  %684 = vst [vmem:[%s683_s16] sm:$0xff] %v682_v5  ;;  %v702_v10 = vld [vmem:[%s701_s28] sm:$0xff]  ;;  %s2330_s16 = smov [#allocation12]  ;;  %s732_s28 = smov [#allocation24] }
 0x202   : >>> { %1902 = vst [vmem:[%s698_s17 + $0x8] sm:$0xff] %v697_v6  ;;  %v1126_v11 = vld [vmem:[%s1125_s21] sm:$0xff]  ;;  %s2333_s17 = smov [#allocation14]  ;;  %v716_v15 = vmul.f32 %v710_v7, %v702_v10  ;;  %v723_v17 = vmul.f32 %v712_v8, %v702_v10  ;;  %s729_s21 = smov [#allocation23] }
 0x203   : >>> { %v1137_v18 = vmul.f32 %v1133_v9, %v1126_v11  ;;  %v1140_v22 = vmul.f32 %v1134_v13, %v1126_v11  ;;  %v709_v26 = vld [vmem:[%s2330_s16] sm:$0xff]  ;;  %v1144_v27 = vmul.f32 %v1135_v14, %v1126_v11  ;;  %v1147_v36 = vmul.f32 %v1136_v21, %v1126_v11  ;;  %v1903_v45 = vld [vmem:[%s729_s21 + $0x8] sm:$0xff]  ;;  %s763_s21 = smov [#allocation21] }
 0x204   : >>> { %v711_v31 = vld [vmem:[%s2333_s17] sm:$0xff]  ;;  %v713_v39 = vmul.f32 %v709_v26, %v702_v10 }
 0x205   : >>> { %v720_v42 = vmul.f32 %v711_v31, %v702_v10 }
 0x209   : >>> { %v704_v19 = vld [vmem:[%s703_s11] sm:$0xff]  ;;  %s2342_s11 = smov [#allocation13]  ;;  %v1904_v46 = vld [vmem:[%s732_s28 + $0x8] sm:$0xff]  ;;  %s765_s28 = smov [#allocation22] }
 0x20a   : >>> { %v1128_v20 = vld [vmem:[%s1127_s15] sm:$0xff]  ;;  %v717_v23 = vmul.f32 %v712_v8, %v704_v19  ;;  %v722_v24 = vmul.f32 %v710_v7, %v704_v19  ;;  %v714_v35 = vmul.f32 %v711_v31, %v704_v19  ;;  %v719_v37 = vmul.f32 %v709_v26, %v704_v19  ;;  %s2345_s15 = smov [#allocation15] }
 0x20b   : >>> { %v1138_v25 = vmul.f32 %v1135_v14, %v1128_v20  ;;  %v1141_v28 = vmul.f32 %v1136_v21, %v1128_v20  ;;  %v1143_v29 = vmul.f32 %v1133_v9, %v1128_v20  ;;  %v1146_v30 = vmul.f32 %v1134_v13, %v1128_v20  ;;  %v2406_v26 = vld [vmem:[%s763_s21] ss:$0 sm:$0xff]  ;;  %s791_s21 = smov [#allocation12] }
 0x20c   : >>> { %v718_v32 = vsub.f32 %v716_v15, %v717_v23  ;;  %v724_v33 = vadd.f32 %v723_v17, %v722_v24  ;;  %v715_v43 = vsub.f32 %v713_v39, %v714_v35  ;;  %v721_v44 = vadd.f32 %v720_v42, %v719_v37 }
 0x20d   : >>> { %v1139_v34 = vsub.f32 %v1137_v18, %v1138_v25  ;;  %v1142_v38 = vsub.f32 %v1140_v22, %v1141_v28  ;;  %v1145_v40 = vadd.f32 %v1144_v27, %v1143_v29  ;;  %v1148_v41 = vadd.f32 %v1147_v36, %v1146_v30  ;;  %v2408_v27 = vld [vmem:[%s765_s28] ss:$0 sm:$0xff]  ;;  %s793_s28 = smov [#allocation13] }
 0x20e   : >>> { %726 = vst [vmem:[%s2310_s22] sm:$0xff] %v718_v32  ;;  %s1153_s22 = smov [#allocation23] }
 0x20f   : >>> { %728 = vst [vmem:[%s2312_s30] sm:$0xff] %v724_v33  ;;  %s1156_s30 = smov [#allocation24]  ;;  %v1961_v51 = vld [vmem:[%s1153_s22 + $0x8] sm:$0xff]  ;;  %s2390_s22 = smov [#allocation13] }
 0x210   : >>> { %1149 = vst [vmem:[%s2315_s14] sm:$0xff] %v1139_v34  ;;  %s2349_s14 = smov %s2222_s14  ;;  %v1962_v54 = vld [vmem:[%s1156_s30 + $0x8] sm:$0xff]  ;;  %s2396_s30 = smov [#allocation12] }
 0x211   : >>> { %1150 = vst [vmem:[%s2318_s24] sm:$0xff] %v1142_v38  ;;  %s2353_s24 = smov %s2237_s24 }
 0x212   : >>> { %1151 = vst [vmem:[%s2323_s25] sm:$0xff] %v1145_v40  ;;  %s2358_s25 = smov %s2242_s25 }
 0x213   : >>> { %1152 = vst [vmem:[%s2327_s26] sm:$0xff] %v1148_v41  ;;  %s2362_s26 = smov %s2248_s26 }
 0x214   : >>> { %725 = vst [vmem:[%s2330_s16] sm:$0xff] %v715_v43  ;;  %s2366_s16 = smov [#allocation12] }
 0x215   : >>> { %v1906_v47 = vld [vmem:[%s2342_s11 + $0x8] sm:$0xf]  ;;  %727 = vst [vmem:[%s2333_s17] sm:$0xff] %v721_v44  ;;  %s739_s17 = smov [#allocation14] }
 0x216   : >>> { %v1908_v48 = vld [vmem:[%s2345_s15 + $0x8] sm:$0xf]  ;;  %v750_v49 = vmul.f32 %v1906_v47, %v1903_v45  ;;  %v756_v50 = vmul.f32 %v1906_v47, %v1904_v46 }
 0x217   : >>> { %v751_v52 = vmul.f32 %v1908_v48, %v1904_v46  ;;  %v757_v53 = vmul.f32 %v1908_v48, %v1903_v45  ;;  %v1963_v55 = vld [vmem:[%s2349_s14 + $0x8] sm:$0xf] }
 0x218   : >>> { %v1964_v56 = vld [vmem:[%s2353_s24 + $0x8] sm:$0xf]  ;;  %v1171_v57 = vmul.f32 %v1963_v55, %v1961_v51  ;;  %v1177_v58 = vmul.f32 %v1963_v55, %v1962_v54 }
 0x219   : >>> { %v752_v59 = vsub.f32 %v750_v49, %v751_v52  ;;  %v758_v60 = vadd.f32 %v757_v53, %v756_v50  ;;  %v1965_v61 = vld [vmem:[%s2358_s25 + $0x8] sm:$0xf]  ;;  %v1174_v62 = vmul.f32 %v1964_v56, %v1961_v51  ;;  %v1180_v63 = vmul.f32 %v1964_v56, %v1962_v54 }
 0x21a   : >>> { %v1966_v0 = vld [vmem:[%s2362_s26 + $0x8] sm:$0xf]  ;;  %v1172_v1 = vmul.f32 %v1965_v61, %v1962_v54  ;;  %v1178_v2 = vmul.f32 %v1965_v61, %v1961_v51 }
 0x21b   : >>> { %1910 = vst [vmem:[%s2342_s11 + $0x8] sm:$0xf] %v752_v59  ;;  %v1175_v3 = vmul.f32 %v1966_v0, %v1962_v54  ;;  %v1181_v4 = vmul.f32 %v1966_v0, %v1961_v51  ;;  %v1905_v5 = vld [vmem:[%s2366_s16 + $0x8] sm:$0xf]  ;;  %s2387_s11 = smov [#allocation15] }
 0x21c   : >>> { %1912 = vst [vmem:[%s2345_s15 + $0x8] sm:$0xf] %v758_v60  ;;  %v1173_v6 = vsub.f32 %v1171_v57, %v1172_v1  ;;  %v1179_v7 = vadd.f32 %v1178_v2, %v1177_v58  ;;  %v1907_v8 = vld [vmem:[%s739_s17 + $0x8] sm:$0xf]  ;;  %v753_v9 = vmul.f32 %v1905_v5, %v1904_v46  ;;  %v747_v10 = vmul.f32 %v1905_v5, %v1903_v45  ;;  %s2394_s15 = smov [#allocation14] }
 0x21d   : >>> { %v1176_v11 = vsub.f32 %v1174_v62, %v1175_v3  ;;  %v1182_v13 = vadd.f32 %v1181_v4, %v1180_v63  ;;  %v754_v14 = vmul.f32 %v1907_v8, %v1903_v45  ;;  %v748_v15 = vmul.f32 %v1907_v8, %v1904_v46 }
 0x21e   : >>> { %1967 = vst [vmem:[%s2349_s14 + $0x8] sm:$0xf] %v1173_v6  ;;  %s2376_s14 = smov %s2222_s14 }
 0x21f   : >>> { %1968 = vst [vmem:[%s2353_s24 + $0x8] sm:$0xf] %v1176_v11  ;;  %v755_v17 = vadd.f32 %v754_v14, %v753_v9  ;;  %v749_v18 = vsub.f32 %v747_v10, %v748_v15  ;;  %s2383_s24 = smov %s2237_s24 }
 0x220   : >>> { %1969 = vst [vmem:[%s2358_s25 + $0x8] sm:$0xf] %v1179_v7  ;;  %s2380_s25 = smov %s2242_s25 }
 0x221   : >>> { %1970 = vst [vmem:[%s2362_s26 + $0x8] sm:$0xf] %v1182_v13  ;;  %s2419_s26 = smov %s2248_s26 }
 0x222   : >>> { %1911 = vst [vmem:[%s739_s17 + $0x8] sm:$0xf] %v755_v17  ;;  %v772_v29 = vld [vmem:[%s2390_s22] sm:$0xff]  ;;  %s797_s17 = smov [#allocation15]  ;;  %v878_v17 = vadd.s32 8, %v868_v12  ;;  %v889_v12 = vmov %v2225_v12 }
 0x223   : >>> { %1909 = vst [vmem:[%s2366_s16 + $0x8] sm:$0xf] %v749_v18  ;;  %v774_v28 = vld [vmem:[%s2387_s11] sm:$0xff]  ;;  %v776_v48 = vmul.f32 %v772_v29, %v2408_v27  ;;  %v779_v53 = vmul.f32 %v772_v29, %v2406_v26  ;;  %s795_s16 = smov [#allocation14]  ;;  %v838_v18 = vadd.s32 8, %v826_v12  ;;  %v848_v12 = vmov %v2225_v12 }
 0x224   : >>> { %v782_v46 = vmul.f32 %v774_v28, %v2408_v27  ;;  %v785_v47 = vmul.f32 %v774_v28, %v2406_v26  ;;  %vm879_vm8 = vcmp.eq.s32.totalorder %v878_v17, %v865_v16  ;;  %v845_v16 = vmov %v2230_v16 }
 0x225   : >>> { %v1189_v19 = vld [vmem:[%s2376_s14] ss:$0 sm:$0xff]  ;;  %v1972_v21 = vld [vmem:[%s2376_s14 + $0x7] ss:$0 sm:$0xff]  ;;  %v1973_v23 = vld [vmem:[%s2376_s14 + $0x7] sm:$0xe]  ;;  %vm839_vm10 = vcmp.eq.s32.totalorder %v838_v18, %v823_v16  ;;  %vm894_vm11 = vcmp.eq.s32.totalorder %v889_v12, %v886_v16  ;;  %vm852_vm13 = vcmp.eq.s32.totalorder %v848_v12, %v845_v16 }
 0x226   : >>> { %v1971_v20 = vld [vmem:[%s2376_s14 - $0x1] sm:$0xfe]  ;;  %v1974_v24 = vld [vmem:[%s2376_s14 + $0xb] ss:$0 sm:$0xff]  ;;  %v1207_v30 = vsel %vm1045_vm3, %v1972_v21, %v1973_v23  ;;  %v1982_v39 = vld [vmem:[%s2383_s24 + $0x7] ss:$0 sm:$0xff] }
 0x227   : >>> { %v1196_v22 = vsel %vm1045_vm3, %v1189_v19, %v1971_v20  ;;  %v1233_v25 = vld [vmem:[%s2383_s24] ss:$0 sm:$0xff]  ;;  %v1977_v32 = vld [vmem:[%s2380_s25 + $0x9] sm:$0x7]  ;;  %v1978_v33 = vld [vmem:[%s2380_s25 + $0x8] ss:$0 sm:$0xff] }
 0x228   : >>> { %1199 = vst [vmem:[%s2376_s14] sm:$0xff] %v1196_v22  ;;  %v1211_v31 = vld [vmem:[%s2380_s25] ss:$0 sm:$0xff]  ;;  %v1220_v34 = vsel %vm1069_vm5, %v1974_v24, %v1977_v32  ;;  %v1980_v35 = vld [vmem:[%s2380_s25 + $0x1] sm:$0x7f]  ;;  %v1983_v40 = vld [vmem:[%s2383_s24 + $0x7] sm:$0xe] }
 0x229   : >>> { %1975 = vst [vmem:[%s2376_s14 + $0x8] sm:$0xf] %v1207_v30  ;;  %v1981_v36 = vld [vmem:[%s2383_s24 - $0x1] sm:$0xfe]  ;;  %v1228_v37 = vsel %vm1077_vm6, %v1978_v33, %v1980_v35  ;;  %v1251_v41 = vsel %vm1045_vm3, %v1982_v39, %v1983_v40  ;;  %v1984_v42 = vld [vmem:[%s2383_s24 + $0xb] ss:$0 sm:$0xff] }
 0x22a   : >>> { %1976 = vst [vmem:[%s2376_s14 + $0x1] sm:$0x1] %v1211_v31  ;;  %v1240_v38 = vsel %vm1045_vm3, %v1233_v25, %v1981_v36  ;;  %v1987_v43 = vld [vmem:[%s2419_s26 + $0x9] sm:$0x7]  ;;  %v1988_v44 = vld [vmem:[%s2419_s26 + $0x8] ss:$0 sm:$0xff] }
 0x22b   : >>> { %1979 = vst [vmem:[%s2380_s25 + $0x8] sm:$0xf] %v1220_v34  ;;  %v1990_v45 = vld [vmem:[%s2419_s26 + $0x1] sm:$0x7f]  ;;  %v1264_v49 = vsel %vm1069_vm5, %v1984_v42, %v1987_v43  ;;  %v1255_v54 = vld [vmem:[%s2419_s26] ss:$0 sm:$0xff] }
 0x22c   : >>> { %1230 = vst [vmem:[%s2380_s25] sm:$0xff] %v1228_v37  ;;  %v1272_v50 = vsel %vm1077_vm6, %v1988_v44, %v1990_v45  ;;  %v773_v51 = vld [vmem:[%s2394_s15] sm:$0xff]  ;;  %v901_v19 = vadd.s32 8, %v889_v12  ;;  %v858_v21 = vadd.s32 8, %v848_v12  ;;  %v343_v12 = vmov (%p468_p9), %v2225_v12 }
 0x22d   : >>> { %1243 = vst [vmem:[%s2383_s24] sm:$0xff] %v1240_v38  ;;  %v771_v52 = vld [vmem:[%s2396_s30] sm:$0xff]  ;;  %v781_v55 = vmul.f32 %v773_v51, %v2406_v26  ;;  %v784_v56 = vmul.f32 %v773_v51, %v2408_v27  ;;  %v372_v12 = vmov (%p468_p9), %v2225_v12 }
 0x22e   : >>> { %1985 = vst [vmem:[%s2383_s24 + $0x8] sm:$0xf] %v1251_v41  ;;  %v775_v57 = vmul.f32 %v771_v52, %v2406_v26  ;;  %v778_v58 = vmul.f32 %v771_v52, %v2408_v27  ;;  %vm902_vm12 = vcmp.eq.s32.totalorder %v901_v19, %v886_v16  ;;  %vm859_vm14 = vcmp.eq.s32.totalorder %v858_v21, %v845_v16 }
 0x22f   : >>> { %1986 = vst [vmem:[%s2383_s24 + $0x1] sm:$0x1] %v1255_v54  ;;  %v783_v59 = vsub.f32 %v781_v55, %v782_v46  ;;  %v786_v60 = vadd.f32 %v785_v47, %v784_v56  ;;  %v340_v16 = vmov (%p468_p9), %v2230_v16 }
 0x230   : >>> { %1989 = vst [vmem:[%s2419_s26 + $0x8] sm:$0xf] %v1264_v49  ;;  %v777_v61 = vsub.f32 %v775_v57, %v776_v48  ;;  %v780_v62 = vadd.f32 %v779_v53, %v778_v58  ;;  %v369_v16 = vmov (%p468_p9), %v2230_v16  ;;  %vm355_vm2 = vcmp.eq.s32.totalorder (%p468_p9), %v343_v12, %v340_v16 }
 0x231   : >>> { %1274 = vst [vmem:[%s2419_s26] sm:$0xff] %v1272_v50  ;;  %v392_v16 = vmov (%p468_p9), %v2230_v16 }
 0x232   : >>> { %789 = vst [vmem:[%s2394_s15] sm:$0xff] %v783_v59  ;;  %s883_s15 = smov [#allocation20] }
 0x233   : >>> { %790 = vst [vmem:[%s2387_s11] sm:$0xff] %v786_v60  ;;  %s820_s11 = smov [#allocation19]  ;;  %v890_v24 = vld [vmem:[%s883_s15] ss:$0 sm:$0xff]  ;;  %s2496_s15 = smov [#allocation15] }
 0x234   : >>> { %787 = vst [vmem:[%s2396_s30] sm:$0xff] %v777_v61  ;;  %s2480_s30 = smov [#allocation15]  ;;  %v827_v20 = vld [vmem:[%s820_s11] ss:$0 sm:$0xff]  ;;  %s2491_s11 = smov [#allocation12] }
 0x235   : >>> { %788 = vst [vmem:[%s2390_s22] sm:$0xff] %v780_v62  ;;  %s862_s22 = smov [#allocation14] }
 0x239   : >>> { %v1915_v63 = vld [vmem:[%s795_s16 + $0x8] sm:$0xf] }
 0x23a   : >>> { %v1916_v0 = vld [vmem:[%s797_s17 + $0x8] sm:$0xf]  ;;  %v809_v1 = vmul.f32 %v1915_v63, %v2406_v26  ;;  %v812_v2 = vmul.f32 %v1915_v63, %v2408_v27 }
 0x23b   : >>> { %v810_v3 = vmul.f32 %v1916_v0, %v2408_v27  ;;  %v813_v4 = vmul.f32 %v1916_v0, %v2406_v26  ;;  %v1913_v5 = vld [vmem:[%s791_s21 + $0x8] sm:$0xf] }
 0x23c   : >>> { %v1914_v6 = vld [vmem:[%s793_s28 + $0x8] sm:$0xf]  ;;  %v803_v7 = vmul.f32 %v1913_v5, %v2406_v26  ;;  %v806_v8 = vmul.f32 %v1913_v5, %v2408_v27 }
 0x23d   : >>> { %v811_v9 = vsub.f32 %v809_v1, %v810_v3  ;;  %v814_v10 = vadd.f32 %v813_v4, %v812_v2  ;;  %v804_v11 = vmul.f32 %v1914_v6, %v2408_v27  ;;  %v807_v13 = vmul.f32 %v1914_v6, %v2406_v26 }
 0x23f   : >>> { %1919 = vst [vmem:[%s795_s16 + $0x8] sm:$0xf] %v811_v9  ;;  %v805_v14 = vsub.f32 %v803_v7, %v804_v11  ;;  %v808_v15 = vadd.f32 %v807_v13, %v806_v8  ;;  %s819_s16 = smov [#allocation12] }
 0x240   : >>> { %1920 = vst [vmem:[%s797_s17 + $0x8] sm:$0xf] %v814_v10  ;;  %s842_s17 = smov [#allocation13] }
 0x241   : >>> { %1917 = vst [vmem:[%s791_s21 + $0x8] sm:$0xf] %v805_v14  ;;  %s2486_s21 = smov [#allocation14] }
 0x242   : >>> { %1918 = vst [vmem:[%s793_s28 + $0x8] sm:$0xf] %v808_v15  ;;  %s2489_s28 = smov [#allocation12] }
 0x246   : >>> { %v869_v22 = vld [vmem:[%s862_s22] sm:$0xff]  ;;  %v1925_v23 = vld [vmem:[%s862_s22 + $0x8] sm:$0xf] }
 0x247   : >>> { %v873_v25 = vsel %vm872_vm7, 0.0, %v869_v22  ;;  %v880_v26 = vsel %vm879_vm8, 0.0, %v1925_v23  ;;  %v891_v27 = vld [vmem:[%s2480_s30] sm:$0xff]  ;;  %v1927_v28 = vld [vmem:[%s2480_s30 + $0x8] sm:$0xf] }
 0x248   : >>> { %874 = vst [vmem:[%s862_s22] sm:$0xff] %v873_v25  ;;  %v828_v29 = vld [vmem:[%s819_s16] sm:$0xff]  ;;  %v1921_v30 = vld [vmem:[%s819_s16 + $0x8] sm:$0xf]  ;;  %v895_v33 = vsel %vm894_vm11, %v890_v24, %v891_v27  ;;  %v903_v36 = vsel %vm902_vm12, %v890_v24, %v1927_v28 }
 0x249   : >>> { %1926 = vst [vmem:[%s862_s22 + $0x8] sm:$0xf] %v880_v26  ;;  %v832_v31 = vsel %vm831_vm9, %v827_v20, %v828_v29  ;;  %v840_v32 = vsel %vm839_vm10, %v827_v20, %v1921_v30  ;;  %v849_v34 = vld [vmem:[%s842_s17] sm:$0xff]  ;;  %v1923_v35 = vld [vmem:[%s842_s17 + $0x8] sm:$0xf]  ;;  %s2111_s22 = smov 1  }
 0x24a   : >>> { %833 = vst [vmem:[%s819_s16] sm:$0xff] %v832_v31  ;;  %v853_v37 = vsel %vm852_vm13, 0.0, %v849_v34  ;;  %v860_v38 = vsel %vm859_vm14, 0.0, %v1923_v35 }
 0x24b   : >>> { %1922 = vst [vmem:[%s819_s16 + $0x8] sm:$0xf] %v840_v32  ;;  %s2498_s16 = smov [#allocation14] }
 0x24c   : >>> { %896 = vst [vmem:[%s2480_s30] sm:$0xff] %v895_v33 }
 0x24d   : >>> { %1928 = vst [vmem:[%s2480_s30 + $0x8] sm:$0xf] %v903_v36  ;;  %s2500_s30 = smov [#allocation13] }
 0x24e   : >>> { %854 = vst [vmem:[%s842_s17] sm:$0xff] %v853_v37 }
 0x24f   : >>> { %1924 = vst [vmem:[%s842_s17 + $0x8] sm:$0xf] %v860_v38  ;;  %s2505_s17 = smov [#allocation15] }
 0x250   : >>> { %v977_v39 = vld [vmem:[%s2486_s21] sm:$0xff]  ;;  %v1937_v43 = vld [vmem:[%s2498_s16 + $0x8] sm:$0xf] }
 0x251   : >>> { %978 = vrot.lane.b32.xlu1 %v977_v39, %s2111_s22  ;;  %v1936_v6 = vld [vmem:[%s2498_s16 + $0x8] sm:$0xf] }
 0x252   : >>> { %v1931_v40 = vld [vmem:[%s2489_s28 + $0x8] sm:$0xf]  ;;  %v911_v41 = vld [vmem:[%s2491_s11] sm:$0xff] }
 0x253   : >>> { %944 = vrot.lane.b32.xlu0 %v1931_v40, %s2111_s22  ;;  %912 = vrot.lane.b32.xlu2 %v911_v41, %s2111_s22  ;;  %v1930_v54 = vld [vmem:[%s2489_s28 + $0x8] sm:$0xf] }
 0x254   : >>> { %v994_v42 = vld [vmem:[%s2496_s15] sm:$0xff]  ;;  %v1935_v45 = vld [vmem:[%s2505_s17 + $0x8] sm:$0xf] }
 0x255   : >>> { %v1938_v48 = vld [vmem:[%s2505_s17 + $0x8] sm:$0xf] }
 0x256   : >>> { %v907_v44 = vld [vmem:[%s2500_s30] sm:$0xff]  ;;  %v1929_v46 = vld [vmem:[%s2508_s0 + $0x8] sm:$0xf] }
 0x257   : >>> { %v1932_v47 = vld [vmem:[%s2508_s0 + $0x8] sm:$0xf] }
 0x259   : >>> { %995 = vrot.lane.b32.xlu1 %v994_v42, %s2112_s27 }
 0x25b   : >>> { %1010 = vrot.lane.b32.xlu0 %v1937_v43, %s2111_s22  ;;  %908 = vrot.lane.b32.xlu2 %v907_v44, %s2111_s22 }
 0x263   : >>> { %1006 = vrot.lane.b32.xlu0 %v1935_v45, %s2111_s22  ;;  %929 = vrot.lane.b32.xlu2 %v907_v44, %s2112_s27 }
 0x26b   : >>> { %940 = vrot.lane.b32.xlu2 %v1929_v46, %s2111_s22 }
 0x273   : >>> { %974 = vrot.lane.b32.xlu2 %v994_v42, %s2111_s22  ;;  %s344_s22 = smov (%p468_p9), [#allocation12] }
 0x27b   : >>> { %961 = vrot.lane.b32.xlu2 %v1932_v47, %s2112_s27 }
 0x283   : >>> { %1027 = vrot.lane.b32.xlu2 %v1938_v48, %s2112_s27  ;;  %s2536_s27 = smov [#allocation12] }
 0x2ad   : >>> { %v913_v49 = vpop.permute.xlu2 %912 }
 0x2ae   : >>> { %v917_v50 = vsel %vm916_vm15, %v911_v41, %v913_v49 }
 0x2b5   : >>> { %v909_v51 = vpop.permute.xlu2 %908 }
 0x2b6   : >>> { %v921_v52 = vsel %vm920_vm0, %v909_v51, %v917_v50 }
 0x2b7   : >>> { %v927_v53 = vsel %vm1717_vm4, %v921_v52, 0.0 }
 0x2b8   : >>> { %967 = vst [vmem:[%s2491_s11] sm:$0xff] %v927_v53  ;;  %s1275_s11 = sadd.s32 (%p468_p9), 1, %s2104_s20  }
 0x2b9   : >> { %p464_p10 = scmp.ge.s32.totalorder (%p468_p9), %s1275_s11, 15  ;;  %s2687_s20 = smov (%p468_p9), %s1275_s11 }
 0x2bd   : >>> { %v930_v55 = vpop.permute.xlu2 %929 }
 0x2be   : >>> { %v934_v56 = vsel %vm933_vm1, %v911_v41, %v930_v55 }
 0x2bf   : >>> { %968 = vst [vmem:[%s2500_s30] sm:$0xff] %v934_v56  ;;  %s419_s30 = smov (%p468_p9), [#allocation15] }
 0x2c3   : >>> { %v979_v57 = vpop.permute.xlu1 %978 }
 0x2c4   : >>> { %v983_v1 = vsel %vm916_vm15, %v977_v39, %v979_v57 }
 0x2c5   : >>> { %v945_v58 = vpop.permute.xlu0 %944  ;;  %v941_v59 = vpop.permute.xlu2 %940 }
 0x2c6   : >>> { %v949_v60 = vsel %vm916_vm15, %v1931_v40, %v945_v58 }
 0x2c7   : >>> { %v953_v61 = vsel %vm920_vm0, %v941_v59, %v949_v60 }
 0x2c8   : >>> { %v959_v62 = vsel %vm1717_vm4, %v953_v61, 0.0  ;;  %v362_v61 = vadd.s32 (%p468_p9), 8, %v343_v12  ;;  %v395_v12 = vmov (%p468_p9), %v2225_v12 }
 0x2c9   : >>> { %1933 = vst [vmem:[%s2489_s28 + $0x8] sm:$0xf] %v959_v62  ;;  %s1038_s28 = smov [#allocation14]  ;;  %v418_v12 = vmov (%p468_p9), %v2225_v12 }
 0x2cb   : >>> { %v996_v63 = vpop.permute.xlu1 %995 }
 0x2cc   : >>> { %v1000_v0 = vsel %vm933_vm1, %v977_v39, %v996_v63 }
 0x2cd   : >>> { %1034 = vst [vmem:[%s2496_s15] sm:$0xff] %v1000_v0  ;;  %v1011_v2 = vpop.permute.xlu0 %1010  ;;  %v975_v3 = vpop.permute.xlu2 %974  ;;  %s373_s15 = smov (%p468_p9), [#allocation13] }
 0x2ce   : >>> { %v987_v4 = vsel %vm920_vm0, %v975_v3, %v983_v1  ;;  %v1015_v15 = vsel %vm916_vm15, %v1937_v43, %v1011_v2 }
 0x2cf   : >>> { %v993_v5 = vsel %vm1717_vm4, %v987_v4, 0.0 }
 0x2d0   : >>> { %v1039_v7 = vld [vmem:[%s2536_s27] ss:$0 sm:$0xff]  ;;  %v1942_v9 = vld [vmem:[%s2536_s27 + $0x7] ss:$0 sm:$0xff]  ;;  %1033 = vst [vmem:[%s2486_s21] sm:$0xff] %v993_v5  ;;  %v1943_v11 = vld [vmem:[%s2536_s27 + $0x7] sm:$0xe] }
 0x2d1   : >>> { %v1941_v8 = vld [vmem:[%s2536_s27 - $0x1] sm:$0xfe]  ;;  %v1944_v13 = vld [vmem:[%s2536_s27 + $0xb] ss:$0 sm:$0xff]  ;;  %v1057_v14 = vsel %vm1045_vm3, %v1942_v9, %v1943_v11  ;;  %s1081_s21 = smov [#allocation13] }
 0x2d2   : >>> { %v1046_v10 = vsel %vm1045_vm3, %v1039_v7, %v1941_v8  ;;  %1945 = vst [vmem:[%s2536_s27 + $0x8] sm:$0xf] %v1057_v14  ;;  %v439_v14 = vadd.s32 (%p468_p9), 8, %v418_v12 }
 0x2d3   : >>> { %1049 = vst [vmem:[%s2536_s27] sm:$0xff] %v1046_v10 }
 0x2d5   : >>> { %v1007_v17 = vpop.permute.xlu0 %1006  ;;  %v962_v18 = vpop.permute.xlu2 %961 }
 0x2d6   : >>> { %v1019_v19 = vsel %vm920_vm0, %v1007_v17, %v1015_v15  ;;  %v966_v20 = vsel %vm933_vm1, %v1930_v54, %v962_v18 }
 0x2d7   : >>> { %v1025_v21 = vsel %vm1717_vm4, %v1019_v19, 0.0  ;;  %1934 = vst [vmem:[%s2508_s0 + $0x8] sm:$0xf] %v966_v20  ;;  %s1082_s0 = smov [#allocation15] }
 0x2d8   : >>> { %1939 = vst [vmem:[%s2498_s16 + $0x8] sm:$0xf] %v1025_v21  ;;  %s396_s16 = smov (%p468_p9), [#allocation14] }
 0x2dd   : >>> { %v1028_v22 = vpop.permute.xlu2 %1027 }
 0x2de   : >>> { %v1083_v23 = vld [vmem:[%s1081_s21] ss:$0 sm:$0xff]  ;;  %v1952_v25 = vld [vmem:[%s1081_s21 + $0x7] ss:$0 sm:$0xff]  ;;  %v1953_v27 = vld [vmem:[%s1081_s21 + $0x7] sm:$0xe]  ;;  %v1032_v34 = vsel %vm933_vm1, %v1936_v6, %v1028_v22 }
 0x2df   : >>> { %v1951_v24 = vld [vmem:[%s1081_s21 - $0x1] sm:$0xfe]  ;;  %v1954_v28 = vld [vmem:[%s1081_s21 + $0xb] ss:$0 sm:$0xff]  ;;  %v1101_v30 = vsel %vm1045_vm3, %v1952_v25, %v1953_v27  ;;  %v1948_v32 = vld [vmem:[%s1038_s28 + $0x8] ss:$0 sm:$0xff] }
 0x2e0   : >>> { %v1090_v26 = vsel %vm1045_vm3, %v1083_v23, %v1951_v24  ;;  %v1061_v29 = vld [vmem:[%s1038_s28] ss:$0 sm:$0xff]  ;;  %v1947_v31 = vld [vmem:[%s1038_s28 + $0x9] sm:$0x7]  ;;  %v1950_v33 = vld [vmem:[%s1038_s28 + $0x1] sm:$0x7f]  ;;  %vm363_vm3 = vcmp.eq.s32.totalorder (%p468_p9), %v362_v61, %v340_v16  ;;  %v415_v16 = vmov (%p468_p9), %v2230_v16 }
 0x2e1   : >>> { %1093 = vst [vmem:[%s1081_s21] sm:$0xff] %v1090_v26  ;;  %v1078_v35 = vsel %vm1077_vm6, %v1948_v32, %v1950_v33  ;;  %v1070_v36 = vsel %vm1069_vm5, %v1944_v13, %v1947_v31 }
 0x2e2   : >>> { %1955 = vst [vmem:[%s1081_s21 + $0x8] sm:$0xf] %v1101_v30 }
 0x2e3   : >>> { %1080 = vst [vmem:[%s1038_s28] sm:$0xff] %v1078_v35 }
 0x2e4   : >>> { %1940 = vst [vmem:[%s2505_s17 + $0x8] sm:$0xf] %v1032_v34 }
 0x2e5   : >>> { %1946 = vst [vmem:[%s2536_s27 + $0x1] sm:$0x1] %v1061_v29 }
 0x2e6   : >>> { %1949 = vst [vmem:[%s1038_s28 + $0x8] sm:$0xf] %v1070_v36 }
 0x2ea   : >> { %470 = sbr.rel (!%p468_p9) target bundleno = 263 (0x107), region = 443 }
 0x2eb   : >>> { %v1105_v37 = vld [vmem:[%s1082_s0] ss:$0 sm:$0xff]  ;;  %v1957_v38 = vld [vmem:[%s1082_s0 + $0x9] sm:$0x7]  ;;  %v1958_v39 = vld [vmem:[%s1082_s0 + $0x8] ss:$0 sm:$0xff] }
 0x2ec   : >>> { %1956 = vst [vmem:[%s1081_s21 + $0x1] sm:$0x1] %v1105_v37  ;;  %v1114_v40 = vsel %vm1069_vm5, %v1954_v28, %v1957_v38  ;;  %v1960_v41 = vld [vmem:[%s1082_s0 + $0x1] sm:$0x7f]  ;;  %v1991_v44 = vld [vmem:[%s344_s22 + $0x8] sm:$0xf] (%p468_p9)  ;;  %vm430_vm5 = vcmp.eq.s32.totalorder (%p468_p9), %v418_v12, %v415_v16 }
 0x2ed   : >>> { %1959 = vst [vmem:[%s1082_s0 + $0x8] sm:$0xf] %v1114_v40  ;;  %v1122_v42 = vsel %vm1077_vm6, %v1958_v39, %v1960_v41  ;;  %v350_v43 = vld [vmem:[%s344_s22] sm:$0xff] (%p468_p9)  ;;  %v359_v47 = vsel (%p468_p9), %vm1717_vm4, %v1991_v44, 0.0  ;;  %v1993_v55 = vld [vmem:[%s396_s16 + $0x8] sm:$0xf] (%p468_p9)  ;;  %vm440_vm6 = vcmp.eq.s32.totalorder (%p468_p9), %v439_v14, %v415_v16 }
 0x2ee   : >>> { %1124 = vst [vmem:[%s1082_s0] sm:$0xff] %v1122_v42  ;;  %v351_v46 = vsel (%p468_p9), %vm1717_vm4, %v350_v43, 0.0  ;;  %v402_v50 = vld [vmem:[%s396_s16] sm:$0xff] (%p468_p9)  ;;  %v360_v52 = vmul.f32 (%p468_p9), %v359_v47, %v359_v47  ;;  %v409_v60 = vsel (%p468_p9), %vm1717_vm4, %v1993_v55, 0.0 }
 0x2ef   : >> { %v352_v51 = vmul.f32 %v351_v46, %v351_v46  ;;  %v403_v56 = vsel %vm1717_vm4, %v402_v50, 0.0  ;;  %v410_v4 = vmul.f32 %v409_v60, %v409_v60 }
 0x2f0   : >> { %v404_v63 = vmul.f32 %v403_v56, %v403_v56  ;;  %v364_v5 = vsel %vm363_vm3, 0.0, %v360_v52 }
 0x2f1   : >> { %v366_v57 = vadd.f32 %v360_v52, %v352_v51  ;;  %v356_v1 = vsel %vm355_vm2, 0.0, %v352_v51 }
 0x2f2   : >> { %v365_v7 = vadd.f32 %v364_v5, %v356_v1 }
 0x2f3   : >> { %v379_v45 = vld [vmem:[%s373_s15] sm:$0xff]  ;;  %v1992_v49 = vld [vmem:[%s373_s15 + $0x8] sm:$0xf] }
 0x2f4   : >> { %v380_v48 = vsel %vm1717_vm4, %v379_v45, 0.0  ;;  %v386_v54 = vsel %vm1717_vm4, %v1992_v49, 0.0 }
 0x2f5   : >> { %v381_v53 = vmul.f32 %v380_v48, %v380_v48  ;;  %v387_v58 = vmul.f32 %v386_v54, %v386_v54  ;;  %v425_v59 = vld [vmem:[%s419_s30] sm:$0xff]  ;;  %v1994_v0 = vld [vmem:[%s419_s30 + $0x8] sm:$0xf] }
 0x2f6   : >> { %v426_v2 = vsel %vm1717_vm4, %v425_v59, 0.0  ;;  %v436_v6 = vsel %vm1717_vm4, %v1994_v0, 0.0 }
 0x2f7   : >> { %v383_v62 = vadd.f32 %v381_v53, %v366_v57  ;;  %v427_v9 = vmul.f32 %v426_v2, %v426_v2  ;;  %v382_v10 = vadd.f32 %v381_v53, %v365_v7  ;;  %v437_v13 = vmul.f32 %v436_v6, %v436_v6 }
 0x2f9   : >> { %v389_v3 = vadd.f32 %v387_v58, %v383_v62  ;;  %v388_v15 = vadd.f32 %v387_v58, %v382_v10  ;;  %v431_v20 = vsel %vm430_vm5, 0.0, %v427_v9  ;;  %v441_v23 = vsel %vm440_vm6, 0.0, %v437_v13 }
 0x2fb   : >> { %v406_v8 = vadd.f32 %v404_v63, %v389_v3  ;;  %v405_v18 = vadd.f32 %v404_v63, %v388_v15 }
 0x2fd   : >> { %v412_v11 = vadd.f32 %v410_v4, %v406_v8  ;;  %v411_v21 = vadd.f32 %v410_v4, %v405_v18 }
 0x2ff   : >> { %v433_v17 = vadd.f32 %v427_v9, %v412_v11  ;;  %v432_v22 = vadd.f32 %v431_v20, %v411_v21 }
 0x301   : >> { %v443_v19 = vadd.f32 %v437_v13, %v433_v17  ;;  %v442_v24 = vadd.f32 %v441_v23, %v432_v22 }
 0x303   : >> { %444 = vadd.xlane.f32.xlu0 %v443_v19 }
 0x30b   : >> { %452 = vadd.xlane.f32.xlu0 %v442_v24 }
 0x376   : >> { %v445_v25 = vpop.xlane.xlu0 %444 }
 0x377   : >> { %v446_v26 = vrot.slane %v445_v25, 4 }
 0x379   : >> { %v447_v27 = vadd.f32 %v446_v26, %v445_v25 }
 0x37b   : >> { %v448_v28 = vrot.slane %v447_v27, 2 }
 0x37d   : >> { %v449_v32 = vadd.f32 %v448_v28, %v447_v27 }
 0x37e   : >> { %v453_v29 = vpop.xlane.xlu0 %452 }
 0x37f   : >> { %v454_v30 = vrot.slane %v453_v29, 4  ;;  %v450_v35 = vrot.slane %v449_v32, 1 }
 0x381   : >> { %v455_v31 = vadd.f32 %v454_v30, %v453_v29  ;;  %v451_v38 = vadd.f32 %v450_v35, %v449_v32 }
 0x383   : >> { %v456_v33 = vrot.slane %v455_v31, 2 }
 0x385   : >> { %v457_v34 = vadd.f32 %v456_v33, %v455_v31 }
 0x387   : >> { %v458_v36 = vrot.slane %v457_v34, 1 }
 0x389   : >> { %v459_v37 = vadd.f32 %v458_v36, %v457_v34 }
 0x38b   : >> { %2015 = vpush %v459_v37 }
 0x38c   : >> { %2017 = vpush %v451_v38 }
 0x3bc   : >> { %s2016_s23 = spop %2015 }
 0x3bd   : >> { %s2018_s17 = spop %2017 }
 0x3be   : >> { %s462_s27 = smul.f32 1e-10, %s2018_s17 }
 0x3c0   : >> { %p463_p11 = scmp.le.f32.partialorder %s2016_s23, %s462_s27 }
 0x3c2   : >> { %p465_p12 = por %p464_p10, %p463_p11 }
 0x3c4   : > { %1277 = sbr.rel (!%p465_p12) target bundleno = 262 (0x106), region = 454 }
 0x3c9 PF: > { %s1282_s21 = smov [#allocation12]  ;;  %v1286_v16 = vmov %v2230_v16  ;;  %v1289_v12 = vmov %v2225_v12  ;;  %s1308_s20 = smov [#allocation15] }
 0x3ca   : > { %v1312_v16 = vmov %v2230_v16  ;;  %v1315_v12 = vmov %v2225_v12  ;;  %v1290_v39 = vld [vmem:[%s1282_s21] sm:$0xff]  ;;  %vm1293_vm7 = vcmp.eq.s32.totalorder %v1289_v12, %v1286_v16  ;;  %v1995_v40 = vld [vmem:[%s1282_s21 + $0x8] sm:$0xf]  ;;  %v1298_v41 = vadd.s32 8, %v1289_v12  ;;  %s1278_s28 = sand.u32 7, %s2179_s12   ;;  %s2688_s22 = scalar_lea.vmem [#allocation5], %s2218_s29 }
 0x3cb   : > { %vm1319_vm8 = vcmp.eq.s32.totalorder %v1315_v12, %v1312_v16  ;;  %v1294_v42 = vsel %vm1293_vm7, %v1290_v39, 0.0  ;;  %v1324_v43 = vadd.s32 8, %v1315_v12  ;;  %v1316_v44 = vld [vmem:[%s1308_s20] sm:$0xff]  ;;  %v1996_v45 = vld [vmem:[%s1308_s20 + $0x8] sm:$0xf]  ;;  %s1279_s0 = scalar_lea.vmem [#allocation4], %s1278_s28 }
 0x3cc   : > { %vm1299_vm9 = vcmp.eq.s32.totalorder %v1298_v41, %v1286_v16  ;;  %v1320_v47 = vsel %vm1319_vm8, %v1316_v44, 0.0  ;;  %s1283_s0 = smov %s1279_s0  ;;  %s1281_s11 = scalar_lea.vmem [#allocation6], %s1278_s28 }
 0x3cd   : > { %v1300_v46 = vsel %vm1299_vm9, %v1995_v40, %v1294_v42  ;;  %vm1325_vm4 = vcmp.eq.s32.totalorder %v1324_v43, %v1312_v16  ;;  %s1309_s11 = smov %s1281_s11  ;;  %s2689_s15 = scalar_lea.vmem [#allocation7], %s2218_s29 }
 0x3ce   : > { %v1301_v48 = vrot.slane %v1300_v46, 4  ;;  %v1326_v49 = vsel %vm1325_vm4, %v1996_v45, %v1320_v47  ;;  %s1373_s16 = sshrl.u32 (%p2193_p3), %s2179_s12, 3  ;;  %s2690_s30 = scalar_lea.vmem (%p2193_p3), [#allocation5], %s2218_s29 }
 0x3cf   : > { %v1327_v50 = vrot.slane %v1326_v49, 4  ;;  %s2003_s23 = sshll.u32 (%p2193_p3), %s1373_s16, 1 }
 0x3d0   : > { %v1302_v51 = vadd.f32 %v1301_v48, %v1300_v46  ;;  %s1375_s21 = scalar_lea.vmem (%p2193_p3), %s2678_s4, %s2003_s23 }
 0x3d1   : > { %v1328_v52 = vadd.f32 %v1327_v50, %v1326_v49 }
 0x3d2   : > { %v1303_v53 = vrot.slane %v1302_v51, 2 }
 0x3d3   : > { %v1329_v54 = vrot.slane %v1328_v52, 2 }
 0x3d4   : > { %v1304_v55 = vadd.f32 %v1303_v53, %v1302_v51 }
 0x3d5   : > { %v1330_v56 = vadd.f32 %v1329_v54, %v1328_v52 }
 0x3d6   : > { %v1305_v57 = vrot.slane %v1304_v55, 1 }
 0x3d7   : > { %v1331_v12 = vrot.slane %v1330_v56, 1 }
 0x3d8   : > { %v1306_v58 = vadd.f32 %v1305_v57, %v1304_v55 }
 0x3d9   : > { %v1332_v16 = vadd.f32 %v1331_v12, %v1330_v56 }
 0x3da   : > { %1307 = vst [vmem:[%s1283_s0] sm:$0x1] %v1306_v58 }
 0x3db   : > { %1333 = vst [vmem:[%s1309_s11] sm:$0x1] %v1332_v16 }
 0x3df   : > { %1372 = sbr.rel (!%p2193_p3) target bundleno = 1003 (0x3eb), region = 114 }
 0x3e1   : > { %v1336_v59 = vld [vmem:[#allocation4] sm:$0x3] }
 0x3e2   : > { %1339 = vst [vmem:[%s2688_s22] sm:$0x3] %v1336_v59  ;;  %v1342_v60 = vld [vmem:[#allocation6] sm:$0x3] }
 0x3e3   : > { %1345 = vst [vmem:[%s2689_s15] sm:$0x3] %v1342_v60 }
 0x3e9   : > { %v1392_v61 = vld [vmem:[%s2690_s30] sm:$0x3] }
 0x3ea   : > { %1393 = vst [vmem:[%s1375_s21] sm:$0x3] %v1392_v61 }
 0x3eb PF: > { %1411 = sbr.rel (!%p2193_p3) target bundleno = 1011 (0x3f3), region = 148  ;;  %s1412_s20 = sshrl.u32 (%p2193_p3), %s2179_s12, 3 }
 0x3ec   : > { %s2691_s28 = scalar_lea.vmem (%p2193_p3), [#allocation7], %s2218_s29  ;;  %s2004_s0 = sshll.u32 (%p2193_p3), %s1412_s20, 1 }
 0x3ed   : > { %s1414_s15 = scalar_lea.vmem (%p2193_p3), %s2679_s5, %s2004_s0 }
 0x3f1   : > { %v1431_v62 = vld [vmem:[%s2691_s28] sm:$0x3] }
 0x3f2   : > { %1432 = vst [vmem:[%s1414_s15] sm:$0x3] %v1431_v62 }
 0x3f3 PF: > { %s2005_s19 = sshll.u32 %s2179_s12, 4  ;;  %v1462_v63 = vld [vmem:[%s2222_s14] sm:$0xff]  ;;  %v1464_v0 = vld [vmem:[%s2222_s14 + $0x8] sm:$0xff] }
 0x3f4   : > { %s1449_s30 = scalar_lea.vmem %s2680_s6, %s2005_s19  ;;  %s1470_s27 = scalar_lea.vmem %s2681_s7, %s2005_s19  ;;  %v1483_v1 = vld [vmem:[%s2237_s24] sm:$0xff]  ;;  %v1485_v2 = vld [vmem:[%s2237_s24 + $0x8] sm:$0xff] }
 0x3f5   : > { %1463 = vst [vmem:[%s1449_s30] sm:$0xff] %v1462_v63  ;;  %s1491_s28 = scalar_lea.vmem %s2682_s8, %s2005_s19  ;;  %v1504_v3 = vld [vmem:[%s2242_s25] sm:$0xff]  ;;  %v1506_v4 = vld [vmem:[%s2242_s25 + $0x8] sm:$0xff]  ;;  %s1512_s0 = scalar_lea.vmem %s2683_s9, %s2005_s19 }
 0x3f6   : > { %1465 = vst [vmem:[%s1449_s30 + $0x8] sm:$0xff] %v1464_v0  ;;  %v1525_v5 = vld [vmem:[%s2248_s26] sm:$0xff]  ;;  %v1527_v6 = vld [vmem:[%s2248_s26 + $0x8] sm:$0xff] }
 0x3f7   : > { %1484 = vst [vmem:[%s1470_s27] sm:$0xff] %v1483_v1 }
 0x3f8   : > { %1486 = vst [vmem:[%s1470_s27 + $0x8] sm:$0xff] %v1485_v2 }
 0x3f9   : > { %1505 = vst [vmem:[%s1491_s28] sm:$0xff] %v1504_v3 }
 0x3fa   : > { %1507 = vst [vmem:[%s1491_s28 + $0x8] sm:$0xff] %v1506_v4 }
 0x3fb   : > { %1526 = vst [vmem:[%s1512_s0] sm:$0xff] %v1525_v5 }
 0x3fc   : > { %1528 = vst [vmem:[%s1512_s0 + $0x8] sm:$0xff] %v1527_v6 }
 0x3fd PF: > { %p13_p13 = scmp.ge.s32.totalorder %s2182_s13, 4   ;;  %s2692_s30 = smov %s2096_s10 }
 0x3fe   : > { %s2693_s10 = smov %s2191_s18  ;;  %s2694_s11 = smov %s2182_s13 }
 0x3ff   :  { %15 = sbr.rel (!%p13_p13) target bundleno = 4 (0x4), region = 465 }

// kernel: spdnet_forward.5
= control target key start
LH: loop header
LB: loop body
LE: loop exit
PB: predicated region body
PF: predicated region fallthrough
CT: control target
= control target key end

     0   :  { %vm23_vm0 = vcmask 392192   ;;  %vm59_vm1 = vcmask 785408   ;;  %s236_s4 = smov 80   ;;  %vm127_vm2 = vcmask 195584   ;;  %s237_s9 = smov 24   ;;  %vm205_vm3 = vcmask 392384   ;;  %s327_s0 = inlined_call_operand.vmem [shape: f32[48,96], index: 0, kind: input, shape index: {}]   ;;  %s328_s2 = inlined_call_operand.vmem [shape: f32[24,48], index: 2, kind: input, shape index: {}]   ;;  %s329_s1 = inlined_call_operand.vmem [shape: f32[1,96], index: 1, kind: input, shape index: {}]   ;;  %s330_s3 = inlined_call_operand.vmem [shape: f32[24,48], index: 3, kind: output, shape index: {}]  }
   0x1   :  { %v22_v0 = vld [vmem:[%s327_s0 + $0x28] sm:$0xff]  ;;  %v21_v1 = vld [vmem:[%s327_s0 + $0x20] sm:$0xff]  ;;  %v20_v2 = vld [vmem:[%s327_s0 + $0x18] sm:$0xff] }
   0x2   :  { %228 = vmatpush.msra.mxu3 %v22_v0  ;;  %43 = vmatpush.msra.mxu0 %v22_v0  ;;  %v19_v3 = vld [vmem:[%s327_s0 + $0x10] sm:$0xff]  ;;  %v18_v4 = vld [vmem:[%s327_s0 + $0x8] sm:$0xff]  ;;  %v17_v5 = vld [vmem:[%s327_s0] sm:$0xff] }
   0x3   :  { %v15_v6 = vld [vmem:[%s328_s2 + $0x8] sm:$0xff]  ;;  %v14_v7 = vld [vmem:[%s328_s2] sm:$0xff]  ;;  %v16_v8 = vld [vmem:[%s328_s2 + $0x10] sm:$0xff] }
   0x4   :  { %229 = vmatpush.msra.mxu3 %v21_v1  ;;  %44 = vmatpush.msra.mxu0 %v21_v1  ;;  %v66_v9 = vld [vmem:[%s329_s1] sm:$0x1] }
   0x5   :  { %v67_v11 = vmax.f32 %v66_v9, 0.0001 }
   0x6   :  { %230 = vmatpush.msra.mxu3 %v20_v2  ;;  %45 = vmatpush.msra.mxu0 %v20_v2 }
   0x7   :  { %v69_v13 = vperm.slane %v67_v11, 0 }
   0x8   :  { %231 = vmatpush.msra.mxu3 %v19_v3  ;;  %46 = vmatpush.msra.mxu0 %v19_v3 }
   0xa   :  { %232 = vmatpush.msra.mxu3 %v18_v4  ;;  %47 = vmatpush.msra.mxu0 %v18_v4 }
   0xc   :  { %233 = vmatpush.msra.mxu3 %v17_v5  ;;  %48 = vmatpush.msra.mxu0 %v17_v5 }
   0xd   :  { %214 = vmatmul.msk.f32.vlgmr.msra.gmra.mxu3 %vm23_vm0, %v15_v6  ;;  %213 = vmatmul.msk.f32.vlgmr.msra.gmra.mxu0 %vm23_vm0, %v14_v7 }
  0x15   :  { %215 = vmatmul.msk.f32.gmra.mxu3 %vm23_vm0, %v16_v8 }
  0x8a   :  { %v50_v10 = vpop.f32.mrf.mxu0 }
  0x8b   :  { %60 = vst.msk [vmem:[#allocation2] sm:$0xff] %vm59_vm1, %v50_v10 }
  0x90   :  { %v53_v12 = vpop.f32.mrf.mxu3 }
  0x91   :  { %61 = vst.msk [vmem:[#allocation2 + $0x8] sm:$0xff] %vm59_vm1, %v53_v12 }
  0x92   :  { %v63_v14 = vld [vmem:[#allocation2] sm:$0xff] }
  0x93   :  { %v71_v15 = vmul.f32 %v69_v13, %v63_v14  ;;  %149 = vrot.lane.b32.xlu1 %v63_v14, %s236_s4 }
  0x95   :  { %74 = vst.msk [vmem:[#allocation3] sm:$0xff] %vm59_vm1, %v71_v15 }
  0x98   :  { %v64_v16 = vld [vmem:[#allocation2 + $0x8] sm:$0xff]  ;;  %v56_v17 = vpop.f32.mrf.mxu3 }
  0x99   :  { %v72_v18 = vmul.f32 %v69_v13, %v64_v16  ;;  %62 = vst.msk [vmem:[#allocation2 + $0x10] sm:$0xff] %vm59_vm1, %v56_v17 }
  0x9b   :  { %75 = vst.msk [vmem:[#allocation3 + $0x8] sm:$0xff] %vm59_vm1, %v72_v18 }
  0x9c   :  { %v77_v19 = vld [vmem:[#allocation3] sm:$0xff] }
  0x9d   :  { %140 = vrot.lane.b32.xlu1 %v77_v19, %s236_s4 }
  0xa0   :  { %v65_v20 = vld [vmem:[#allocation2 + $0x10] sm:$0xff] }
  0xa1   :  { %v73_v21 = vmul.f32 %v69_v13, %v65_v20  ;;  %153 = vrot.lane.b32.xlu0 %v65_v20, %s236_s4  ;;  %216 = vmatpush.xpose.msk.msra.mxu1 %vm23_vm0, %v65_v20 }
  0xa2   :  { %v132_v22 = vld [vmem:[#allocation3 + $0x8] sm:$0xff] }
  0xa3   :  { %76 = vst.msk [vmem:[#allocation3 + $0x10] sm:$0xff] %vm59_vm1, %v73_v21  ;;  %142 = vrot.lane.b32.xlu2 %v132_v22, %s236_s4 }
  0xa5   :  { %217 = vmatpush.xpose.msk.msra.mxu1 %vm23_vm0, %v64_v16 }
  0xa9   :  { %151 = vrot.lane.b32.xlu0 %v64_v16, %s236_s4  ;;  %218 = vmatpush.xpose.msk.msra.mxu1 %vm23_vm0, %v63_v14 }
  0xaa   :  { %v133_v23 = vld [vmem:[#allocation3 + $0x10] sm:$0xff] }
  0xab   :  { %144 = vrot.lane.b32.xlu2 %v133_v23, %s236_s4 }
  0xac   :  { %219 = vmatmul.msk.f32.vlgmr.msra.gmra.mxu1 %vm23_vm0, %v77_v19 }
  0xb4   :  { %220 = vmatmul.msk.f32.gmra.mxu1 %vm23_vm0, %v132_v22 }
  0xbc   :  { %221 = vmatmul.msk.f32.gmra.mxu1 %vm23_vm0, %v133_v23 }
  0xfd   :  { %v143_v28 = vpop.permute.xlu2 %142 }
 0x105   :  { %v150_v25 = vpop.permute.xlu1 %149  ;;  %v145_v31 = vpop.permute.xlu2 %144 }
 0x10f   :  { %v141_v27 = vpop.permute.xlu1 %140 }
 0x113   :  { %v154_v24 = vpop.permute.xlu0 %153 }
 0x114   :  { %222 = vmatpush.xpose.msk.msra.mxu2 %vm23_vm0, %v154_v24 }
 0x11b   :  { %v152_v26 = vpop.permute.xlu0 %151 }
 0x11c   :  { %223 = vmatpush.xpose.msk.msra.mxu2 %vm23_vm0, %v152_v26 }
 0x120   :  { %224 = vmatpush.xpose.msk.msra.mxu2 %vm23_vm0, %v150_v25 }
 0x123   :  { %225 = vmatmul.msk.f32.vlgmr.msra.gmra.mxu2 %vm23_vm0, %v141_v27 }
 0x129   :  { %v118_v29 = vpop.f32.mrf.mxu1 }
 0x12a   :  { %128 = vst.msk [vmem:[%s330_s3] sm:$0xff] %vm127_vm2, %v118_v29 }
 0x12b   :  { %226 = vmatmul.msk.f32.gmra.mxu2 %vm23_vm0, %v143_v28 }
 0x131   :  { %v121_v30 = vpop.f32.mrf.mxu1 }
 0x132   :  { %129 = vst.msk [vmem:[%s330_s3 + $0x8] sm:$0xff] %vm127_vm2, %v121_v30 }
 0x133   :  { %227 = vmatmul.msk.f32.gmra.mxu2 %vm23_vm0, %v145_v31 }
 0x139   :  { %v124_v32 = vpop.f32.mrf.mxu1 }
 0x13a   :  { %130 = vst.msk [vmem:[%s330_s3 + $0x10] sm:$0xff] %vm127_vm2, %v124_v32 }
 0x1a6   :  { %v184_v33 = vpop.f32.mrf.mxu2 }
 0x1a7   :  { %196 = vrot.lane.b32.xlu0 %v184_v33, %s237_s9 }
 0x1ae   :  { %v187_v34 = vpop.f32.mrf.mxu2 }
 0x1af   :  { %198 = vrot.lane.b32.xlu1 %v187_v34, %s237_s9 }
 0x1b6   :  { %v190_v35 = vpop.f32.mrf.mxu2 }
 0x1b7   :  { %200 = vrot.lane.b32.xlu2 %v190_v35, %s237_s9 }
 0x211   :  { %v201_v36 = vpop.permute.xlu2 %200 }
 0x212   :  { %208 = vst.msk [vmem:[%s330_s3 + $0x10] sm:$0xff] %vm205_vm3, %v201_v36 }
 0x219   :  { %v197_v37 = vpop.permute.xlu0 %196 }
 0x21a   :  { %206 = vst.msk [vmem:[%s330_s3] sm:$0xff] %vm205_vm3, %v197_v37 }
 0x221   :  { %v199_v38 = vpop.permute.xlu1 %198 }
 0x222   :  { %207 = vst.msk [vmem:[%s330_s3 + $0x8] sm:$0xff] %vm205_vm3, %v199_v38 }

// kernel: spdnet_forward.6
= control target key start
LH: loop header
LB: loop body
LE: loop exit
PB: predicated region body
PF: predicated region fallthrough
CT: control target
= control target key end

     0   :  { %vm24_vm0 = vcmask 195584   ;;  %s249_s0 = inlined_call_operand.vmem [shape: f32[2,24,24], index: 0, kind: input, shape index: {}]   ;;  %s250_s1 = inlined_call_operand.vmem [shape: f32[2,1,24], index: 1, kind: input, shape index: {}]   ;;  %s251_s2 = inlined_call_operand.vmem [shape: f32[2,24,24], index: 2, kind: output, shape index: {}]  }
   0x1   :  { %v13_v0 = vld [vmem:[%s249_s0 + $0x10] sm:$0xff]  ;;  %v147_v1 = vld [vmem:[%s249_s0 + $0x28] sm:$0xff]  ;;  %v146_v3 = vld [vmem:[%s249_s0 + $0x20] sm:$0xff] }
   0x2   :  { %158 = vmatpush.xpose.msk.msra.mxu2 %vm24_vm0, %v13_v0  ;;  %161 = vmatpush.xpose.msk.msra.mxu3 %vm24_vm0, %v147_v1  ;;  %v12_v2 = vld [vmem:[%s249_s0 + $0x8] sm:$0xff]  ;;  %v14_v4 = vld [vmem:[%s250_s1] sm:$0x1]  ;;  %v148_v5 = vld [vmem:[%s250_s1 + $0x1] sm:$0x1] }
   0x3   :  { %139 = vmatpush.xpose.msk.msra.mxu0 %vm24_vm0, %v13_v0  ;;  %149 = vmatpush.xpose.msk.msra.mxu1 %vm24_vm0, %v147_v1  ;;  %v15_v6 = vmax.f32 %v14_v4, 0.0001  ;;  %v78_v7 = vmax.f32 %v148_v5, 0.0001  ;;  %v11_v8 = vld [vmem:[%s249_s0] sm:$0xff]  ;;  %v145_v9 = vld [vmem:[%s249_s0 + $0x18] sm:$0xff] }
   0x5   :  { %164 = vlog2.f32 %v15_v6 }
   0x6   :  { %159 = vmatpush.xpose.msk.msra.mxu2 %vm24_vm0, %v12_v2  ;;  %162 = vmatpush.xpose.msk.msra.mxu3 %vm24_vm0, %v146_v3  ;;  %166 = vlog2.f32 %v78_v7 }
   0x7   :  { %140 = vmatpush.xpose.msk.msra.mxu0 %vm24_vm0, %v12_v2  ;;  %150 = vmatpush.xpose.msk.msra.mxu1 %vm24_vm0, %v146_v3 }
   0xa   :  { %160 = vmatpush.xpose.msk.msra.mxu2 %vm24_vm0, %v11_v8  ;;  %163 = vmatpush.xpose.msk.msra.mxu3 %vm24_vm0, %v145_v9 }
   0xb   :  { %141 = vmatpush.xpose.msk.msra.mxu0 %vm24_vm0, %v11_v8  ;;  %151 = vmatpush.xpose.msk.msra.mxu1 %vm24_vm0, %v145_v9  ;;  %v165_v10 = vpop.eup %164 }
   0xc   :  { %v167_v11 = vpop.eup %166  ;;  %v17_v12 = vmul.f32 0.6931472, %v165_v10 }
   0xd   :  { %v80_v13 = vmul.f32 0.6931472, %v167_v11 }
   0xe   :  { %v19_v14 = vperm.slane %v17_v12, 0 }
   0xf   :  { %v82_v15 = vperm.slane %v80_v13, 0 }
  0x10   :  { %v22_v16 = vmul.f32 %v19_v14, %v12_v2  ;;  %v21_v17 = vmul.f32 %v19_v14, %v11_v8  ;;  %v23_v20 = vmul.f32 %v19_v14, %v13_v0 }
  0x11   :  { %v85_v18 = vmul.f32 %v146_v3, %v82_v15  ;;  %v84_v19 = vmul.f32 %v145_v9, %v82_v15  ;;  %v86_v21 = vmul.f32 %v147_v1, %v82_v15 }
  0x12   :  { %143 = vmatmul.msk.f32.vlgmr.msra.gmra.mxu2 %vm24_vm0, %v22_v16  ;;  %142 = vmatmul.msk.f32.vlgmr.msra.gmra.mxu0 %vm24_vm0, %v21_v17 }
  0x13   :  { %153 = vmatmul.msk.f32.vlgmr.msra.gmra.mxu3 %vm24_vm0, %v85_v18  ;;  %152 = vmatmul.msk.f32.vlgmr.msra.gmra.mxu1 %vm24_vm0, %v84_v19 }
  0x1a   :  { %144 = vmatmul.msk.f32.gmra.mxu2 %vm24_vm0, %v23_v20 }
  0x1b   :  { %154 = vmatmul.msk.f32.gmra.mxu3 %vm24_vm0, %v86_v21 }
  0x8f   :  { %v60_v22 = vpop.f32.mrf.mxu0 }
  0x90   :  { %69 = vst.msk [vmem:[%s251_s2] sm:$0xff] %vm24_vm0, %v60_v22  ;;  %v122_v23 = vpop.f32.mrf.mxu1 }
  0x91   :  { %155 = vst.msk [vmem:[%s251_s2 + $0x18] sm:$0xff] %vm24_vm0, %v122_v23 }
  0x95   :  { %v63_v24 = vpop.f32.mrf.mxu2 }
  0x96   :  { %70 = vst.msk [vmem:[%s251_s2 + $0x8] sm:$0xff] %vm24_vm0, %v63_v24  ;;  %v125_v25 = vpop.f32.mrf.mxu3 }
  0x97   :  { %156 = vst.msk [vmem:[%s251_s2 + $0x20] sm:$0xff] %vm24_vm0, %v125_v25 }
  0x9d   :  { %v66_v26 = vpop.f32.mrf.mxu2 }
  0x9e   :  { %71 = vst.msk [vmem:[%s251_s2 + $0x10] sm:$0xff] %vm24_vm0, %v66_v26  ;;  %v128_v27 = vpop.f32.mrf.mxu3 }
  0x9f   :  { %157 = vst.msk [vmem:[%s251_s2 + $0x28] sm:$0xff] %vm24_vm0, %v128_v27 }

// kernel: spdnet_forward.7
= control target key start
LH: loop header
LB: loop body
LE: loop exit
PB: predicated region body
PF: predicated region fallthrough
CT: control target
= control target key end

     0   :  { %s653_s0 = inlined_call_operand.vmem [shape: f32[2,576], index: 0, kind: input, shape index: {}]   ;;  %s654_s1 = inlined_call_operand.vmem [shape: f32[576,64], index: 1, kind: input, shape index: {}]   ;;  %s655_s2 = inlined_call_operand.vmem [shape: f32[1,64], index: 2, kind: input, shape index: {}]   ;;  %s656_s3 = inlined_call_operand.vmem [shape: f32[64,32], index: 3, kind: input, shape index: {}]   ;;  %s657_s4 = inlined_call_operand.vmem [shape: f32[1,32], index: 4, kind: input, shape index: {}]   ;;  %s658_s5 = inlined_call_operand.vmem [shape: f32[32,2], index: 5, kind: input, shape index: {}]   ;;  %s659_s6 = inlined_call_operand.vmem [shape: f32[1,2], index: 6, kind: input, shape index: {}]   ;;  %s660_s7 = inlined_call_operand.hbm [shape: f32[2,2], index: 7, kind: output, shape index: {}]  }
   0x1   :  { %v44_v0 = vld [vmem:[%s654_s1 + $0x78] sm:$0xff]  ;;  %v43_v1 = vld [vmem:[%s654_s1 + $0x70] sm:$0xff]  ;;  %v42_v4 = vld [vmem:[%s654_s1 + $0x68] sm:$0xff] }
   0x2   :  { %122 = vmatpush.msra.mxu0 %v44_v0  ;;  %v76_v2 = vld [vmem:[%s654_s1 + $0x178] sm:$0xff]  ;;  %v75_v3 = vld [vmem:[%s654_s1 + $0x170] sm:$0xff]  ;;  %v74_v7 = vld [vmem:[%s654_s1 + $0x168] sm:$0xff] }
   0x3   :  { %162 = vmatpush.msra.mxu2 %v76_v2  ;;  %v92_v5 = vld [vmem:[%s654_s1 + $0x1f8] sm:$0xff]  ;;  %v91_v8 = vld [vmem:[%s654_s1 + $0x1f0] sm:$0xff]  ;;  %v41_v9 = vld [vmem:[%s654_s1 + $0x60] sm:$0xff] }
   0x4   :  { %v60_v6 = vld [vmem:[%s654_s1 + $0xf8] sm:$0xff]  ;;  %123 = vmatpush.msra.mxu0 %v43_v1  ;;  %182 = vmatpush.msra.mxu3 %v92_v5  ;;  %v59_v10 = vld [vmem:[%s654_s1 + $0xf0] sm:$0xff]  ;;  %v90_v11 = vld [vmem:[%s654_s1 + $0x1e8] sm:$0xff] }
   0x5   :  { %163 = vmatpush.msra.mxu2 %v75_v3  ;;  %142 = vmatpush.msra.mxu1 %v60_v6  ;;  %v73_v12 = vld [vmem:[%s654_s1 + $0x160] sm:$0xff]  ;;  %v58_v13 = vld [vmem:[%s654_s1 + $0xe8] sm:$0xff]  ;;  %v40_v14 = vld [vmem:[%s654_s1 + $0x58] sm:$0xff] }
   0x6   :  { %124 = vmatpush.msra.mxu0 %v42_v4  ;;  %183 = vmatpush.msra.mxu3 %v91_v8  ;;  %v89_v15 = vld [vmem:[%s654_s1 + $0x1e0] sm:$0xff]  ;;  %v72_v16 = vld [vmem:[%s654_s1 + $0x158] sm:$0xff]  ;;  %v39_v18 = vld [vmem:[%s654_s1 + $0x50] sm:$0xff] }
   0x7   :  { %164 = vmatpush.msra.mxu2 %v74_v7  ;;  %143 = vmatpush.msra.mxu1 %v59_v10  ;;  %v57_v17 = vld [vmem:[%s654_s1 + $0xe0] sm:$0xff]  ;;  %v88_v19 = vld [vmem:[%s654_s1 + $0x1d8] sm:$0xff]  ;;  %v71_v20 = vld [vmem:[%s654_s1 + $0x150] sm:$0xff] }
   0x8   :  { %125 = vmatpush.msra.mxu0 %v41_v9  ;;  %184 = vmatpush.msra.mxu3 %v90_v11  ;;  %v56_v21 = vld [vmem:[%s654_s1 + $0xd8] sm:$0xff]  ;;  %v38_v22 = vld [vmem:[%s654_s1 + $0x48] sm:$0xff]  ;;  %v87_v23 = vld [vmem:[%s654_s1 + $0x1d0] sm:$0xff] }
   0x9   :  { %165 = vmatpush.msra.mxu2 %v73_v12  ;;  %144 = vmatpush.msra.mxu1 %v58_v13  ;;  %v70_v24 = vld [vmem:[%s654_s1 + $0x148] sm:$0xff]  ;;  %v55_v25 = vld [vmem:[%s654_s1 + $0xd0] sm:$0xff]  ;;  %v37_v26 = vld [vmem:[%s654_s1 + $0x40] sm:$0xff] }
   0xa   :  { %126 = vmatpush.msra.mxu0 %v40_v14  ;;  %185 = vmatpush.msra.mxu3 %v89_v15  ;;  %v86_v27 = vld [vmem:[%s654_s1 + $0x1c8] sm:$0xff]  ;;  %v69_v28 = vld [vmem:[%s654_s1 + $0x140] sm:$0xff]  ;;  %v36_v30 = vld [vmem:[%s654_s1 + $0x38] sm:$0xff] }
   0xb   :  { %166 = vmatpush.msra.mxu2 %v72_v16  ;;  %145 = vmatpush.msra.mxu1 %v57_v17  ;;  %v54_v29 = vld [vmem:[%s654_s1 + $0xc8] sm:$0xff]  ;;  %v85_v31 = vld [vmem:[%s654_s1 + $0x1c0] sm:$0xff]  ;;  %v68_v32 = vld [vmem:[%s654_s1 + $0x138] sm:$0xff] }
   0xc   :  { %127 = vmatpush.msra.mxu0 %v39_v18  ;;  %186 = vmatpush.msra.mxu3 %v88_v19  ;;  %v53_v33 = vld [vmem:[%s654_s1 + $0xc0] sm:$0xff]  ;;  %v35_v34 = vld [vmem:[%s654_s1 + $0x30] sm:$0xff]  ;;  %v84_v35 = vld [vmem:[%s654_s1 + $0x1b8] sm:$0xff] }
   0xd   :  { %167 = vmatpush.msra.mxu2 %v71_v20  ;;  %146 = vmatpush.msra.mxu1 %v56_v21  ;;  %v67_v36 = vld [vmem:[%s654_s1 + $0x130] sm:$0xff]  ;;  %v52_v37 = vld [vmem:[%s654_s1 + $0xb8] sm:$0xff]  ;;  %v34_v38 = vld [vmem:[%s654_s1 + $0x28] sm:$0xff] }
   0xe   :  { %128 = vmatpush.msra.mxu0 %v38_v22  ;;  %187 = vmatpush.msra.mxu3 %v87_v23  ;;  %v83_v39 = vld [vmem:[%s654_s1 + $0x1b0] sm:$0xff]  ;;  %v66_v40 = vld [vmem:[%s654_s1 + $0x128] sm:$0xff]  ;;  %v33_v42 = vld [vmem:[%s654_s1 + $0x20] sm:$0xff] }
   0xf   :  { %168 = vmatpush.msra.mxu2 %v70_v24  ;;  %147 = vmatpush.msra.mxu1 %v55_v25  ;;  %v51_v41 = vld [vmem:[%s654_s1 + $0xb0] sm:$0xff]  ;;  %v82_v43 = vld [vmem:[%s654_s1 + $0x1a8] sm:$0xff]  ;;  %v65_v44 = vld [vmem:[%s654_s1 + $0x120] sm:$0xff] }
  0x10   :  { %129 = vmatpush.msra.mxu0 %v37_v26  ;;  %188 = vmatpush.msra.mxu3 %v86_v27  ;;  %v50_v45 = vld [vmem:[%s654_s1 + $0xa8] sm:$0xff]  ;;  %v27_v46 = vld [vmem:[%s653_s0] sm:$0xff]  ;;  %v32_v47 = vld [vmem:[%s654_s1 + $0x18] sm:$0xff] }
  0x11   :  { %169 = vmatpush.msra.mxu2 %v69_v28  ;;  %148 = vmatpush.msra.mxu1 %v54_v29  ;;  %v81_v48 = vld [vmem:[%s654_s1 + $0x1a0] sm:$0xff]  ;;  %107 = vst [vmem:[#allocation1] ss:$4 sm:$0xff] %v27_v46  ;;  %v31_v49 = vld [vmem:[%s654_s1 + $0x10] sm:$0xff]  ;;  %v64_v50 = vld [vmem:[%s654_s1 + $0x118] sm:$0xff] }
  0x12   :  { %130 = vmatpush.msra.mxu0 %v36_v30  ;;  %189 = vmatpush.msra.mxu3 %v85_v31  ;;  %v49_v51 = vld [vmem:[%s654_s1 + $0xa0] sm:$0xff]  ;;  %v30_v52 = vld [vmem:[%s654_s1 + $0x8] sm:$0xff]  ;;  %v80_v53 = vld [vmem:[%s654_s1 + $0x198] sm:$0xff] }
  0x13   :  { %170 = vmatpush.msra.mxu2 %v68_v32  ;;  %149 = vmatpush.msra.mxu1 %v53_v33  ;;  %v28_v54 = vld [vmem:[%s653_s0 + $0x8] sm:$0x3]  ;;  %v63_v55 = vld [vmem:[%s654_s1 + $0x110] sm:$0xff]  ;;  %v48_v56 = vld [vmem:[%s654_s1 + $0x98] sm:$0xff] }
  0x14   :  { %131 = vmatpush.msra.mxu0 %v35_v34  ;;  %190 = vmatpush.msra.mxu3 %v84_v35  ;;  %109 = vst [vmem:[#allocation1 + $0x20] ss:$4 sm:$0xff] %v28_v54  ;;  %v79_v57 = vld [vmem:[%s654_s1 + $0x190] sm:$0xff]  ;;  %v62_v58 = vld [vmem:[%s654_s1 + $0x108] sm:$0xff] }
  0x15   :  { %171 = vmatpush.msra.mxu2 %v67_v36  ;;  %150 = vmatpush.msra.mxu1 %v52_v37  ;;  %v47_v59 = vld [vmem:[%s654_s1 + $0x90] sm:$0xff] }
  0x16   :  { %132 = vmatpush.msra.mxu0 %v34_v38  ;;  %191 = vmatpush.msra.mxu3 %v83_v39 }
  0x17   :  { %172 = vmatpush.msra.mxu2 %v66_v40  ;;  %151 = vmatpush.msra.mxu1 %v51_v41 }
  0x18   :  { %133 = vmatpush.msra.mxu0 %v33_v42  ;;  %192 = vmatpush.msra.mxu3 %v82_v43 }
  0x19   :  { %173 = vmatpush.msra.mxu2 %v65_v44  ;;  %152 = vmatpush.msra.mxu1 %v50_v45 }
  0x1a   :  { %134 = vmatpush.msra.mxu0 %v32_v47  ;;  %193 = vmatpush.msra.mxu3 %v81_v48 }
  0x1b   :  { %174 = vmatpush.msra.mxu2 %v64_v50  ;;  %153 = vmatpush.msra.mxu1 %v49_v51 }
  0x1c   :  { %135 = vmatpush.msra.mxu0 %v31_v49  ;;  %194 = vmatpush.msra.mxu3 %v80_v53 }
  0x1d   :  { %12 = vsyncpa [#allocation3], 0  ;;  %v29_v60 = vld [vmem:[%s654_s1] sm:$0xff]  ;;  %175 = vmatpush.msra.mxu2 %v63_v55  ;;  %154 = vmatpush.msra.mxu1 %v48_v56  ;;  %v78_v61 = vld [vmem:[%s654_s1 + $0x188] sm:$0xff]  ;;  %vm119_vm0 = vcmask 523264   ;;  %vm265_vm1 = vcmask 261120  }
  0x1e   :  { %136 = vmatpush.msra.mxu0 %v30_v52  ;;  %v100_v62 = vld [vmem:[%s654_s1 + $0x238] sm:$0xff]  ;;  %195 = vmatpush.msra.mxu3 %v79_v57  ;;  %v61_v63 = vld [vmem:[%s654_s1 + $0x100] sm:$0xff]  ;;  %v112_v0 = vld.sshfl [vmem:[#allocation1 + $0x10] sm:$0xff pattern:$0x73625140]  ;;  %s340_s12 = smov [#allocation2]  }
  0x1f   :  { %176 = vmatpush.msra.mxu2 %v62_v58  ;;  %155 = vmatpush.msra.mxu1 %v47_v59  ;;  %v46_v1 = vld [vmem:[%s654_s1 + $0x88] sm:$0xff]  ;;  %v99_v2 = vld [vmem:[%s654_s1 + $0x230] sm:$0xff]  ;;  %v77_v3 = vld [vmem:[%s654_s1 + $0x180] sm:$0xff]  ;;  %s296_s13 = sshll.u32 %s340_s12, 4  ;;  %s298_s16 = sshll.u32 %s660_s7, 4  ;;  %vm289_vm2 = vcmask 9216   ;;  %s297_s13 = int_to_ptr.vmem [resolvable:$true] %s296_s13  ;;  %s299_s16 = int_to_ptr.hbm [resolvable:$true] %s298_s16 }
  0x20   :  { %137 = vmatpush.msra.mxu0 %v29_v60  ;;  %196 = vmatpush.msra.mxu3 %v78_v61  ;;  %v110_v4 = vld.sshfl [vmem:[#allocation1] sm:$0xff pattern:$0x73625140]  ;;  %v113_v5 = vld.sshfl [vmem:[#allocation1 + $0x18] sm:$0xff pattern:$0x73625140] }
  0x21   :  { %177 = vmatpush.msra.mxu2 %v61_v63  ;;  %v98_v6 = vld [vmem:[%s654_s1 + $0x228] sm:$0xff]  ;;  %156 = vmatpush.msra.mxu1 %v46_v1  ;;  %v45_v7 = vld [vmem:[%s654_s1 + $0x80] sm:$0xff]  ;;  %v229_v10 = vld [vmem:[%s656_s3 + $0x38] sm:$0xff] }
  0x22   :  { %210 = vmatpush.msrb.mxu0 %v100_v62  ;;  %178 = vmatmul.f32.vlgmr.msra.gmra.mxu2 %v112_v0  ;;  %v111_v8 = vld.sshfl [vmem:[#allocation1 + $0x8] sm:$0xff pattern:$0x73625140]  ;;  %v97_v9 = vld [vmem:[%s654_s1 + $0x220] sm:$0xff]  ;;  %v96_v11 = vld [vmem:[%s654_s1 + $0x218] sm:$0xff] }
  0x23   :  { %197 = vmatpush.msra.mxu3 %v77_v3  ;;  %138 = vmatmul.f32.vlgmr.msra.gmra.mxu0 %v110_v4  ;;  %v228_v12 = vld [vmem:[%s656_s3 + $0x30] sm:$0xff]  ;;  %v94_v14 = vld [vmem:[%s654_s1 + $0x208] sm:$0xff]  ;;  %v93_v15 = vld [vmem:[%s654_s1 + $0x200] sm:$0xff] }
  0x24   :  { %211 = vmatpush.msrb.mxu0 %v99_v2  ;;  %198 = vmatmul.f32.vlgmr.msra.gmra.mxu3 %v113_v5  ;;  %v95_v13 = vld [vmem:[%s654_s1 + $0x210] sm:$0xff]  ;;  %v114_v16 = vld.sshfl [vmem:[#allocation1 + $0x20] sm:$0xff pattern:$0x73625140]  ;;  %v227_v17 = vld [vmem:[%s656_s3 + $0x28] sm:$0xff] }
  0x25   :  { %157 = vmatpush.msra.mxu1 %v45_v7  ;;  %v226_v18 = vld [vmem:[%s656_s3 + $0x20] sm:$0xff]  ;;  %v225_v19 = vld [vmem:[%s656_s3 + $0x18] sm:$0xff]  ;;  %v224_v20 = vld [vmem:[%s656_s3 + $0x10] sm:$0xff] }
  0x26   :  { %212 = vmatpush.msrb.mxu0 %v98_v6  ;;  %158 = vmatmul.f32.vlgmr.msra.gmra.mxu1 %v111_v8  ;;  %v223_v21 = vld [vmem:[%s656_s3 + $0x8] sm:$0xff]  ;;  %v222_v22 = vld [vmem:[%s656_s3] sm:$0xff]  ;;  %v260_v23 = vld [vmem:[%s658_s5 + $0x18] sm:$0xff] }
  0x27   :  { %245 = vmatpush.msrb.mxu1 %v229_v10  ;;  %v259_v24 = vld [vmem:[%s658_s5 + $0x10] sm:$0xff]  ;;  %281 = vmatpush.msrb.mxu2 %v260_v23  ;;  %v258_v25 = vld [vmem:[%s658_s5 + $0x8] sm:$0xff]  ;;  %v311_v26 = vld [vmem:[%s655_s2] ss:$0 sm:$0xff] }
  0x28   :  { %213 = vmatpush.msrb.mxu0 %v97_v9  ;;  %v257_v37 = vld [vmem:[%s658_s5] sm:$0xff] }
  0x29   :  { %246 = vmatpush.msrb.mxu1 %v228_v12  ;;  %282 = vmatpush.msrb.mxu2 %v259_v24  ;;  %v312_v38 = vld [vmem:[%s657_s4] ss:$0 sm:$0xff] }
  0x2a   :  { %214 = vmatpush.msrb.mxu0 %v96_v11  ;;  %v313_v41 = vld [vmem:[%s659_s6] ss:$0 sm:$0xff] }
  0x2b   :  { %247 = vmatpush.msrb.mxu1 %v227_v17  ;;  %283 = vmatpush.msrb.mxu2 %v258_v25 }
  0x2c   :  { %215 = vmatpush.msrb.mxu0 %v95_v13 }
  0x2d   :  { %248 = vmatpush.msrb.mxu1 %v226_v18  ;;  %284 = vmatpush.msrb.mxu2 %v257_v37 }
  0x2e   :  { %216 = vmatpush.msrb.mxu0 %v94_v14 }
  0x2f   :  { %249 = vmatpush.msrb.mxu1 %v225_v19 }
  0x30   :  { %217 = vmatpush.msrb.mxu0 %v93_v15 }
  0x31   :  { %307 = vmatmul.msk.f32.vlgmr.msrb.gmra.mxu0 %vm119_vm0, %v114_v16  ;;  %250 = vmatpush.msrb.mxu1 %v224_v20 }
  0x33   :  { %251 = vmatpush.msrb.mxu1 %v223_v21 }
  0x35   :  { %252 = vmatpush.msrb.mxu1 %v222_v22 }
  0xa0   :  { %v139_v27 = vpop.f32.mrf.mxu0 }
  0xa1   :  { %v140_v28 = vadd.f32 %v311_v26, %v139_v27 }
  0xa3   :  { %v159_v29 = vpop.f32.mrf.mxu1 }
  0xa4   :  { %v160_v30 = vadd.f32 %v159_v29, %v140_v28 }
  0xa5   :  { %v179_v31 = vpop.f32.mrf.mxu2 }
  0xa6   :  { %v180_v32 = vadd.f32 %v179_v31, %v160_v30 }
  0xa7   :  { %v199_v33 = vpop.f32.mrf.mxu3 }
  0xa8   :  { %v200_v34 = vadd.f32 %v199_v33, %v180_v32 }
  0xae   :  { %v219_v35 = vpop.f32.mrf.mxu0 }
  0xaf   :  { %v220_v36 = vadd.f32 %v219_v35, %v200_v34 }
  0xb1   :  { %308 = vmatmul.msk.f32.vlgmr.msrb.gmra.mxu1 %vm119_vm0, %v220_v36 }
 0x12e   :  { %v254_v39 = vpop.f32.mrf.mxu1 }
 0x12f   :  { %v255_v40 = vadd.f32 %v312_v38, %v254_v39 }
 0x131   :  { %309 = vmatmul.msk.f32.vlgmr.msrb.gmra.mxu2 %vm265_vm1, %v255_v40 }
 0x1b4   :  { %v286_v42 = vpop.f32.mrf.mxu2 }
 0x1b5   :  { %v287_v43 = vadd.f32 %v313_v41, %v286_v42 }
 0x1b7   :  { %290 = vst.msk [vmem:[#allocation2] sm:$0x3] %vm289_vm2, %v287_v43 }
 0x1b8   :  { %301 = dma.vmem_to_hbm [thread:$0]  %s297_s13, 32, %s299_s16, [#allocation3]  }
 0x1b9   :  { %338 = dma.done.wait [#allocation3], 32  }
 0x1ba   :  { %339 = vsyncadd [#allocation3], 4294967264 }
 0x1bb   :  { %306 = vsyncpa [#allocation3], 1 }

</bundles_post_ra>
